<compile_context>
chip_gen: v6e
topology: v6e:2x2x1
jax: 0.10.0
libtpu: 0.0.40
codegen_flags: <defaults>
</compile_context>

<pallas_src>
import functools

import jax
import jax.numpy as jnp
from jax import lax
from jax.experimental import pallas as pl
from jax.experimental.pallas import tpu as pltpu


def _round_up(x, m):
    return (x + m - 1) // m * m


def _vmem_budget_bytes():
    """Generation-aware VMEM budget (leave ~20% headroom under the physical capacity)."""
    try:
        cap = int(pltpu.get_tpu_info().vmem_capacity_bytes)
    except Exception:
        cap = 64 * 1024 * 1024          # conservative default (v7x-sized)
    return max(32 * 1024 * 1024, int(cap * 0.8))


def _choose_tiles(ho, wo, wp, kh, kw, cin_pad, cout_pad, in_itemsize, out_itemsize,
                  budget, tile_h=None, cout_blk=None):
    """Pick (tile_h, cout_blk) so the per-step VMEM footprint fits the budget."""
    if cout_blk is None:
        cout_blk = 256 if (cout_pad % 256 == 0 and cout_pad >= 256) else 128
    cout_blk = min(cout_blk, cout_pad)
    assert cout_pad % cout_blk == 0

    def vmem_est(th):
        halo = th + kh - 1
        b = 2 * halo * wp * cin_pad * in_itemsize                 # input halo tile, x2 buffers
        b += 2 * kh * kw * cin_pad * cout_blk * in_itemsize       # weight taps (worst case x2)
        b += 2 * th * wo * cout_blk * out_itemsize                # output tile, x2 buffers
        b += th * wo * cout_blk * 4                               # f32 accumulator scratch
        return b + (2 << 20)                                      # slack for BN affine / temps

    if tile_h is None:
        # Larger row tiles on 128-MiB parts (v5e/v6e), smaller on 64-MiB v7x.
        target_rows = 2048 if budget >= (80 << 20) else (1024 if budget >= (40 << 20) else 512)
        tile_h = max(1, min(ho, target_rows // max(1, wo)))
        if ho >= 2:                                # keep >=2 row tiles so v7x megacore has work
            tile_h = min(tile_h, -(-ho // 2))
        while tile_h > 1 and vmem_est(tile_h) > budget:
            tile_h = max(1, tile_h // 2)
    return tile_h, cout_blk


def _conv_block_kernel(x_ref, w_ref, scale_ref, shift_ref, o_ref, acc_ref, *,
                       kh_size, kw_size, use_bn_act):
    # x_ref:     (tile_h + KH - 1, Wp, Cin_pad)   halo input window (N / row-tile dims squeezed)
    # w_ref:     (KH*KW, Cin_pad, Cout_blk)       per-tap weight slabs for this Cout block
    # scale_ref: (1, Cout_blk)   BN scale  (gamma / sqrt(var + eps))
    # shift_ref: (1, Cout_blk)   BN shift  (beta - mean * scale)
    # o_ref:     (tile_h, Wo, Cout_blk)           lane-dense output tile (Cout_blk % 128 == 0)
    # acc_ref:   (tile_h * Wo, Cout_blk) f32      VMEM accumulator
    tile_h, wo, cout_blk = o_ref.shape
    cin_pad = x_ref.shape[-1]

    # Per-tap matmuls (K = Cin_pad >= 128): no im2col scratch write/read, MXU-fed directly.
    for tap in range(kh_size * kw_size):
        kh, kw = divmod(tap, kw_size)
        xs = x_ref[pl.ds(kh, tile_h), pl.ds(kw, wo), :].reshape(tile_h * wo, cin_pad)
        p = jnp.dot(xs, w_ref[tap], preferred_element_type=jnp.float32)
        if tap == 0:
            acc_ref[...] = p
        else:
            acc_ref[...] += p

    acc = acc_ref[...]
    if use_bn_act:
        acc = acc * scale_ref[...] + shift_ref[...]      # fused inference BatchNorm (f32)
        acc = jnp.maximum(acc, 0.0)                      # ReLU
    o_ref[...] = acc.reshape(tile_h, wo, cout_blk).astype(o_ref.dtype)


def prepare_conv_block_params(weight, bn_gamma, bn_beta, bn_mean, bn_var, *,
                              use_bn_act=True, eps=1e-5, compute_dtype=jnp.bfloat16):
    """Per-layer, call-once preparation: channel pad, tap reshape, BN fold, dtype cast."""
    kh, kw, cin, cout = weight.shape
    cin_pad = max(128, _round_up(cin, 128))      # full-lane K for every tap matmul
    cout_pad = max(128, _round_up(cout, 128))    # lane-dense output stores

    # NOTE: this is an explicit downcast of the conv weights to `compute_dtype` (bf16 by
    # default) -- MXU accumulation stays f32.  Pass compute_dtype=jnp.float32 for parity.
    w = jnp.pad(weight.astype(compute_dtype),
                ((0, 0), (0, 0), (0, cin_pad - cin), (0, cout_pad - cout)))
    w_taps = w.reshape(kh * kw, cin_pad, cout_pad)

    if use_bn_act:
        s = bn_gamma.astype(jnp.float32) / jnp.sqrt(bn_var.astype(jnp.float32) + eps)
        b = bn_beta.astype(jnp.float32) - bn_mean.astype(jnp.float32) * s
    else:
        s = jnp.ones((cout,), jnp.float32)
        b = jnp.zeros((cout,), jnp.float32)
    scale = jnp.pad(s, (0, cout_pad - cout)).reshape(1, cout_pad)
    shift = jnp.pad(b, (0, cout_pad - cout)).reshape(1, cout_pad)

    return dict(w_taps=w_taps, scale=scale, shift=shift, kh=kh, kw=kw,
                cin=cin, cout=cout, cin_pad=cin_pad, cout_pad=cout_pad,
                use_bn_act=use_bn_act, compute_dtype=compute_dtype)


# Tri-state cache: None = unknown, True/False = whether pipeline_mode=pl.Buffered(1) works.
_SINGLE_BUFFER_OK = {"ok": None}


def conv_block_apply_nhwc(x_nhwc, params, *, stride=1, padding=1, out_dtype=None,
                          tile_h=None, cout_blk=None, keep_padded_cout=False):
    """conv_block forward on NHWC input using pre-prepared params.  Returns NHWC."""
    # TODO(synk): stride > 1, dilation > 1 and groups > 1 are not implemented; SSFPN's
    # conv_block is exercised here with stride=1, dilation=1, groups=1, bias=False.
    assert stride == 1, "only stride=1 is implemented"
    n, h, w, cin = x_nhwc.shape
    assert cin == params["cin"], (cin, params["cin"])
    kh, kw = params["kh"], params["kw"]
    cin_pad, cout_pad = params["cin_pad"], params["cout_pad"]
    cdt = params["compute_dtype"]
    use_bn_act = params["use_bn_act"]
    out_dtype = x_nhwc.dtype if out_dtype is None else out_dtype

    hp, wp = h + 2 * padding, w + 2 * padding
    ho, wo = hp - kh + 1, wp - kw + 1

    budget = _vmem_budget_bytes()
    tile_h, cout_blk = _choose_tiles(ho, wo, wp, kh, kw, cin_pad, cout_pad,
                                     jnp.dtype(cdt).itemsize, jnp.dtype(out_dtype).itemsize,
                                     budget, tile_h=tile_h, cout_blk=cout_blk)
    nh = -(-ho // tile_h)
    ho_pad = nh * tile_h
    extra_h = ho_pad - ho
    nc = cout_pad // cout_blk
    halo = tile_h + kh - 1

    # Zero halo + Ho-padding + channel pad + compute-dtype cast fused into one XLA pad.
    # TODO(synk): in-kernel halo masking would remove this extra HBM pass entirely.
    xp = jnp.pad(x_nhwc.astype(cdt),
                 ((0, 0), (padding, padding + extra_h), (padding, padding),
                  (0, cin_pad - cin)))
    # Shingled overlapping row windows: (N, nh, tile_h+KH-1, Wp, Cin_pad).  Each grid step
    # only needs its own halo tile in VMEM (instead of the whole image being resident).
    win = jnp.arange(nh)[:, None] * tile_h + jnp.arange(halo)[None, :]
    xs = xp[:, win]

    kernel = functools.partial(_conv_block_kernel, kh_size=kh, kw_size=kw,
                               use_bn_act=use_bn_act)

    def run(single_buffer_invariants):
        inv = dict(pipeline_mode=pl.Buffered(1)) if single_buffer_invariants else {}
        grid_spec = pltpu.PrefetchScalarGridSpec(
            num_scalar_prefetch=0,
            # batch x Cout blocks x output-row tiles; row tiles innermost so the weight
            # block (which only depends on the Cout index) is not re-fetched every step.
            grid=(n, nc, nh),
            in_specs=[
                # Halo input window for this row tile (invariant in the Cout axis).
                pl.BlockSpec((None, None, halo, wp, cin_pad),
                             lambda b, c, t: (b, t, 0, 0, 0)),
                # Weight taps / BN affine for this Cout block (grid-invariant when nc==1).
                pl.BlockSpec((kh * kw, cin_pad, cout_blk),
                             lambda b, c, t: (0, 0, c), **inv),
                pl.BlockSpec((1, cout_blk), lambda b, c, t: (0, c), **inv),
                pl.BlockSpec((1, cout_blk), lambda b, c, t: (0, c), **inv),
            ],
            out_specs=pl.BlockSpec((None, tile_h, wo, cout_blk),
                                   lambda b, c, t: (b, t, 0, c)),
            scratch_shapes=[pltpu.VMEM((tile_h * wo, cout_blk), jnp.float32)],
        )
        return pl.pallas_call(
            kernel,
            out_shape=jax.ShapeDtypeStruct((n, ho_pad, wo, cout_pad), out_dtype),
            grid_spec=grid_spec,
            compiler_params=pltpu.CompilerParams(
                dimension_semantics=("parallel", "parallel", "parallel"),
                vmem_limit_bytes=budget,
            ),
        )(xs, params["w_taps"], params["scale"], params["shift"])

    want_sb = (nc == 1) and hasattr(pl, "Buffered") and _SINGLE_BUFFER_OK["ok"] is not False
    if want_sb:
        try:
            out = run(True)
            _SINGLE_BUFFER_OK["ok"] = True
        except Exception:
            # This JAX build rejects single-buffered invariant operands; fall back to the
            # default double-buffered specs (correctness unaffected).
            _SINGLE_BUFFER_OK["ok"] = False
            out = run(False)
    else:
        out = run(False)

    out = out[:, :ho]
    if not keep_padded_cout:
        # TODO(synk): keep channels padded to 128 across consecutive SSFPN layers so
        # narrow-Cout stem/head layers do not pay this slice (and the padded write) twice.
        out = out[..., :params["cout"]]
    return out


def conv_block_forward(x_nchw, weight, bn_gamma, bn_beta, bn_mean, bn_var, *,
                       stride=1, padding=1, use_bn_act=True, eps=1e-5,
                       compute_dtype=jnp.bfloat16, out_dtype=None, tile_h=None):
    """PyTorch-parity wrapper: NCHW in / NCHW out, weight (KH, KW, Cin, Cout)."""
    # TODO(synk): at inference, call prepare_conv_block_params once per layer and keep
    # activations NHWC across SSFPN layers; this wrapper re-prepares and transposes per
    # call only to match the nn.Conv2d interface for the test below.
    params = prepare_conv_block_params(weight, bn_gamma, bn_beta, bn_mean, bn_var,
                                       use_bn_act=use_bn_act, eps=eps,
                                       compute_dtype=compute_dtype)
    x = jnp.transpose(x_nchw, (0, 2, 3, 1))
    out = conv_block_apply_nhwc(x, params, stride=stride, padding=padding,
                                out_dtype=out_dtype, tile_h=tile_h)
    return jnp.transpose(out, (0, 3, 1, 2))


if __name__ == "__main__":
    key = jax.random.PRNGKey(0)
    k1, k2, k3, k4, k5, k6 = jax.random.split(key, 6)

    # conv_block(in_channels=4, out_channels=8, kernel_size=3, stride=1, padding=1, bn_act=True)
    N, Cin, H, W = 2, 4, 16, 16
    Cout, KH, KW = 8, 3, 3
    eps = 1e-5

    x = jax.random.normal(k1, (N, Cin, H, W), jnp.float32)
    weight = jax.random.normal(k2, (KH, KW, Cin, Cout), jnp.float32) * 0.1
    gamma = 1.0 + 0.1 * jax.random.normal(k3, (Cout,), jnp.float32)
    beta = 0.1 * jax.random.normal(k4, (Cout,), jnp.float32)
    run_mean = 0.1 * jax.random.normal(k5, (Cout,), jnp.float32)
    run_var = jax.random.uniform(k6, (Cout,), jnp.float32, minval=0.5, maxval=1.5)

    # Pure-JAX reference (same math, XLA conv, f32).
    w_oihw = jnp.transpose(weight, (3, 2, 0, 1))
    conv_ref = lax.conv_general_dilated(x, w_oihw, window_strides=(1, 1),
                                        padding=((1, 1), (1, 1)),
                                        dimension_numbers=('NCHW', 'OIHW', 'NCHW'))
    r_scale = gamma / jnp.sqrt(run_var + eps)
    r_shift = beta - run_mean * r_scale
    ref_bn = jnp.maximum(conv_ref * r_scale[None, :, None, None]
                         + r_shift[None, :, None, None], 0.0)

    # 1) Default path (bf16 compute per the perf review) -- loose tolerance vs f32 reference.
    out_bf16 = conv_block_forward(x, weight, gamma, beta, run_mean, run_var,
                                  stride=1, padding=1, use_bn_act=True, eps=eps)
    out_bf16 = jax.block_until_ready(out_bf16)
    assert out_bf16.shape == (N, Cout, H, W)
    assert jnp.allclose(out_bf16, ref_bn, atol=5e-2, rtol=5e-2), \
        f"bf16 bn_act=True: max abs err = {float(jnp.max(jnp.abs(out_bf16 - ref_bn)))}"

    # 2) f32 compute path -- tight tolerance (validates the kernel math exactly).
    out_f32 = conv_block_forward(x, weight, gamma, beta, run_mean, run_var,
                                 stride=1, padding=1, use_bn_act=True, eps=eps,
                                 compute_dtype=jnp.float32)
    out_f32 = jax.block_until_ready(out_f32)
    assert jnp.allclose(out_f32, ref_bn, atol=1e-4, rtol=1e-4), \
        f"f32 bn_act=True: max abs err = {float(jnp.max(jnp.abs(out_f32 - ref_bn)))}"

    # 3) bn_act=False (plain conv) path.
    out_nc = conv_block_forward(x, weight, gamma, beta, run_mean, run_var,
                                stride=1, padding=1, use_bn_act=False, eps=eps,
                                compute_dtype=jnp.float32)
    out_nc = jax.block_until_ready(out_nc)
    assert jnp.allclose(out_nc, conv_ref, atol=1e-4, rtol=1e-4), \
        f"bn_act=False: max abs err = {float(jnp.max(jnp.abs(out_nc - conv_ref)))}"

    # 4) Non-divisible row tiling (Ho % tile_h != 0) exercises the Ho-padding path.
    out_t3 = conv_block_forward(x, weight, gamma, beta, run_mean, run_var,
                                stride=1, padding=1, use_bn_act=True, eps=eps,
                                compute_dtype=jnp.float32, tile_h=3)
    out_t3 = jax.block_until_ready(out_t3)
    assert jnp.allclose(out_t3, ref_bn, atol=1e-4, rtol=1e-4), \
        f"tile_h=3: max abs err = {float(jnp.max(jnp.abs(out_t3 - ref_bn)))}"

    print("KERNEL_OK")
</pallas_src>

<mosaic_0001>
module attributes {stable_mosaic.version = 11 : i64} {
  func.func @_conv_block_kernel(%arg0: i32, %arg1: i32, %arg2: i32, %arg3: memref<1x1x10x18x128xbf16, #tpu.memory_space<vmem>>, %arg4: memref<9x128x128xbf16, #tpu.memory_space<vmem>>, %arg5: memref<1x128xf32, #tpu.memory_space<vmem>>, %arg6: memref<1x128xf32, #tpu.memory_space<vmem>>, %arg7: memref<1x8x16x128xf32, #tpu.memory_space<vmem>>, %arg8: memref<128x128xf32, #tpu.memory_space<vmem>>) attributes {dimension_semantics = [#tpu.dimension_semantics<parallel>, #tpu.dimension_semantics<parallel>, #tpu.dimension_semantics<parallel>], iteration_bounds = array<i64: 2, 1, 2>, scalar_prefetch = 0 : i64, scratch_operands = 1 : i64, tpu.core_type = #tpu.core_type<tc>, window_params = [{transform_indices = @transform_0, window_bounds = array<i64: 1, 1, 10, 18, 128>}, {pipeline_mode = #tpu.pipeline_mode<synchronous>, transform_indices = @transform_1, window_bounds = array<i64: 9, 128, 128>}, {pipeline_mode = #tpu.pipeline_mode<synchronous>, transform_indices = @transform_2, window_bounds = array<i64: 1, 128>}, {pipeline_mode = #tpu.pipeline_mode<synchronous>, transform_indices = @transform_3, window_bounds = array<i64: 1, 128>}, {transform_indices = @transform_4, window_bounds = array<i64: 1, 8, 16, 128>}]} {
    %c0 = arith.constant 0 : index
    %c0_0 = arith.constant 0 : index
    %c0_1 = arith.constant 0 : index
    %c0_2 = arith.constant 0 : index
    %c0_3 = arith.constant 0 : index
    %0 = vector.load %arg3[%c0, %c0_0, %c0_1, %c0_2, %c0_3] : memref<1x1x10x18x128xbf16, #tpu.memory_space<vmem>>, vector<1x1x8x16x128xbf16>
    %1 = vector.shape_cast %0 : vector<1x1x8x16x128xbf16> to vector<8x16x128xbf16>
    %2 = vector.shape_cast %1 : vector<8x16x128xbf16> to vector<128x128xbf16>
    %c0_4 = arith.constant 0 : index
    %c0_5 = arith.constant 0 : index
    %c0_6 = arith.constant 0 : index
    %3 = vector.load %arg4[%c0_4, %c0_5, %c0_6] : memref<9x128x128xbf16, #tpu.memory_space<vmem>>, vector<1x128x128xbf16>
    %4 = vector.shape_cast %3 : vector<1x128x128xbf16> to vector<128x128xbf16>
    %cst = arith.constant dense<0.000000e+00> : vector<128x128xf32>
    %5 = tpu.matmul %2, %4, %cst {dimension_numbers = #tpu.dot_dimension_numbers<[1], [0], [0], [1], [0, 0, 1, 1], [], []>} : vector<128x128xbf16>, vector<128x128xbf16>, vector<128x128xf32> -> vector<128x128xf32>
    %c0_7 = arith.constant 0 : index
    %c0_8 = arith.constant 0 : index
    %6 = vector.load %arg8[%c0_7, %c0_8] : memref<128x128xf32, #tpu.memory_space<vmem>>, vector<128x128xf32>
    tpu.vector_store %arg8[%c0_7, %c0_8], %5 {strides = array<i32>} : memref<128x128xf32, #tpu.memory_space<vmem>>, vector<128x128xf32>,
    %c0_9 = arith.constant 0 : index
    %c0_10 = arith.constant 0 : index
    %c0_11 = arith.constant 0 : index
    %c1 = arith.constant 1 : index
    %c0_12 = arith.constant 0 : index
    %7 = vector.load %arg3[%c0_9, %c0_10, %c0_11, %c1, %c0_12] : memref<1x1x10x18x128xbf16, #tpu.memory_space<vmem>>, vector<1x1x8x16x128xbf16>
    %8 = vector.shape_cast %7 : vector<1x1x8x16x128xbf16> to vector<8x16x128xbf16>
    %9 = vector.shape_cast %8 : vector<8x16x128xbf16> to vector<128x128xbf16>
    %c1_13 = arith.constant 1 : index
    %c0_14 = arith.constant 0 : index
    %c0_15 = arith.constant 0 : index
    %10 = vector.load %arg4[%c1_13, %c0_14, %c0_15] : memref<9x128x128xbf16, #tpu.memory_space<vmem>>, vector<1x128x128xbf16>
    %11 = vector.shape_cast %10 : vector<1x128x128xbf16> to vector<128x128xbf16>
    %cst_16 = arith.constant dense<0.000000e+00> : vector<128x128xf32>
    %12 = tpu.matmul %9, %11, %cst_16 {dimension_numbers = #tpu.dot_dimension_numbers<[1], [0], [0], [1], [0, 0, 1, 1], [], []>} : vector<128x128xbf16>, vector<128x128xbf16>, vector<128x128xf32> -> vector<128x128xf32>
    %c0_17 = arith.constant 0 : index
    %c0_18 = arith.constant 0 : index
    %13 = vector.load %arg8[%c0_17, %c0_18] : memref<128x128xf32, #tpu.memory_space<vmem>>, vector<128x128xf32>
    %14 = arith.addf %13, %12 : vector<128x128xf32>
    %c0_19 = arith.constant 0 : index
    %c0_20 = arith.constant 0 : index
    %15 = vector.load %arg8[%c0_19, %c0_20] : memref<128x128xf32, #tpu.memory_space<vmem>>, vector<128x128xf32>
    tpu.vector_store %arg8[%c0_19, %c0_20], %14 {strides = array<i32>} : memref<128x128xf32, #tpu.memory_space<vmem>>, vector<128x128xf32>,
    %c0_21 = arith.constant 0 : index
    %c0_22 = arith.constant 0 : index
    %c0_23 = arith.constant 0 : index
    %c2 = arith.constant 2 : index
    %c0_24 = arith.constant 0 : index
    %16 = vector.load %arg3[%c0_21, %c0_22, %c0_23, %c2, %c0_24] : memref<1x1x10x18x128xbf16, #tpu.memory_space<vmem>>, vector<1x1x8x16x128xbf16>
    %17 = vector.shape_cast %16 : vector<1x1x8x16x128xbf16> to vector<8x16x128xbf16>
    %18 = vector.shape_cast %17 : vector<8x16x128xbf16> to vector<128x128xbf16>
    %c2_25 = arith.constant 2 : index
    %c0_26 = arith.constant 0 : index
    %c0_27 = arith.constant 0 : index
    %19 = vector.load %arg4[%c2_25, %c0_26, %c0_27] : memref<9x128x128xbf16, #tpu.memory_space<vmem>>, vector<1x128x128xbf16>
    %20 = vector.shape_cast %19 : vector<1x128x128xbf16> to vector<128x128xbf16>
    %cst_28 = arith.constant dense<0.000000e+00> : vector<128x128xf32>
    %21 = tpu.matmul %18, %20, %cst_28 {dimension_numbers = #tpu.dot_dimension_numbers<[1], [0], [0], [1], [0, 0, 1, 1], [], []>} : vector<128x128xbf16>, vector<128x128xbf16>, vector<128x128xf32> -> vector<128x128xf32>
    %c0_29 = arith.constant 0 : index
    %c0_30 = arith.constant 0 : index
    %22 = vector.load %arg8[%c0_29, %c0_30] : memref<128x128xf32, #tpu.memory_space<vmem>>, vector<128x128xf32>
    %23 = arith.addf %22, %21 : vector<128x128xf32>
    %c0_31 = arith.constant 0 : index
    %c0_32 = arith.constant 0 : index
    %24 = vector.load %arg8[%c0_31, %c0_32] : memref<128x128xf32, #tpu.memory_space<vmem>>, vector<128x128xf32>
    tpu.vector_store %arg8[%c0_31, %c0_32], %23 {strides = array<i32>} : memref<128x128xf32, #tpu.memory_space<vmem>>, vector<128x128xf32>,
    %c0_33 = arith.constant 0 : index
    %c0_34 = arith.constant 0 : index
    %c1_35 = arith.constant 1 : index
    %c0_36 = arith.constant 0 : index
    %c0_37 = arith.constant 0 : index
    %25 = vector.load %arg3[%c0_33, %c0_34, %c1_35, %c0_36, %c0_37] : memref<1x1x10x18x128xbf16, #tpu.memory_space<vmem>>, vector<1x1x8x16x128xbf16>
    %26 = vector.shape_cast %25 : vector<1x1x8x16x128xbf16> to vector<8x16x128xbf16>
    %27 = vector.shape_cast %26 : vector<8x16x128xbf16> to vector<128x128xbf16>
    %c3 = arith.constant 3 : index
    %c0_38 = arith.constant 0 : index
    %c0_39 = arith.constant 0 : index
    %28 = vector.load %arg4[%c3, %c0_38, %c0_39] : memref<9x128x128xbf16, #tpu.memory_space<vmem>>, vector<1x128x128xbf16>
    %29 = vector.shape_cast %28 : vector<1x128x128xbf16> to vector<128x128xbf16>
    %cst_40 = arith.constant dense<0.000000e+00> : vector<128x128xf32>
    %30 = tpu.matmul %27, %29, %cst_40 {dimension_numbers = #tpu.dot_dimension_numbers<[1], [0], [0], [1], [0, 0, 1, 1], [], []>} : vector<128x128xbf16>, vector<128x128xbf16>, vector<128x128xf32> -> vector<128x128xf32>
    %c0_41 = arith.constant 0 : index
    %c0_42 = arith.constant 0 : index
    %31 = vector.load %arg8[%c0_41, %c0_42] : memref<128x128xf32, #tpu.memory_space<vmem>>, vector<128x128xf32>
    %32 = arith.addf %31, %30 : vector<128x128xf32>
    %c0_43 = arith.constant 0 : index
    %c0_44 = arith.constant 0 : index
    %33 = vector.load %arg8[%c0_43, %c0_44] : memref<128x128xf32, #tpu.memory_space<vmem>>, vector<128x128xf32>
    tpu.vector_store %arg8[%c0_43, %c0_44], %32 {strides = array<i32>} : memref<128x128xf32, #tpu.memory_space<vmem>>, vector<128x128xf32>,
    %c0_45 = arith.constant 0 : index
    %c0_46 = arith.constant 0 : index
    %c1_47 = arith.constant 1 : index
    %c1_48 = arith.constant 1 : index
    %c0_49 = arith.constant 0 : index
    %34 = vector.load %arg3[%c0_45, %c0_46, %c1_47, %c1_48, %c0_49] : memref<1x1x10x18x128xbf16, #tpu.memory_space<vmem>>, vector<1x1x8x16x128xbf16>
    %35 = vector.shape_cast %34 : vector<1x1x8x16x128xbf16> to vector<8x16x128xbf16>
    %36 = vector.shape_cast %35 : vector<8x16x128xbf16> to vector<128x128xbf16>
    %c4 = arith.constant 4 : index
    %c0_50 = arith.constant 0 : index
    %c0_51 = arith.constant 0 : index
    %37 = vector.load %arg4[%c4, %c0_50, %c0_51] : memref<9x128x128xbf16, #tpu.memory_space<vmem>>, vector<1x128x128xbf16>
    %38 = vector.shape_cast %37 : vector<1x128x128xbf16> to vector<128x128xbf16>
    %cst_52 = arith.constant dense<0.000000e+00> : vector<128x128xf32>
    %39 = tpu.matmul %36, %38, %cst_52 {dimension_numbers = #tpu.dot_dimension_numbers<[1], [0], [0], [1], [0, 0, 1, 1], [], []>} : vector<128x128xbf16>, vector<128x128xbf16>, vector<128x128xf32> -> vector<128x128xf32>
    %c0_53 = arith.constant 0 : index
    %c0_54 = arith.constant 0 : index
    %40 = vector.load %arg8[%c0_53, %c0_54] : memref<128x128xf32, #tpu.memory_space<vmem>>, vector<128x128xf32>
    %41 = arith.addf %40, %39 : vector<128x128xf32>
    %c0_55 = arith.constant 0 : index
    %c0_56 = arith.constant 0 : index
    %42 = vector.load %arg8[%c0_55, %c0_56] : memref<128x128xf32, #tpu.memory_space<vmem>>, vector<128x128xf32>
    tpu.vector_store %arg8[%c0_55, %c0_56], %41 {strides = array<i32>} : memref<128x128xf32, #tpu.memory_space<vmem>>, vector<128x128xf32>,
    %c0_57 = arith.constant 0 : index
    %c0_58 = arith.constant 0 : index
    %c1_59 = arith.constant 1 : index
    %c2_60 = arith.constant 2 : index
    %c0_61 = arith.constant 0 : index
    %43 = vector.load %arg3[%c0_57, %c0_58, %c1_59, %c2_60, %c0_61] : memref<1x1x10x18x128xbf16, #tpu.memory_space<vmem>>, vector<1x1x8x16x128xbf16>
    %44 = vector.shape_cast %43 : vector<1x1x8x16x128xbf16> to vector<8x16x128xbf16>
    %45 = vector.shape_cast %44 : vector<8x16x128xbf16> to vector<128x128xbf16>
    %c5 = arith.constant 5 : index
    %c0_62 = arith.constant 0 : index
    %c0_63 = arith.constant 0 : index
    %46 = vector.load %arg4[%c5, %c0_62, %c0_63] : memref<9x128x128xbf16, #tpu.memory_space<vmem>>, vector<1x128x128xbf16>
    %47 = vector.shape_cast %46 : vector<1x128x128xbf16> to vector<128x128xbf16>
    %cst_64 = arith.constant dense<0.000000e+00> : vector<128x128xf32>
    %48 = tpu.matmul %45, %47, %cst_64 {dimension_numbers = #tpu.dot_dimension_numbers<[1], [0], [0], [1], [0, 0, 1, 1], [], []>} : vector<128x128xbf16>, vector<128x128xbf16>, vector<128x128xf32> -> vector<128x128xf32>
    %c0_65 = arith.constant 0 : index
    %c0_66 = arith.constant 0 : index
    %49 = vector.load %arg8[%c0_65, %c0_66] : memref<128x128xf32, #tpu.memory_space<vmem>>, vector<128x128xf32>
    %50 = arith.addf %49, %48 : vector<128x128xf32>
    %c0_67 = arith.constant 0 : index
    %c0_68 = arith.constant 0 : index
    %51 = vector.load %arg8[%c0_67, %c0_68] : memref<128x128xf32, #tpu.memory_space<vmem>>, vector<128x128xf32>
    tpu.vector_store %arg8[%c0_67, %c0_68], %50 {strides = array<i32>} : memref<128x128xf32, #tpu.memory_space<vmem>>, vector<128x128xf32>,
    %c0_69 = arith.constant 0 : index
    %c0_70 = arith.constant 0 : index
    %c2_71 = arith.constant 2 : index
    %c0_72 = arith.constant 0 : index
    %c0_73 = arith.constant 0 : index
    %52 = vector.load %arg3[%c0_69, %c0_70, %c2_71, %c0_72, %c0_73] : memref<1x1x10x18x128xbf16, #tpu.memory_space<vmem>>, vector<1x1x8x16x128xbf16>
    %53 = vector.shape_cast %52 : vector<1x1x8x16x128xbf16> to vector<8x16x128xbf16>
    %54 = vector.shape_cast %53 : vector<8x16x128xbf16> to vector<128x128xbf16>
    %c6 = arith.constant 6 : index
    %c0_74 = arith.constant 0 : index
    %c0_75 = arith.constant 0 : index
    %55 = vector.load %arg4[%c6, %c0_74, %c0_75] : memref<9x128x128xbf16, #tpu.memory_space<vmem>>, vector<1x128x128xbf16>
    %56 = vector.shape_cast %55 : vector<1x128x128xbf16> to vector<128x128xbf16>
    %cst_76 = arith.constant dense<0.000000e+00> : vector<128x128xf32>
    %57 = tpu.matmul %54, %56, %cst_76 {dimension_numbers = #tpu.dot_dimension_numbers<[1], [0], [0], [1], [0, 0, 1, 1], [], []>} : vector<128x128xbf16>, vector<128x128xbf16>, vector<128x128xf32> -> vector<128x128xf32>
    %c0_77 = arith.constant 0 : index
    %c0_78 = arith.constant 0 : index
    %58 = vector.load %arg8[%c0_77, %c0_78] : memref<128x128xf32, #tpu.memory_space<vmem>>, vector<128x128xf32>
    %59 = arith.addf %58, %57 : vector<128x128xf32>
    %c0_79 = arith.constant 0 : index
    %c0_80 = arith.constant 0 : index
    %60 = vector.load %arg8[%c0_79, %c0_80] : memref<128x128xf32, #tpu.memory_space<vmem>>, vector<128x128xf32>
    tpu.vector_store %arg8[%c0_79, %c0_80], %59 {strides = array<i32>} : memref<128x128xf32, #tpu.memory_space<vmem>>, vector<128x128xf32>,
    %c0_81 = arith.constant 0 : index
    %c0_82 = arith.constant 0 : index
    %c2_83 = arith.constant 2 : index
    %c1_84 = arith.constant 1 : index
    %c0_85 = arith.constant 0 : index
    %61 = vector.load %arg3[%c0_81, %c0_82, %c2_83, %c1_84, %c0_85] : memref<1x1x10x18x128xbf16, #tpu.memory_space<vmem>>, vector<1x1x8x16x128xbf16>
    %62 = vector.shape_cast %61 : vector<1x1x8x16x128xbf16> to vector<8x16x128xbf16>
    %63 = vector.shape_cast %62 : vector<8x16x128xbf16> to vector<128x128xbf16>
    %c7 = arith.constant 7 : index
    %c0_86 = arith.constant 0 : index
    %c0_87 = arith.constant 0 : index
    %64 = vector.load %arg4[%c7, %c0_86, %c0_87] : memref<9x128x128xbf16, #tpu.memory_space<vmem>>, vector<1x128x128xbf16>
    %65 = vector.shape_cast %64 : vector<1x128x128xbf16> to vector<128x128xbf16>
    %cst_88 = arith.constant dense<0.000000e+00> : vector<128x128xf32>
    %66 = tpu.matmul %63, %65, %cst_88 {dimension_numbers = #tpu.dot_dimension_numbers<[1], [0], [0], [1], [0, 0, 1, 1], [], []>} : vector<128x128xbf16>, vector<128x128xbf16>, vector<128x128xf32> -> vector<128x128xf32>
    %c0_89 = arith.constant 0 : index
    %c0_90 = arith.constant 0 : index
    %67 = vector.load %arg8[%c0_89, %c0_90] : memref<128x128xf32, #tpu.memory_space<vmem>>, vector<128x128xf32>
    %68 = arith.addf %67, %66 : vector<128x128xf32>
    %c0_91 = arith.constant 0 : index
    %c0_92 = arith.constant 0 : index
    %69 = vector.load %arg8[%c0_91, %c0_92] : memref<128x128xf32, #tpu.memory_space<vmem>>, vector<128x128xf32>
    tpu.vector_store %arg8[%c0_91, %c0_92], %68 {strides = array<i32>} : memref<128x128xf32, #tpu.memory_space<vmem>>, vector<128x128xf32>,
    %c0_93 = arith.constant 0 : index
    %c0_94 = arith.constant 0 : index
    %c2_95 = arith.constant 2 : index
    %c2_96 = arith.constant 2 : index
    %c0_97 = arith.constant 0 : index
    %70 = vector.load %arg3[%c0_93, %c0_94, %c2_95, %c2_96, %c0_97] : memref<1x1x10x18x128xbf16, #tpu.memory_space<vmem>>, vector<1x1x8x16x128xbf16>
    %71 = vector.shape_cast %70 : vector<1x1x8x16x128xbf16> to vector<8x16x128xbf16>
    %72 = vector.shape_cast %71 : vector<8x16x128xbf16> to vector<128x128xbf16>
    %c8 = arith.constant 8 : index
    %c0_98 = arith.constant 0 : index
    %c0_99 = arith.constant 0 : index
    %73 = vector.load %arg4[%c8, %c0_98, %c0_99] : memref<9x128x128xbf16, #tpu.memory_space<vmem>>, vector<1x128x128xbf16>
    %74 = vector.shape_cast %73 : vector<1x128x128xbf16> to vector<128x128xbf16>
    %cst_100 = arith.constant dense<0.000000e+00> : vector<128x128xf32>
    %75 = tpu.matmul %72, %74, %cst_100 {dimension_numbers = #tpu.dot_dimension_numbers<[1], [0], [0], [1], [0, 0, 1, 1], [], []>} : vector<128x128xbf16>, vector<128x128xbf16>, vector<128x128xf32> -> vector<128x128xf32>
    %c0_101 = arith.constant 0 : index
    %c0_102 = arith.constant 0 : index
    %76 = vector.load %arg8[%c0_101, %c0_102] : memref<128x128xf32, #tpu.memory_space<vmem>>, vector<128x128xf32>
    %77 = arith.addf %76, %75 : vector<128x128xf32>
    %c0_103 = arith.constant 0 : index
    %c0_104 = arith.constant 0 : index
    %78 = vector.load %arg8[%c0_103, %c0_104] : memref<128x128xf32, #tpu.memory_space<vmem>>, vector<128x128xf32>
    tpu.vector_store %arg8[%c0_103, %c0_104], %77 {strides = array<i32>} : memref<128x128xf32, #tpu.memory_space<vmem>>, vector<128x128xf32>,
    %c0_105 = arith.constant 0 : index
    %c0_106 = arith.constant 0 : index
    %79 = vector.load %arg8[%c0_105, %c0_106] : memref<128x128xf32, #tpu.memory_space<vmem>>, vector<128x128xf32>
    %c0_107 = arith.constant 0 : index
    %c0_108 = arith.constant 0 : index
    %80 = vector.load %arg5[%c0_107, %c0_108] : memref<1x128xf32, #tpu.memory_space<vmem>>, vector<1x128xf32>
    %81 = vector.broadcast %80 : vector<1x128xf32> to vector<128x128xf32>
    %82 = arith.mulf %79, %81 : vector<128x128xf32>
    %c0_109 = arith.constant 0 : index
    %c0_110 = arith.constant 0 : index
    %83 = vector.load %arg6[%c0_109, %c0_110] : memref<1x128xf32, #tpu.memory_space<vmem>>, vector<1x128xf32>
    %84 = vector.broadcast %83 : vector<1x128xf32> to vector<128x128xf32>
    %85 = arith.addf %82, %84 : vector<128x128xf32>
    %cst_111 = arith.constant 0.000000e+00 : f32
    %86 = vector.broadcast %cst_111 : f32 to vector<128x128xf32>
    %87 = arith.maximumf %85, %86 : vector<128x128xf32>
    %88 = vector.shape_cast %87 : vector<128x128xf32> to vector<8x16x128xf32>
    %c0_112 = arith.constant 0 : index
    %c0_113 = arith.constant 0 : index
    %c0_114 = arith.constant 0 : index
    %c0_115 = arith.constant 0 : index
    %89 = vector.load %arg7[%c0_112, %c0_113, %c0_114, %c0_115] : memref<1x8x16x128xf32, #tpu.memory_space<vmem>>, vector<1x8x16x128xf32>
    %90 = vector.shape_cast %89 : vector<1x8x16x128xf32> to vector<8x16x128xf32>
    %91 = vector.shape_cast %88 : vector<8x16x128xf32> to vector<1x8x16x128xf32>
    tpu.vector_store %arg7[%c0_112, %c0_113, %c0_114, %c0_115], %91 {strides = array<i32>} : memref<1x8x16x128xf32, #tpu.memory_space<vmem>>, vector<1x8x16x128xf32>,
    return
  }
  func.func @transform_0(%arg0: i32, %arg1: i32, %arg2: i32) -> (i32, i32, i32, i32, i32) {
    %c0_i32 = arith.constant 0 : i32
    %c0_i32_0 = arith.constant 0 : i32
    %c0_i32_1 = arith.constant 0 : i32
    %c0_i32_2 = arith.constant 0 : i32
    return %arg0, %arg2, %c0_i32, %c0_i32_0, %c0_i32_1 : i32, i32, i32, i32, i32
  }
  func.func @transform_1(%arg0: i32, %arg1: i32, %arg2: i32) -> (i32, i32, i32) {
    %c0_i32 = arith.constant 0 : i32
    %c0_i32_0 = arith.constant 0 : i32
    %c0_i32_1 = arith.constant 0 : i32
    return %c0_i32, %c0_i32_0, %arg1 : i32, i32, i32
  }
  func.func @transform_2(%arg0: i32, %arg1: i32, %arg2: i32) -> (i32, i32) {
    %c0_i32 = arith.constant 0 : i32
    %c0_i32_0 = arith.constant 0 : i32
    return %c0_i32, %arg1 : i32, i32
  }
  func.func @transform_3(%arg0: i32, %arg1: i32, %arg2: i32) -> (i32, i32) {
    %c0_i32 = arith.constant 0 : i32
    %c0_i32_0 = arith.constant 0 : i32
    return %c0_i32, %arg1 : i32, i32
  }
  func.func @transform_4(%arg0: i32, %arg1: i32, %arg2: i32) -> (i32, i32, i32, i32) {
    %c0_i32 = arith.constant 0 : i32
    %c0_i32_0 = arith.constant 0 : i32
    return %arg0, %arg2, %c0_i32, %arg1 : i32, i32, i32, i32
  }
}

module attributes {stable_mosaic.version = 11 : i64} {
  func.func @_conv_block_kernel(%arg0: i32, %arg1: i32, %arg2: i32, %arg3: memref<1x1x10x18x128xbf16, #tpu.memory_space<vmem>>, %arg4: memref<9x128x128xbf16, #tpu.memory_space<vmem>>, %arg5: memref<1x128xf32, #tpu.memory_space<vmem>>, %arg6: memref<1x128xf32, #tpu.memory_space<vmem>>, %arg7: memref<1x8x16x128xf32, #tpu.memory_space<vmem>>, %arg8: memref<128x128xf32, #tpu.memory_space<vmem>>) attributes {dimension_semantics = [#tpu.dimension_semantics<parallel>, #tpu.dimension_semantics<parallel>, #tpu.dimension_semantics<parallel>], iteration_bounds = array<i64: 2, 1, 2>, scalar_prefetch = 0 : i64, scratch_operands = 1 : i64, tpu.core_type = #tpu.core_type<tc>, window_params = [{transform_indices = @transform_0, window_bounds = array<i64: 1, 1, 10, 18, 128>}, {transform_indices = @transform_1, window_bounds = array<i64: 9, 128, 128>}, {transform_indices = @transform_2, window_bounds = array<i64: 1, 128>}, {transform_indices = @transform_3, window_bounds = array<i64: 1, 128>}, {transform_indices = @transform_4, window_bounds = array<i64: 1, 8, 16, 128>}]} {
    %c0 = arith.constant 0 : index
    %c0_0 = arith.constant 0 : index
    %c0_1 = arith.constant 0 : index
    %c0_2 = arith.constant 0 : index
    %c0_3 = arith.constant 0 : index
    %0 = vector.load %arg3[%c0, %c0_0, %c0_1, %c0_2, %c0_3] : memref<1x1x10x18x128xbf16, #tpu.memory_space<vmem>>, vector<1x1x8x16x128xbf16>
    %1 = vector.shape_cast %0 : vector<1x1x8x16x128xbf16> to vector<8x16x128xbf16>
    %2 = vector.shape_cast %1 : vector<8x16x128xbf16> to vector<128x128xbf16>
    %c0_4 = arith.constant 0 : index
    %c0_5 = arith.constant 0 : index
    %c0_6 = arith.constant 0 : index
    %3 = vector.load %arg4[%c0_4, %c0_5, %c0_6] : memref<9x128x128xbf16, #tpu.memory_space<vmem>>, vector<1x128x128xbf16>
    %4 = vector.shape_cast %3 : vector<1x128x128xbf16> to vector<128x128xbf16>
    %cst = arith.constant dense<0.000000e+00> : vector<128x128xf32>
    %5 = tpu.matmul %2, %4, %cst {dimension_numbers = #tpu.dot_dimension_numbers<[1], [0], [0], [1], [0, 0, 1, 1], [], []>} : vector<128x128xbf16>, vector<128x128xbf16>, vector<128x128xf32> -> vector<128x128xf32>
    %c0_7 = arith.constant 0 : index
    %c0_8 = arith.constant 0 : index
    %6 = vector.load %arg8[%c0_7, %c0_8] : memref<128x128xf32, #tpu.memory_space<vmem>>, vector<128x128xf32>
    tpu.vector_store %arg8[%c0_7, %c0_8], %5 {strides = array<i32>} : memref<128x128xf32, #tpu.memory_space<vmem>>, vector<128x128xf32>,
    %c0_9 = arith.constant 0 : index
    %c0_10 = arith.constant 0 : index
    %c0_11 = arith.constant 0 : index
    %c1 = arith.constant 1 : index
    %c0_12 = arith.constant 0 : index
    %7 = vector.load %arg3[%c0_9, %c0_10, %c0_11, %c1, %c0_12] : memref<1x1x10x18x128xbf16, #tpu.memory_space<vmem>>, vector<1x1x8x16x128xbf16>
    %8 = vector.shape_cast %7 : vector<1x1x8x16x128xbf16> to vector<8x16x128xbf16>
    %9 = vector.shape_cast %8 : vector<8x16x128xbf16> to vector<128x128xbf16>
    %c1_13 = arith.constant 1 : index
    %c0_14 = arith.constant 0 : index
    %c0_15 = arith.constant 0 : index
    %10 = vector.load %arg4[%c1_13, %c0_14, %c0_15] : memref<9x128x128xbf16, #tpu.memory_space<vmem>>, vector<1x128x128xbf16>
    %11 = vector.shape_cast %10 : vector<1x128x128xbf16> to vector<128x128xbf16>
    %cst_16 = arith.constant dense<0.000000e+00> : vector<128x128xf32>
    %12 = tpu.matmul %9, %11, %cst_16 {dimension_numbers = #tpu.dot_dimension_numbers<[1], [0], [0], [1], [0, 0, 1, 1], [], []>} : vector<128x128xbf16>, vector<128x128xbf16>, vector<128x128xf32> -> vector<128x128xf32>
    %c0_17 = arith.constant 0 : index
    %c0_18 = arith.constant 0 : index
    %13 = vector.load %arg8[%c0_17, %c0_18] : memref<128x128xf32, #tpu.memory_space<vmem>>, vector<128x128xf32>
    %14 = arith.addf %13, %12 : vector<128x128xf32>
    %c0_19 = arith.constant 0 : index
    %c0_20 = arith.constant 0 : index
    %15 = vector.load %arg8[%c0_19, %c0_20] : memref<128x128xf32, #tpu.memory_space<vmem>>, vector<128x128xf32>
    tpu.vector_store %arg8[%c0_19, %c0_20], %14 {strides = array<i32>} : memref<128x128xf32, #tpu.memory_space<vmem>>, vector<128x128xf32>,
    %c0_21 = arith.constant 0 : index
    %c0_22 = arith.constant 0 : index
    %c0_23 = arith.constant 0 : index
    %c2 = arith.constant 2 : index
    %c0_24 = arith.constant 0 : index
    %16 = vector.load %arg3[%c0_21, %c0_22, %c0_23, %c2, %c0_24] : memref<1x1x10x18x128xbf16, #tpu.memory_space<vmem>>, vector<1x1x8x16x128xbf16>
    %17 = vector.shape_cast %16 : vector<1x1x8x16x128xbf16> to vector<8x16x128xbf16>
    %18 = vector.shape_cast %17 : vector<8x16x128xbf16> to vector<128x128xbf16>
    %c2_25 = arith.constant 2 : index
    %c0_26 = arith.constant 0 : index
    %c0_27 = arith.constant 0 : index
    %19 = vector.load %arg4[%c2_25, %c0_26, %c0_27] : memref<9x128x128xbf16, #tpu.memory_space<vmem>>, vector<1x128x128xbf16>
    %20 = vector.shape_cast %19 : vector<1x128x128xbf16> to vector<128x128xbf16>
    %cst_28 = arith.constant dense<0.000000e+00> : vector<128x128xf32>
    %21 = tpu.matmul %18, %20, %cst_28 {dimension_numbers = #tpu.dot_dimension_numbers<[1], [0], [0], [1], [0, 0, 1, 1], [], []>} : vector<128x128xbf16>, vector<128x128xbf16>, vector<128x128xf32> -> vector<128x128xf32>
    %c0_29 = arith.constant 0 : index
    %c0_30 = arith.constant 0 : index
    %22 = vector.load %arg8[%c0_29, %c0_30] : memref<128x128xf32, #tpu.memory_space<vmem>>, vector<128x128xf32>
    %23 = arith.addf %22, %21 : vector<128x128xf32>
    %c0_31 = arith.constant 0 : index
    %c0_32 = arith.constant 0 : index
    %24 = vector.load %arg8[%c0_31, %c0_32] : memref<128x128xf32, #tpu.memory_space<vmem>>, vector<128x128xf32>
    tpu.vector_store %arg8[%c0_31, %c0_32], %23 {strides = array<i32>} : memref<128x128xf32, #tpu.memory_space<vmem>>, vector<128x128xf32>,
    %c0_33 = arith.constant 0 : index
    %c0_34 = arith.constant 0 : index
    %c1_35 = arith.constant 1 : index
    %c0_36 = arith.constant 0 : index
    %c0_37 = arith.constant 0 : index
    %25 = vector.load %arg3[%c0_33, %c0_34, %c1_35, %c0_36, %c0_37] : memref<1x1x10x18x128xbf16, #tpu.memory_space<vmem>>, vector<1x1x8x16x128xbf16>
    %26 = vector.shape_cast %25 : vector<1x1x8x16x128xbf16> to vector<8x16x128xbf16>
    %27 = vector.shape_cast %26 : vector<8x16x128xbf16> to vector<128x128xbf16>
    %c3 = arith.constant 3 : index
    %c0_38 = arith.constant 0 : index
    %c0_39 = arith.constant 0 : index
    %28 = vector.load %arg4[%c3, %c0_38, %c0_39] : memref<9x128x128xbf16, #tpu.memory_space<vmem>>, vector<1x128x128xbf16>
    %29 = vector.shape_cast %28 : vector<1x128x128xbf16> to vector<128x128xbf16>
    %cst_40 = arith.constant dense<0.000000e+00> : vector<128x128xf32>
    %30 = tpu.matmul %27, %29, %cst_40 {dimension_numbers = #tpu.dot_dimension_numbers<[1], [0], [0], [1], [0, 0, 1, 1], [], []>} : vector<128x128xbf16>, vector<128x128xbf16>, vector<128x128xf32> -> vector<128x128xf32>
    %c0_41 = arith.constant 0 : index
    %c0_42 = arith.constant 0 : index
    %31 = vector.load %arg8[%c0_41, %c0_42] : memref<128x128xf32, #tpu.memory_space<vmem>>, vector<128x128xf32>
    %32 = arith.addf %31, %30 : vector<128x128xf32>
    %c0_43 = arith.constant 0 : index
    %c0_44 = arith.constant 0 : index
    %33 = vector.load %arg8[%c0_43, %c0_44] : memref<128x128xf32, #tpu.memory_space<vmem>>, vector<128x128xf32>
    tpu.vector_store %arg8[%c0_43, %c0_44], %32 {strides = array<i32>} : memref<128x128xf32, #tpu.memory_space<vmem>>, vector<128x128xf32>,
    %c0_45 = arith.constant 0 : index
    %c0_46 = arith.constant 0 : index
    %c1_47 = arith.constant 1 : index
    %c1_48 = arith.constant 1 : index
    %c0_49 = arith.constant 0 : index
    %34 = vector.load %arg3[%c0_45, %c0_46, %c1_47, %c1_48, %c0_49] : memref<1x1x10x18x128xbf16, #tpu.memory_space<vmem>>, vector<1x1x8x16x128xbf16>
    %35 = vector.shape_cast %34 : vector<1x1x8x16x128xbf16> to vector<8x16x128xbf16>
    %36 = vector.shape_cast %35 : vector<8x16x128xbf16> to vector<128x128xbf16>
    %c4 = arith.constant 4 : index
    %c0_50 = arith.constant 0 : index
    %c0_51 = arith.constant 0 : index
    %37 = vector.load %arg4[%c4, %c0_50, %c0_51] : memref<9x128x128xbf16, #tpu.memory_space<vmem>>, vector<1x128x128xbf16>
    %38 = vector.shape_cast %37 : vector<1x128x128xbf16> to vector<128x128xbf16>
    %cst_52 = arith.constant dense<0.000000e+00> : vector<128x128xf32>
    %39 = tpu.matmul %36, %38, %cst_52 {dimension_numbers = #tpu.dot_dimension_numbers<[1], [0], [0], [1], [0, 0, 1, 1], [], []>} : vector<128x128xbf16>, vector<128x128xbf16>, vector<128x128xf32> -> vector<128x128xf32>
    %c0_53 = arith.constant 0 : index
    %c0_54 = arith.constant 0 : index
    %40 = vector.load %arg8[%c0_53, %c0_54] : memref<128x128xf32, #tpu.memory_space<vmem>>, vector<128x128xf32>
    %41 = arith.addf %40, %39 : vector<128x128xf32>
    %c0_55 = arith.constant 0 : index
    %c0_56 = arith.constant 0 : index
    %42 = vector.load %arg8[%c0_55, %c0_56] : memref<128x128xf32, #tpu.memory_space<vmem>>, vector<128x128xf32>
    tpu.vector_store %arg8[%c0_55, %c0_56], %41 {strides = array<i32>} : memref<128x128xf32, #tpu.memory_space<vmem>>, vector<128x128xf32>,
    %c0_57 = arith.constant 0 : index
    %c0_58 = arith.constant 0 : index
    %c1_59 = arith.constant 1 : index
    %c2_60 = arith.constant 2 : index
    %c0_61 = arith.constant 0 : index
    %43 = vector.load %arg3[%c0_57, %c0_58, %c1_59, %c2_60, %c0_61] : memref<1x1x10x18x128xbf16, #tpu.memory_space<vmem>>, vector<1x1x8x16x128xbf16>
    %44 = vector.shape_cast %43 : vector<1x1x8x16x128xbf16> to vector<8x16x128xbf16>
    %45 = vector.shape_cast %44 : vector<8x16x128xbf16> to vector<128x128xbf16>
    %c5 = arith.constant 5 : index
    %c0_62 = arith.constant 0 : index
    %c0_63 = arith.constant 0 : index
    %46 = vector.load %arg4[%c5, %c0_62, %c0_63] : memref<9x128x128xbf16, #tpu.memory_space<vmem>>, vector<1x128x128xbf16>
    %47 = vector.shape_cast %46 : vector<1x128x128xbf16> to vector<128x128xbf16>
    %cst_64 = arith.constant dense<0.000000e+00> : vector<128x128xf32>
    %48 = tpu.matmul %45, %47, %cst_64 {dimension_numbers = #tpu.dot_dimension_numbers<[1], [0], [0], [1], [0, 0, 1, 1], [], []>} : vector<128x128xbf16>, vector<128x128xbf16>, vector<128x128xf32> -> vector<128x128xf32>
    %c0_65 = arith.constant 0 : index
    %c0_66 = arith.constant 0 : index
    %49 = vector.load %arg8[%c0_65, %c0_66] : memref<128x128xf32, #tpu.memory_space<vmem>>, vector<128x128xf32>
    %50 = arith.addf %49, %48 : vector<128x128xf32>
    %c0_67 = arith.constant 0 : index
    %c0_68 = arith.constant 0 : index
    %51 = vector.load %arg8[%c0_67, %c0_68] : memref<128x128xf32, #tpu.memory_space<vmem>>, vector<128x128xf32>
    tpu.vector_store %arg8[%c0_67, %c0_68], %50 {strides = array<i32>} : memref<128x128xf32, #tpu.memory_space<vmem>>, vector<128x128xf32>,
    %c0_69 = arith.constant 0 : index
    %c0_70 = arith.constant 0 : index
    %c2_71 = arith.constant 2 : index
    %c0_72 = arith.constant 0 : index
    %c0_73 = arith.constant 0 : index
    %52 = vector.load %arg3[%c0_69, %c0_70, %c2_71, %c0_72, %c0_73] : memref<1x1x10x18x128xbf16, #tpu.memory_space<vmem>>, vector<1x1x8x16x128xbf16>
    %53 = vector.shape_cast %52 : vector<1x1x8x16x128xbf16> to vector<8x16x128xbf16>
    %54 = vector.shape_cast %53 : vector<8x16x128xbf16> to vector<128x128xbf16>
    %c6 = arith.constant 6 : index
    %c0_74 = arith.constant 0 : index
    %c0_75 = arith.constant 0 : index
    %55 = vector.load %arg4[%c6, %c0_74, %c0_75] : memref<9x128x128xbf16, #tpu.memory_space<vmem>>, vector<1x128x128xbf16>
    %56 = vector.shape_cast %55 : vector<1x128x128xbf16> to vector<128x128xbf16>
    %cst_76 = arith.constant dense<0.000000e+00> : vector<128x128xf32>
    %57 = tpu.matmul %54, %56, %cst_76 {dimension_numbers = #tpu.dot_dimension_numbers<[1], [0], [0], [1], [0, 0, 1, 1], [], []>} : vector<128x128xbf16>, vector<128x128xbf16>, vector<128x128xf32> -> vector<128x128xf32>
    %c0_77 = arith.constant 0 : index
    %c0_78 = arith.constant 0 : index
    %58 = vector.load %arg8[%c0_77, %c0_78] : memref<128x128xf32, #tpu.memory_space<vmem>>, vector<128x128xf32>
    %59 = arith.addf %58, %57 : vector<128x128xf32>
    %c0_79 = arith.constant 0 : index
    %c0_80 = arith.constant 0 : index
    %60 = vector.load %arg8[%c0_79, %c0_80] : memref<128x128xf32, #tpu.memory_space<vmem>>, vector<128x128xf32>
    tpu.vector_store %arg8[%c0_79, %c0_80], %59 {strides = array<i32>} : memref<128x128xf32, #tpu.memory_space<vmem>>, vector<128x128xf32>,
    %c0_81 = arith.constant 0 : index
    %c0_82 = arith.constant 0 : index
    %c2_83 = arith.constant 2 : index
    %c1_84 = arith.constant 1 : index
    %c0_85 = arith.constant 0 : index
    %61 = vector.load %arg3[%c0_81, %c0_82, %c2_83, %c1_84, %c0_85] : memref<1x1x10x18x128xbf16, #tpu.memory_space<vmem>>, vector<1x1x8x16x128xbf16>
    %62 = vector.shape_cast %61 : vector<1x1x8x16x128xbf16> to vector<8x16x128xbf16>
    %63 = vector.shape_cast %62 : vector<8x16x128xbf16> to vector<128x128xbf16>
    %c7 = arith.constant 7 : index
    %c0_86 = arith.constant 0 : index
    %c0_87 = arith.constant 0 : index
    %64 = vector.load %arg4[%c7, %c0_86, %c0_87] : memref<9x128x128xbf16, #tpu.memory_space<vmem>>, vector<1x128x128xbf16>
    %65 = vector.shape_cast %64 : vector<1x128x128xbf16> to vector<128x128xbf16>
    %cst_88 = arith.constant dense<0.000000e+00> : vector<128x128xf32>
    %66 = tpu.matmul %63, %65, %cst_88 {dimension_numbers = #tpu.dot_dimension_numbers<[1], [0], [0], [1], [0, 0, 1, 1], [], []>} : vector<128x128xbf16>, vector<128x128xbf16>, vector<128x128xf32> -> vector<128x128xf32>
    %c0_89 = arith.constant 0 : index
    %c0_90 = arith.constant 0 : index
    %67 = vector.load %arg8[%c0_89, %c0_90] : memref<128x128xf32, #tpu.memory_space<vmem>>, vector<128x128xf32>
    %68 = arith.addf %67, %66 : vector<128x128xf32>
    %c0_91 = arith.constant 0 : index
    %c0_92 = arith.constant 0 : index
    %69 = vector.load %arg8[%c0_91, %c0_92] : memref<128x128xf32, #tpu.memory_space<vmem>>, vector<128x128xf32>
    tpu.vector_store %arg8[%c0_91, %c0_92], %68 {strides = array<i32>} : memref<128x128xf32, #tpu.memory_space<vmem>>, vector<128x128xf32>,
    %c0_93 = arith.constant 0 : index
    %c0_94 = arith.constant 0 : index
    %c2_95 = arith.constant 2 : index
    %c2_96 = arith.constant 2 : index
    %c0_97 = arith.constant 0 : index
    %70 = vector.load %arg3[%c0_93, %c0_94, %c2_95, %c2_96, %c0_97] : memref<1x1x10x18x128xbf16, #tpu.memory_space<vmem>>, vector<1x1x8x16x128xbf16>
    %71 = vector.shape_cast %70 : vector<1x1x8x16x128xbf16> to vector<8x16x128xbf16>
    %72 = vector.shape_cast %71 : vector<8x16x128xbf16> to vector<128x128xbf16>
    %c8 = arith.constant 8 : index
    %c0_98 = arith.constant 0 : index
    %c0_99 = arith.constant 0 : index
    %73 = vector.load %arg4[%c8, %c0_98, %c0_99] : memref<9x128x128xbf16, #tpu.memory_space<vmem>>, vector<1x128x128xbf16>
    %74 = vector.shape_cast %73 : vector<1x128x128xbf16> to vector<128x128xbf16>
    %cst_100 = arith.constant dense<0.000000e+00> : vector<128x128xf32>
    %75 = tpu.matmul %72, %74, %cst_100 {dimension_numbers = #tpu.dot_dimension_numbers<[1], [0], [0], [1], [0, 0, 1, 1], [], []>} : vector<128x128xbf16>, vector<128x128xbf16>, vector<128x128xf32> -> vector<128x128xf32>
    %c0_101 = arith.constant 0 : index
    %c0_102 = arith.constant 0 : index
    %76 = vector.load %arg8[%c0_101, %c0_102] : memref<128x128xf32, #tpu.memory_space<vmem>>, vector<128x128xf32>
    %77 = arith.addf %76, %75 : vector<128x128xf32>
    %c0_103 = arith.constant 0 : index
    %c0_104 = arith.constant 0 : index
    %78 = vector.load %arg8[%c0_103, %c0_104] : memref<128x128xf32, #tpu.memory_space<vmem>>, vector<128x128xf32>
    tpu.vector_store %arg8[%c0_103, %c0_104], %77 {strides = array<i32>} : memref<128x128xf32, #tpu.memory_space<vmem>>, vector<128x128xf32>,
    %c0_105 = arith.constant 0 : index
    %c0_106 = arith.constant 0 : index
    %79 = vector.load %arg8[%c0_105, %c0_106] : memref<128x128xf32, #tpu.memory_space<vmem>>, vector<128x128xf32>
    %c0_107 = arith.constant 0 : index
    %c0_108 = arith.constant 0 : index
    %80 = vector.load %arg5[%c0_107, %c0_108] : memref<1x128xf32, #tpu.memory_space<vmem>>, vector<1x128xf32>
    %81 = vector.broadcast %80 : vector<1x128xf32> to vector<128x128xf32>
    %82 = arith.mulf %79, %81 : vector<128x128xf32>
    %c0_109 = arith.constant 0 : index
    %c0_110 = arith.constant 0 : index
    %83 = vector.load %arg6[%c0_109, %c0_110] : memref<1x128xf32, #tpu.memory_space<vmem>>, vector<1x128xf32>
    %84 = vector.broadcast %83 : vector<1x128xf32> to vector<128x128xf32>
    %85 = arith.addf %82, %84 : vector<128x128xf32>
    %cst_111 = arith.constant 0.000000e+00 : f32
    %86 = vector.broadcast %cst_111 : f32 to vector<128x128xf32>
    %87 = arith.maximumf %85, %86 : vector<128x128xf32>
    %88 = vector.shape_cast %87 : vector<128x128xf32> to vector<8x16x128xf32>
    %c0_112 = arith.constant 0 : index
    %c0_113 = arith.constant 0 : index
    %c0_114 = arith.constant 0 : index
    %c0_115 = arith.constant 0 : index
    %89 = vector.load %arg7[%c0_112, %c0_113, %c0_114, %c0_115] : memref<1x8x16x128xf32, #tpu.memory_space<vmem>>, vector<1x8x16x128xf32>
    %90 = vector.shape_cast %89 : vector<1x8x16x128xf32> to vector<8x16x128xf32>
    %91 = vector.shape_cast %88 : vector<8x16x128xf32> to vector<1x8x16x128xf32>
    tpu.vector_store %arg7[%c0_112, %c0_113, %c0_114, %c0_115], %91 {strides = array<i32>} : memref<1x8x16x128xf32, #tpu.memory_space<vmem>>, vector<1x8x16x128xf32>,
    return
  }
  func.func @transform_0(%arg0: i32, %arg1: i32, %arg2: i32) -> (i32, i32, i32, i32, i32) {
    %c0_i32 = arith.constant 0 : i32
    %c0_i32_0 = arith.constant 0 : i32
    %c0_i32_1 = arith.constant 0 : i32
    %c0_i32_2 = arith.constant 0 : i32
    return %arg0, %arg2, %c0_i32, %c0_i32_0, %c0_i32_1 : i32, i32, i32, i32, i32
  }
  func.func @transform_1(%arg0: i32, %arg1: i32, %arg2: i32) -> (i32, i32, i32) {
    %c0_i32 = arith.constant 0 : i32
    %c0_i32_0 = arith.constant 0 : i32
    %c0_i32_1 = arith.constant 0 : i32
    return %c0_i32, %c0_i32_0, %arg1 : i32, i32, i32
  }
  func.func @transform_2(%arg0: i32, %arg1: i32, %arg2: i32) -> (i32, i32) {
    %c0_i32 = arith.constant 0 : i32
    %c0_i32_0 = arith.constant 0 : i32
    return %c0_i32, %arg1 : i32, i32
  }
  func.func @transform_3(%arg0: i32, %arg1: i32, %arg2: i32) -> (i32, i32) {
    %c0_i32 = arith.constant 0 : i32
    %c0_i32_0 = arith.constant 0 : i32
    return %c0_i32, %arg1 : i32, i32
  }
  func.func @transform_4(%arg0: i32, %arg1: i32, %arg2: i32) -> (i32, i32, i32, i32) {
    %c0_i32 = arith.constant 0 : i32
    %c0_i32_0 = arith.constant 0 : i32
    return %arg0, %arg2, %c0_i32, %arg1 : i32, i32, i32, i32
  }
}

</mosaic_0001>

<bundles_post_ra>
// kernel: tpu_custom_call.1
= control target key start
LH: loop header
LB: loop body
LE: loop exit
PB: predicated region body
PF: predicated region fallthrough
CT: control target
= control target key end

     0   :  { %9 = vsyncpa [#allocation4], 0  ;;  %s5903_s0 = inlined_call_operand.vmem [shape: bf16[2,2,10,18,128], index: 0, kind: input, shape index: {}]   ;;  %s5904_s1 = inlined_call_operand.vmem [shape: bf16[9,128,128], index: 1, kind: input, shape index: {}]   ;;  %s5905_s2 = inlined_call_operand.vmem [shape: f32[1,128], index: 2, kind: input, shape index: {}]   ;;  %s5906_s3 = inlined_call_operand.vmem [shape: f32[1,128], index: 3, kind: input, shape index: {}]   ;;  %s5907_s4 = inlined_call_operand.hbm [shape: f32[2,16,16,128], index: 4, kind: output, shape index: {}]  }
   0x1   :  { %11 = vsyncpa [#allocation4 + $0x1], 0  ;;  %s4914_s15 = smov 0   ;;  %s4916_s16 = smov 0  }
   0x2   :  { %s4918_s17 = smov 0   ;;  %s4920_s18 = smov 0  }
   0x3   :  { %s4922_s19 = smov 0   ;;  %s4924_s20 = smov 0  }
   0x4   :  { %s4926_s21 = smov 0   ;;  %s4928_s22 = smov 0  }
   0x5 LB: > { %s3729_s23 = sadd.s32 4294967295, %s4884_s22   ;;  %s3730_s24 = sadd.s32 4294967294, %s4884_s22   ;;  %s4884_s22 = sphi %s4928_s22, %s17_s22   ;;  %s4880_s21 = sphi %s4926_s21, %s5952_s21   ;;  %s4876_s20 = sphi %s4924_s20, %s5951_s20   ;;  %s4872_s19 = sphi %s4922_s19, %s5950_s19   ;;  %s4868_s18 = sphi %s4920_s18, %s5949_s18   ;;  %s4864_s17 = sphi %s4918_s17, %s5948_s17   ;;  %s4860_s16 = sphi %s4916_s16, %s5947_s16   ;;  %s4856_s15 = sphi %s4914_s15, %s5946_s15  }
   0x6   : > { %s29_s25 = sadd.s32 1, %s4876_s20  ;;  %s36_s26 = sadd.s32 1, %s4880_s21 }
   0x7   : > { %p30_p0 = scmp.ge.s32.totalorder %s29_s25, 2  ;;  %p163_p1 = scmp.ne.s32.totalorder %s4864_s17, %s4860_s16 }
   0x8   : > { %p164_p2 = scmp.eq.s32.totalorder %s3729_s23, 3  ;;  %p169_p5 = scmp.ne.s32.totalorder %s4860_s16, %s4856_s15 }
   0x9   : > { %s5954_s25 = smov (%p30_p0, %s29_s25), 0  ;;  %s5956_s26 = smov (!%p30_p0, %s36_s26), %s4880_s21 }
   0xa   : > { %s147_s27 = ssub.s32 %s4876_s20, %s5954_s25  ;;  %p4965_p3 = por %p164_p2, %p163_p1 }
   0xb   : > { %p38_p4 = scmp.ge.s32.totalorder %s5956_s26, 2  ;;  %p170_p6 = scmp.eq.s32.totalorder %s3730_s24, 3 }
   0xc   : > { %p3736_p7 = scmp.ge.s32.totalorder %s4884_s22, 1  ;;  %p219_p9 = scmp.lt.s32.totalorder %s4884_s22, 5 }
   0xd   : > { %s5958_s26 = smov (%p38_p4, %s5956_s26), 0  ;;  %p4974_p8 = por %p170_p6, %p169_p5 }
   0xe   : > { %s146_s30 = ssub.s32 %s4880_s21, %s5958_s26  ;;  %s153_s5 = sadd.s32 1, %s4864_s17 }
   0xf   : > { %s148_s6 = sor.u32 %s147_s27, %s146_s30  ;;  %p220_p10 = pnand %p3736_p7, %p219_p9 }
  0x10   : > { %p151_p11 = scmp.eq.s32.totalorder %s148_s6, 0 }
  0x11   : > { %223 = sbr.rel (%p220_p10) target bundleno = 426 (0x1aa), region = 36 }
  0x12   : > { %s4983_s7 = scalar_select %p151_p11, %s4864_s17, %s153_s5  }
  0x16   : > { %v4696_v0 = vld [vmem:[%s5904_s1 + $0x38] sm:$0xff]   ;;  %p259_p12 = scmp.lt.s32.totalorder %s4872_s19, 1  ;;  %p261_p13 = scmp.lt.s32.totalorder %s4868_s18, 1  ;;  %v4698_v2 = vld [vmem:[%s5904_s1 + $0x30] sm:$0xff]   ;;  %v4700_v4 = vld [vmem:[%s5904_s1 + $0x28] sm:$0xff]   ;;  %vm1030_vm3 = vcmask 1042432  }
  0x17   : > { %v4697_v1 = vld [vmem:[%s5904_s1 + $0x78] sm:$0xff]   ;;  %4317 = vmatprep.subr.bf16.mxu0 %v4696_v0  ;;  %v4699_v3 = vld [vmem:[%s5904_s1 + $0x70] sm:$0xff]   ;;  %v4701_v5 = vld [vmem:[%s5904_s1 + $0x68] sm:$0xff]   ;;  %vm545_vm0 = vsmask.f32 3328  ;;  %vm1031_vm4 = vcmask 1046532  }
  0x18   : > { %s260_s14 = scalar_select %p259_p12, %s4872_s19, 1  ;;  %4349 = vmatprep.subr.bf16.mxu1 %v4697_v1  ;;  %4318 = vmatpush3.bf16.msra.mxu0 %v4696_v0  ;;  %v4702_v6 = vld [vmem:[%s5904_s1 + $0x20] sm:$0xff]   ;;  %v4704_v8 = vld [vmem:[%s5904_s1 + $0x18] sm:$0xff]   ;;  %v4706_v10 = vld [vmem:[%s5904_s1 + $0x10] sm:$0xff]   ;;  %vm546_vm1 = vsmask.f32 7440 }
  0x19   : > { %s262_s27 = scalar_select %p261_p13, %s4868_s18, 1  ;;  %4350 = vmatpush3.bf16.msra.mxu1 %v4697_v1  ;;  %4319 = vmatprep.subr.bf16.mxu0 %v4698_v2  ;;  %v4703_v7 = vld [vmem:[%s5904_s1 + $0x60] sm:$0xff]   ;;  %v4705_v9 = vld [vmem:[%s5904_s1 + $0x58] sm:$0xff]   ;;  %v4707_v11 = vld [vmem:[%s5904_s1 + $0x50] sm:$0xff]  }
  0x1a   : > { %s4622_s6 = smul.u32 60, %s260_s14  ;;  %4351 = vmatprep.subr.bf16.mxu1 %v4699_v3  ;;  %v4708_v16 = vld [vmem:[%s5904_s1 + $0x8] sm:$0xff]   ;;  %v4710_v31 = vld [vmem:[%s5904_s1] sm:$0xff]   ;;  %vm5048_vm2 = vmor %vm545_vm0, %vm546_vm1  ;;  %s4172_s9 = sshll.u32 %s4868_s18, 4 }
  0x1b   : > { %s4621_s10 = smul.u32 30, %s262_s27  ;;  %v4709_v19 = vld [vmem:[%s5904_s1 + $0x48] sm:$0xff]   ;;  %v4711_v45 = vld [vmem:[%s5904_s1 + $0x40] sm:$0xff]   ;;  %v4714_v56 = vld [vmem:[%s5904_s1 + $0xb8] sm:$0xff]  }
  0x1c   : > { %4320 = vmatpush3.bf16.msra.mxu0 %v4698_v2  ;;  %v4715_v57 = vld [vmem:[%s5904_s1 + $0xf8] sm:$0xff]   ;;  %v4716_v63 = vld [vmem:[%s5904_s1 + $0xb0] sm:$0xff]   ;;  %vm5154_vm5 = vmor %vm1030_vm3, %vm1031_vm4 }
  0x1d   : > { %4352 = vmatpush3.bf16.msra.mxu1 %v4699_v3  ;;  %4321 = vmatprep.subr.bf16.mxu0 %v4700_v4  ;;  %s265_s13 = sadd.s32 %s4622_s6, %s4621_s10  ;;  %v4717_v3 = vld [vmem:[%s5904_s1 + $0xf0] sm:$0xff]   ;;  %s4168_s6 = sshll.u32 %s4872_s19, 5 }
  0x1e   : > { %4353 = vmatprep.subr.bf16.mxu1 %v4701_v5  ;;  %s3738_s14 = sshll.u32 %s265_s13, 2  ;;  %s3598_s18 = sadd.s32 %s4172_s9, %s4168_s6 }
  0x1f   : > { %s5025_s12 = scalar_lea.vmem %s5903_s0, %s3738_s14  ;;  %s4169_s19 = sshll.u32 %s3598_s18, 7 }
  0x20   : > { %4322 = vmatpush3.bf16.msra.mxu0 %v4700_v4  ;;  %v4712_v12 = vld [vmem:[%s5025_s12] sm:$0xff]   ;;  %v523_v15 = vld [vmem:[%s5025_s12 + $0x8] sm:$0x1]  ;;  %v524_v25 = vld [vmem:[%s5025_s12 + $0xc] sm:$0xf]  ;;  %s5844_s23 = scalar_lea.hbm %s5907_s4, %s4169_s19  ;;  %s4886_s14 = smov [#allocation3]  }
  0x21   : > { %4354 = vmatpush3.bf16.msra.mxu1 %v4701_v5  ;;  %4323 = vmatprep.subr.bf16.mxu0 %v4702_v6  ;;  %v521_v13 = vld [vmem:[%s5025_s12] sm:$0xf]  ;;  %v522_v14 = vld [vmem:[%s5025_s12 + $0x4] sm:$0xf]  ;;  %v568_v22 = vshll.u32 %v523_v15, 16  ;;  %v573_v30 = vshrl.u32 %v524_v25, 16 }
  0x22   : > { %4355 = vmatprep.subr.bf16.mxu1 %v4703_v7  ;;  %4333 = vmatprep.mubr.bf16.mxu0 %v4712_v12  ;;  %v549_v17 = vshrl.u32 %v521_v13, 16  ;;  %v552_v18 = vshll.u32 %v521_v13, 16  ;;  %v558_v20 = vshll.u32 %v522_v14, 16  ;;  %v562_v21 = vshrl.u32 %v522_v14, 16  ;;  %v525_v29 = vld [vmem:[%s5025_s12 + $0x10] sm:$0xf] }
  0x23   : > { %v570_v28 = vrot.slane %v568_v22, 5  ;;  %v526_v33 = vld [vmem:[%s5025_s12 + $0x14] sm:$0x1]  ;;  %v576_v34 = vshll.u32 %v524_v25, 16  ;;  %v582_v35 = vshll.u32 %v525_v29, 16  ;;  %v586_v36 = vshrl.u32 %v525_v29, 16 }
  0x24   : > { %4324 = vmatpush3.bf16.msra.mxu0 %v4702_v6  ;;  %v551_v23 = vrot.slane %v549_v17, 4  ;;  %v554_v24 = vrot.slane %v552_v18, 5  ;;  %v560_v26 = vrot.slane %v558_v20, 5  ;;  %v564_v27 = vrot.slane %v562_v21, 4  ;;  %v4713_v53 = vld [vmem:[%s5025_s12 + $0xc] sm:$0xff]   ;;  %v4718_v4 = vld [vmem:[%s5025_s12 + $0x18] sm:$0xff]  }
  0x25   : > { %4356 = vmatpush3.bf16.msra.mxu1 %v4703_v7  ;;  %4325 = vmatprep.subr.bf16.mxu0 %v4704_v8  ;;  %v575_v39 = vrot.slane %v573_v30, 4  ;;  %v592_v40 = vshll.u32 %v526_v33, 16  ;;  %v578_v42 = vrot.slane %v576_v34, 5  ;;  %v584_v43 = vrot.slane %v582_v35, 5  ;;  %v527_v58 = vld [vmem:[%s5025_s12 + $0x18] sm:$0xf] }
  0x26   : > { %4357 = vmatprep.subr.bf16.mxu1 %v4705_v9  ;;  %v555_v32 = vor.u32 %v554_v24, %v551_v23  ;;  %v565_v38 = vor.u32 %v564_v27, %v560_v26  ;;  %v588_v44 = vrot.slane %v586_v36, 4  ;;  %v528_v59 = vld [vmem:[%s5025_s12 + $0x1c] sm:$0xf]  ;;  %v529_v60 = vld [vmem:[%s5025_s12 + $0x20] sm:$0x1]  ;;  %v597_v0 = vshrl.u32 %v527_v58, 16 }
  0x27   : > { %v594_v47 = vrot.slane %v592_v40, 5  ;;  %v579_v49 = vor.u32 %v578_v42, %v575_v39  ;;  %v600_v1 = vshll.u32 %v527_v58, 16  ;;  %v606_v5 = vshll.u32 %v528_v59, 16  ;;  %v532_v12 = vld [vmem:[%s5025_s12 + $0x2c] sm:$0x1]  ;;  %v4719_v30 = vld [vmem:[%s5025_s12 + $0x24] sm:$0xff]  }
  0x28   : > { %4326 = vmatpush3.bf16.msra.mxu0 %v4704_v8  ;;  %v556_v41 = vrot.slane %v555_v32, 4  ;;  %v566_v46 = vrot.slane %v565_v38, 4  ;;  %v589_v50 = vor.u32 %v588_v44, %v584_v43  ;;  %v610_v6 = vshrl.u32 %v528_v59, 16  ;;  %v530_v8 = vld [vmem:[%s5025_s12 + $0x24] sm:$0xf]  ;;  %v4720_v21 = vld [vmem:[%s5904_s1 + $0xa8] sm:$0xff]  }
  0x29   : > { %4358 = vmatpush3.bf16.msra.mxu1 %v4705_v9  ;;  %4327 = vmatprep.subr.bf16.mxu0 %v4706_v10  ;;  %v580_v54 = vrot.slane %v579_v49, 4  ;;  %v616_v7 = vshll.u32 %v529_v60, 16  ;;  %v599_v9 = vrot.slane %v597_v0, 4  ;;  %v608_v13 = vrot.slane %v606_v5, 5  ;;  %v4721_v32 = vld [vmem:[%s5904_s1 + $0xe8] sm:$0xff]   ;;  %v4722_v36 = vld [vmem:[%s5904_s1 + $0xa0] sm:$0xff]  }
  0x2a   : > { %4359 = vmatprep.subr.bf16.mxu1 %v4707_v11  ;;  %v561_v48 = vsel %vm5048_vm2, %v556_v41, %v560_v26  ;;  %v571_v51 = vsel %vm5048_vm2, %v566_v46, %v570_v28  ;;  %v590_v55 = vrot.slane %v589_v50, 4  ;;  %v612_v14 = vrot.slane %v610_v6, 4  ;;  %v4723_v39 = vld [vmem:[%s5904_s1 + $0xe0] sm:$0xff]   ;;  %v4724_v40 = vld [vmem:[%s5025_s12 + $0x30] sm:$0xff]   ;;  %v535_v46 = vld [vmem:[%s5025_s12 + $0x38] sm:$0x1] }
  0x2b   : > { %v3771_v52 = vcombine.low %v561_v48, %v571_v51  ;;  %v585_v61 = vsel %vm5048_vm2, %v580_v54, %v584_v43  ;;  %v618_v15 = vrot.slane %v616_v7, 5  ;;  %v624_v18 = vshll.u32 %v530_v8, 16  ;;  %v533_v41 = vld [vmem:[%s5025_s12 + $0x30] sm:$0xf]  ;;  %v536_v54 = vld [vmem:[%s5025_s12 + $0x3c] sm:$0xf] }
  0x2c   : > { %4328 = vmatpush3.bf16.msra.mxu0 %v4706_v10  ;;  %v595_v62 = vsel %vm5048_vm2, %v590_v55, %v594_v47  ;;  %v602_v10 = vrot.slane %v600_v1, 5  ;;  %v613_v22 = vor.u32 %v612_v14, %v608_v13  ;;  %v640_v24 = vshll.u32 %v532_v12, 16  ;;  %v537_v59 = vld [vmem:[%s5025_s12 + $0x40] sm:$0xf]  ;;  %v4726_v60 = vld [vmem:[%s5904_s1 + $0x98] sm:$0xff]   ;;  %s4796_s5 = sshll.u32 %s4886_s14, 4  ;;  %s4797_s5 = int_to_ptr.vmem [resolvable:$false] %s4796_s5 }
  0x2d   : > { %4360 = vmatpush3.bf16.msra.mxu1 %v4707_v11  ;;  %4329 = vmatprep.subr.bf16.mxu0 %v4708_v16  ;;  %v3772_v2 = vcombine.low %v585_v61, %v595_v62  ;;  %v531_v11 = vld [vmem:[%s5025_s12 + $0x28] sm:$0xf]  ;;  %v626_v26 = vrot.slane %v624_v18, 5  ;;  %v645_v47 = vshrl.u32 %v533_v41, 16  ;;  %v648_v48 = vshll.u32 %v533_v41, 16  ;;  %v4727_v7 = vld [vmem:[%s5904_s1 + $0xd8] sm:$0xff]  }
  0x2e   : > { %4361 = vmatprep.subr.bf16.mxu1 %v4709_v19  ;;  %4365 = vmatprep.mubr.bf16.mxu1 %v3771_v52  ;;  %v603_v17 = vor.u32 %v602_v10, %v599_v9  ;;  %v634_v20 = vshrl.u32 %v531_v11, 16  ;;  %v614_v29 = vrot.slane %v613_v22, 4  ;;  %v538_v0 = vld [vmem:[%s5025_s12 + $0x44] sm:$0x1]  ;;  %v669_v1 = vshrl.u32 %v536_v54, 16 }
  0x2f   : > { %v682_v5 = vshrl.u32 %v537_v59, 16  ;;  %v688_v6 = vshll.u32 %v538_v0, 16  ;;  %v4735_v0 = vld [vmem:[%s5904_s1 + $0xc0] sm:$0xff]  }
  0x30   : > { %4330 = vmatpush3.bf16.msra.mxu0 %v4708_v16  ;;  %v621_v16 = vshrl.u32 %v530_v8, 16  ;;  %v604_v25 = vrot.slane %v603_v17, 4  ;;  %v636_v28 = vrot.slane %v634_v20, 4  ;;  %v619_v38 = vsel %vm5048_vm2, %v614_v29, %v618_v15  ;;  %v4729_v20 = vld [vmem:[%s5904_s1 + $0xd0] sm:$0xff]  }
  0x31   : > { %4362 = vmatpush3.bf16.msra.mxu1 %v4709_v19  ;;  %4331 = vmatprep.subr.bf16.mxu0 %v4710_v31  ;;  %v630_v19 = vshll.u32 %v531_v11, 16  ;;  %v671_v9 = vrot.slane %v669_v1, 4  ;;  %v541_v29 = vld [vmem:[%s5025_s12 + $0x50] sm:$0x1] }
  0x32   : > { %4363 = vmatprep.subr.bf16.mxu1 %v4711_v45  ;;  %v623_v23 = vrot.slane %v621_v16, 4  ;;  %v609_v33 = vsel %vm5048_vm2, %v604_v25, %v608_v13  ;;  %v684_v13 = vrot.slane %v682_v5, 4  ;;  %v4728_v16 = vld [vmem:[%s5904_s1 + $0x90] sm:$0xff]  }
  0x33   : > { %v632_v27 = vrot.slane %v630_v19, 5  ;;  %v3773_v42 = vcombine.low %v609_v33, %v619_v38  ;;  %v690_v19 = vrot.slane %v688_v6, 5  ;;  %v4731_v33 = vld [vmem:[%s5025_s12 + $0x54] sm:$0xff]   ;;  %v712_v38 = vshll.u32 %v541_v29, 16  ;;  %v982_v6 = vld [vmem:[%s5025_s12] sm:$0xe] }
  0x34   : > { %4332 = vmatpush3.bf16.msra.mxu0 %v4710_v31  ;;  %v642_v31 = vrot.slane %v640_v24, 5  ;;  %v627_v34 = vor.u32 %v626_v26, %v623_v23  ;;  %v4730_v23 = vld [vmem:[%s5025_s12 + $0x48] sm:$0xff]  }
  0x35   : > { %4364 = vmatpush3.bf16.msra.mxu1 %v4711_v45  ;;  %4381 = vmatprep.subr.bf16.mxu0 %v4714_v56  ;;  %v637_v35 = vor.u32 %v636_v28, %v632_v27  ;;  %v534_v45 = vld [vmem:[%s5025_s12 + $0x34] sm:$0xf]  ;;  %v539_v26 = vld [vmem:[%s5025_s12 + $0x48] sm:$0xf] }
  0x36   : > { %4413 = vmatprep.subr.bf16.mxu1 %v4715_v57  ;;  %v628_v43 = vrot.slane %v627_v34, 4  ;;  %v654_v49 = vshll.u32 %v534_v45, 16  ;;  %v658_v50 = vshrl.u32 %v534_v45, 16  ;;  %v4732_v34 = vld [vmem:[%s5904_s1 + $0x88] sm:$0xff]  }
  0x37   : > { %4334 = vmatmul.mubr.bf16.vlgmr.msra.gmra.mxu0 %v4713_v53  ;;  %v638_v44 = vrot.slane %v637_v35, 4  ;;  %v664_v53 = vshll.u32 %v535_v46, 16  ;;  %v714_v46 = vrot.slane %v712_v38, 5  ;;  %v988_v38 = vld [vmem:[%s5025_s12 + $0x18] sm:$0xe] }
  0x38   : > { %4366 = vmatmul.mubr.bf16.vlgmr.msra.gmra.mxu1 %v3772_v2  ;;  %4382 = vmatpush3.bf16.msra.mxu0 %v4714_v56  ;;  %v633_v51 = vsel %vm5048_vm2, %v628_v43, %v632_v27  ;;  %v647_v56 = vrot.slane %v645_v47, 4  ;;  %v656_v58 = vrot.slane %v654_v49, 5  ;;  %v660_v61 = vrot.slane %v658_v50, 4  ;;  %v540_v27 = vld [vmem:[%s5025_s12 + $0x4c] sm:$0xf] }
  0x39   : > { %4414 = vmatpush3.bf16.msra.mxu1 %v4715_v57  ;;  %4383 = vmatprep.subr.bf16.mxu0 %v4716_v63  ;;  %v643_v52 = vsel %vm5048_vm2, %v638_v44, %v642_v31  ;;  %v650_v57 = vrot.slane %v648_v48, 5  ;;  %v666_v62 = vrot.slane %v664_v53, 5  ;;  %v672_v2 = vshll.u32 %v536_v54, 16  ;;  %v542_v43 = vld [vmem:[%s5025_s12 + $0x54] sm:$0xf]  ;;  %v4733_v44 = vld [vmem:[%s5904_s1 + $0xc8] sm:$0xff]  }
  0x3a   : > { %4415 = vmatprep.subr.bf16.mxu1 %v4717_v3  ;;  %4337 = vmatprep.mubr.bf16.mxu0 %v4718_v4  ;;  %v3774_v55 = vcombine.low %v633_v51, %v643_v52  ;;  %v678_v4 = vshll.u32 %v537_v59, 16  ;;  %v661_v8 = vor.u32 %v660_v61, %v656_v58  ;;  %v696_v31 = vshll.u32 %v539_v26, 16  ;;  %v543_v47 = vld [vmem:[%s5025_s12 + $0x58] sm:$0xf]  ;;  %v544_v48 = vld [vmem:[%s5025_s12 + $0x5c] sm:$0x1] }
  0x3b   : > { %4369 = vmatprep.mubr.bf16.mxu1 %v3773_v42  ;;  %v674_v10 = vrot.slane %v672_v2, 5  ;;  %v717_v50 = vshrl.u32 %v542_v43, 16  ;;  %v720_v51 = vshll.u32 %v542_v43, 16  ;;  %v726_v52 = vshll.u32 %v543_v47, 16  ;;  %v4734_v53 = vld [vmem:[%s5904_s1 + $0x80] sm:$0xff]   ;;  %v4741_v43 = vld [vmem:[%s5904_s1 + $0x170] sm:$0xff]  }
  0x3c   : > { %4384 = vmatpush3.bf16.msra.mxu0 %v4716_v63  ;;  %v4725_v63 = vld [vmem:[%s5025_s12 + $0x3c] sm:$0xff]   ;;  %v680_v12 = vrot.slane %v678_v4, 5  ;;  %v662_v14 = vrot.slane %v661_v8, 4  ;;  %v698_v41 = vrot.slane %v696_v31, 5  ;;  %v984_v8 = vld [vmem:[%s5025_s12 + $0x8] sm:$0x1] }
  0x3d   : > { %4416 = vmatpush3.bf16.msra.mxu1 %v4717_v3  ;;  %4385 = vmatprep.subr.bf16.mxu0 %v4720_v21  ;;  %v651_v3 = vor.u32 %v650_v57, %v647_v56  ;;  %v675_v15 = vor.u32 %v674_v10, %v671_v9  ;;  %v736_v56 = vshll.u32 %v544_v48, 16  ;;  %v722_v59 = vrot.slane %v720_v51, 5  ;;  %v4738_v31 = vld [vmem:[%s5904_s1 + $0x138] sm:$0xff]   ;;  %v992_v48 = vld [vmem:[%s5025_s12 + $0x28] sm:$0xf] }
  0x3e   : > { %4417 = vmatprep.subr.bf16.mxu1 %v4721_v32  ;;  %v685_v18 = vor.u32 %v684_v13, %v680_v12  ;;  %v1056_v51 = vrot.slane %v992_v48, 5  ;;  %v4755_v48 = vld [vmem:[%s5025_s12 + $0x60] sm:$0xff]  }
  0x3f   : > { %4338 = vmatmul.mubr.bf16.gmra.mxu0 %v4719_v30  ;;  %v652_v11 = vrot.slane %v651_v3, 4  ;;  %v676_v22 = vrot.slane %v675_v15, 4  ;;  %v693_v30 = vshrl.u32 %v539_v26, 16  ;;  %v4736_v15 = vld [vmem:[%s5025_s12 + $0xc] sm:$0xff]  }
  0x40   : > { %4386 = vmatpush3.bf16.msra.mxu0 %v4720_v21  ;;  %4341 = vmatprep.mubr.bf16.mxu0 %v4724_v40  ;;  %v667_v21 = vsel %vm5048_vm2, %v662_v14, %v666_v62  ;;  %v686_v25 = vrot.slane %v685_v18, 4  ;;  %v1038_v14 = vrot.slane %v984_v8, 5  ;;  %v4748_v8 = vld [vmem:[%s5025_s12 + $0x3c] sm:$0xff]  }
  0x41   : > { %4418 = vmatpush3.bf16.msra.mxu1 %v4721_v32  ;;  %4387 = vmatprep.subr.bf16.mxu0 %v4722_v36  ;;  %v657_v17 = vsel %vm5048_vm2, %v652_v11, %v656_v58  ;;  %v681_v28 = vsel %vm5048_vm2, %v676_v22, %v680_v12  ;;  %v702_v32 = vshll.u32 %v540_v27, 16  ;;  %v695_v40 = vrot.slane %v693_v30, 4 }
  0x42   : > { %4370 = vmatmul.mubr.bf16.gmra.mxu1 %v3774_v55  ;;  %4419 = vmatprep.subr.bf16.mxu1 %v4723_v39  ;;  %v3775_v24 = vcombine.low %v657_v17, %v667_v21  ;;  %v691_v35 = vsel %vm5048_vm2, %v686_v25, %v690_v19  ;;  %v730_v55 = vshrl.u32 %v543_v47, 16  ;;  %v719_v58 = vrot.slane %v717_v50, 4  ;;  %v987_v21 = vld [vmem:[%s5025_s12 + $0x14] sm:$0x1] }
  0x43   : > { %v704_v42 = vrot.slane %v702_v32, 5  ;;  %v699_v49 = vor.u32 %v698_v41, %v695_v40  ;;  %v3787_v11 = vrot.slane %v982_v6, 9  ;;  %v1045_v25 = vrot.slane %v987_v21, 5  ;;  %v4739_v32 = vld [vmem:[%s5904_s1 + $0x178] sm:$0xff]   ;;  %v990_v40 = vld [vmem:[%s5025_s12 + $0x20] sm:$0x1] }
  0x44   : > { %4388 = vmatpush3.bf16.msra.mxu0 %v4722_v36  ;;  %4373 = vmatprep.mubr.bf16.mxu1 %v3775_v24  ;;  %v706_v36 = vshrl.u32 %v540_v27, 16  ;;  %v732_v62 = vrot.slane %v730_v55, 4  ;;  %v723_v3 = vor.u32 %v722_v59, %v719_v58  ;;  %v3789_v41 = vrot.slane %v988_v38, 9  ;;  %v4744_v58 = vld [vmem:[%s5904_s1 + $0x128] sm:$0xff]   ;;  %v4750_v21 = vld [vmem:[%s5904_s1 + $0x118] sm:$0xff]  }
  0x45   : > { %4420 = vmatpush3.bf16.msra.mxu1 %v4723_v39  ;;  %4389 = vmatprep.subr.bf16.mxu0 %v4726_v60  ;;  %v3776_v39 = vcombine.low %v681_v28, %v691_v35  ;;  %v700_v57 = vrot.slane %v699_v49, 4  ;;  %v4737_v35 = vld [vmem:[%s5025_s12 + $0x18] sm:$0xff]   ;;  %v993_v49 = vld [vmem:[%s5025_s12 + $0x2c] sm:$0x1] }
  0x46   : > { %4421 = vmatprep.subr.bf16.mxu1 %v4727_v7  ;;  %v708_v45 = vrot.slane %v706_v36, 4  ;;  %v724_v10 = vrot.slane %v723_v3, 4  ;;  %v4740_v36 = vld [vmem:[%s5904_s1 + $0x130] sm:$0xff]   ;;  %v4747_v3 = vld [vmem:[%s5904_s1 + $0x160] sm:$0xff]  }
  0x47   : > { %4342 = vmatmul.mubr.bf16.gmra.mxu0 %v4725_v63  ;;  %v738_v63 = vrot.slane %v736_v56, 5  ;;  %v705_v2 = vsel %vm5048_vm2, %v700_v57, %v704_v42  ;;  %v1058_v57 = vrot.slane %v1056_v51, 4 }
  0x48   : > { %4390 = vmatpush3.bf16.msra.mxu0 %v4726_v60  ;;  %4345 = vmatprep.mubr.bf16.mxu0 %v4730_v23  ;;  %v709_v54 = vor.u32 %v708_v45, %v704_v42  ;;  %v728_v60 = vrot.slane %v726_v52, 5  ;;  %v991_v45 = vld [vmem:[%s5025_s12 + $0x24] sm:$0xe]  ;;  %v1059_v52 = vrot.slane %v993_v49, 5  ;;  %v4756_v49 = vld [vmem:[%s5904_s1 + $0x108] sm:$0xff]  }
  0x49   : > { %4422 = vmatpush3.bf16.msra.mxu1 %v4727_v7  ;;  %4391 = vmatprep.subr.bf16.mxu0 %v4728_v16  ;;  %v983_v7 = vld [vmem:[%s5025_s12 + $0x4] sm:$0xf]  ;;  %v3790_v50 = vrot.slane %v991_v45, 9 }
  0x4a   : > { %4423 = vmatprep.subr.bf16.mxu1 %v4729_v20  ;;  %4374 = vmatmul.mubr.bf16.gmra.mxu1 %v3776_v39  ;;  %v710_v61 = vrot.slane %v709_v54, 4  ;;  %v733_v5 = vor.u32 %v732_v62, %v728_v60  ;;  %v1035_v12 = vrot.slane %v983_v7, 5  ;;  %v729_v17 = vsel %vm5048_vm2, %v724_v10, %v728_v60  ;;  %v989_v39 = vld [vmem:[%s5025_s12 + $0x1c] sm:$0xf]  ;;  %v4742_v54 = vld [vmem:[%s5025_s12 + $0x24] sm:$0xff]   ;;  %v4743_v60 = vld [vmem:[%s5025_s12 + $0x30] sm:$0xff]  }
  0x4b   : > { %v1049_v42 = vrot.slane %v989_v39, 5  ;;  %v1057_v56 = vsel %vm5154_vm5, %v3790_v50, %v1056_v51  ;;  %v1060_v59 = vsel %vm5154_vm5, %v1058_v57, %v1059_v52  ;;  %v1004_v39 = vld [vmem:[%s5025_s12 + $0x58] sm:$0xf]  ;;  %v4757_v50 = vld [vmem:[%s5904_s1 + $0x148] sm:$0xff]   ;;  %v4758_v52 = vld [vmem:[%s5904_s1 + $0x100] sm:$0xff]  }
  0x4c   : > { %4392 = vmatpush3.bf16.msra.mxu0 %v4728_v16  ;;  %v715_v4 = vsel %vm5048_vm2, %v710_v61, %v714_v46  ;;  %v734_v13 = vrot.slane %v733_v5, 4  ;;  %v985_v16 = vld [vmem:[%s5025_s12 + $0xc] sm:$0xe]  ;;  %v1036_v18 = vsel %vm5154_vm5, %v3787_v11, %v1035_v12  ;;  %v1037_v19 = vrot.slane %v1035_v12, 4  ;;  %v998_v12 = vld [vmem:[%s5025_s12 + $0x40] sm:$0xf] }
  0x4d   : > { %4393 = vmatprep.subr.bf16.mxu0 %v4732_v34  ;;  %4424 = vmatpush3.bf16.msra.mxu1 %v4729_v20  ;;  %v3777_v9 = vcombine.low %v705_v2, %v715_v4  ;;  %v986_v20 = vld [vmem:[%s5025_s12 + $0x10] sm:$0xf]  ;;  %v3788_v22 = vrot.slane %v985_v16, 9  ;;  %v1050_v46 = vsel %vm5154_vm5, %v3789_v41, %v1049_v42  ;;  %v1051_v47 = vrot.slane %v1049_v42, 4  ;;  %v4745_v61 = vld [vmem:[%s5904_s1 + $0x168] sm:$0xff]  }
  0x4e   : > { %4425 = vmatprep.subr.bf16.mxu1 %v4733_v44  ;;  %v739_v23 = vsel %vm5048_vm2, %v734_v13, %v738_v63  ;;  %v1042_v24 = vrot.slane %v986_v20, 5  ;;  %v1039_v27 = vsel %vm5154_vm5, %v1037_v19, %v1038_v14  ;;  %v3814_v62 = vcombine.low %v1057_v56, %v1060_v59  ;;  %v4746_v63 = vld [vmem:[%s5904_s1 + $0x120] sm:$0xff]   ;;  %v995_v2 = vld [vmem:[%s5025_s12 + $0x34] sm:$0xf]  ;;  %v996_v4 = vld [vmem:[%s5025_s12 + $0x38] sm:$0x1] }
  0x4f   : > { %4346 = vmatmul.mubr.bf16.gmra.mxu0 %v4731_v33  ;;  %4377 = vmatprep.mubr.bf16.mxu1 %v3777_v9  ;;  %v3778_v26 = vcombine.low %v729_v17, %v739_v23  ;;  %v3811_v28 = vcombine.low %v1036_v18, %v1039_v27  ;;  %v1063_v6 = vrot.slane %v995_v2, 5  ;;  %v1066_v7 = vrot.slane %v996_v4, 5  ;;  %v997_v9 = vld [vmem:[%s5025_s12 + $0x3c] sm:$0xe]  ;;  %v999_v13 = vld [vmem:[%s5025_s12 + $0x44] sm:$0x1] }
  0x50   : > { %4394 = vmatpush3.bf16.msra.mxu0 %v4732_v34  ;;  %v1043_v29 = vsel %vm5154_vm5, %v3788_v22, %v1042_v24  ;;  %v1044_v30 = vrot.slane %v1042_v24, 4  ;;  %v3792_v14 = vrot.slane %v997_v9, 9  ;;  %v1073_v16 = vrot.slane %v999_v13, 5  ;;  %v4749_v22 = vld [vmem:[%s5025_s12 + $0x48] sm:$0xff]   ;;  %v4751_v23 = vld [vmem:[%s5904_s1 + $0x158] sm:$0xff]   ;;  %v4753_v27 = vld [vmem:[%s5904_s1 + $0x150] sm:$0xff]  }
  0x51   : > { %4395 = vmatprep.subr.bf16.mxu0 %v4734_v53  ;;  %4426 = vmatpush3.bf16.msra.mxu1 %v4733_v44  ;;  %v1052_v44 = vrot.slane %v990_v40, 5  ;;  %v1065_v11 = vrot.slane %v1063_v6, 4  ;;  %v1005_v40 = vld [vmem:[%s5025_s12 + $0x5c] sm:$0x1]  ;;  %v1084_v42 = vrot.slane %v1004_v39, 5 }
  0x52   : > { %4427 = vmatprep.subr.bf16.mxu1 %v4735_v0  ;;  %4378 = vmatmul.mubr.bf16.gmra.mxu1 %v3778_v26  ;;  %v1046_v33 = vsel %vm5154_vm5, %v1044_v30, %v1045_v25  ;;  %v4752_v25 = vld [vmem:[%s5904_s1 + $0x110] sm:$0xff]   ;;  %v5286_v2 = vld [vmem:[%s5904_s1 + $0x1b8] sm:$0xff]  }
  0x53   : > { %4397 = vmatprep.mubr.bf16.mxu0 %v3811_v28  ;;  %4429 = vmatprep.mubr.bf16.mxu1 %v4736_v15  ;;  %v3812_v34 = vcombine.low %v1043_v29, %v1046_v33  ;;  %v1070_v15 = vrot.slane %v998_v12, 5  ;;  %v1067_v17 = vsel %vm5154_vm5, %v1065_v11, %v1066_v7  ;;  %v1000_v28 = vld [vmem:[%s5025_s12 + $0x48] sm:$0xe]  ;;  %v1001_v29 = vld [vmem:[%s5025_s12 + $0x4c] sm:$0xf] }
  0x54   : > { %4396 = vmatpush3.bf16.msra.mxu0 %v4734_v53  ;;  %v1053_v53 = vsel %vm5154_vm5, %v1051_v47, %v1052_v44  ;;  %v1002_v30 = vld [vmem:[%s5025_s12 + $0x50] sm:$0x1]  ;;  %v1086_v47 = vrot.slane %v1084_v42, 4  ;;  %v3877_v57 = vld [vmem:[%s5025_s12 + $0x14] sm:$0x1] }
  0x55   : > { %4428 = vmatpush3.bf16.msra.mxu1 %v4735_v0  ;;  %4445 = vmatprep.subr.bf16.mxu0 %v4738_v31  ;;  %v3813_v55 = vcombine.low %v1050_v46, %v1053_v53  ;;  %v994_v0 = vld [vmem:[%s5025_s12 + $0x30] sm:$0xe]  ;;  %v1071_v19 = vsel %vm5154_vm5, %v3792_v14, %v1070_v15  ;;  %v1072_v20 = vrot.slane %v1070_v15, 4  ;;  %v1080_v33 = vrot.slane %v1002_v30, 5  ;;  %v3933_v7 = vld [vmem:[%s5025_s12 + $0x14] sm:$0x1] }
  0x56   : > { %4477 = vmatprep.subr.bf16.mxu1 %v4739_v32  ;;  %v3791_v5 = vrot.slane %v994_v0, 9  ;;  %v3876_v56 = vld [vmem:[%s5025_s12 + $0x10] sm:$0xf]  ;;  %v2117_v11 = vrot.slane %v3933_v7, 5  ;;  %v3878_v12 = vld [vmem:[%s5025_s12 + $0x18] sm:$0xf] }
  0x57   : > { %4398 = vmatmul.mubr.bf16.vlgmr.msra.gmra.mxu0 %v3812_v34  ;;  %v1074_v24 = vsel %vm5154_vm5, %v1072_v20, %v1073_v16  ;;  %v4754_v34 = vld [vmem:[%s5025_s12 + $0x54] sm:$0xff]   ;;  %v3932_v0 = vld [vmem:[%s5025_s12 + $0x10] sm:$0xf]  ;;  %v3879_v15 = vld [vmem:[%s5025_s12 + $0x1c] sm:$0xf] }
  0x58   : > { %4446 = vmatpush3.bf16.msra.mxu0 %v4738_v31  ;;  %4401 = vmatprep.mubr.bf16.mxu0 %v3813_v55  ;;  %v1064_v10 = vsel %vm5154_vm5, %v3791_v5, %v1063_v6  ;;  %v3816_v26 = vcombine.low %v1071_v19, %v1074_v24  ;;  %v3793_v31 = vrot.slane %v1000_v28, 9  ;;  %v3875_v55 = vld [vmem:[%s5025_s12 + $0xc] sm:$0xf]  ;;  %v3880_v16 = vld [vmem:[%s5025_s12 + $0x20] sm:$0x1]  ;;  %v5298_v24 = vld [vmem:[%s5904_s1 + $0x1f8] sm:$0xff]  }
  0x59   : > { %4447 = vmatprep.subr.bf16.mxu0 %v4740_v36  ;;  %v3815_v18 = vcombine.low %v1064_v10, %v1067_v17  ;;  %v1634_v59 = vshll.u32 %v3875_v55, 16  ;;  %v2114_v10 = vrot.slane %v3932_v0, 5  ;;  %v1655_v17 = vshrl.u32 %v3878_v12, 16  ;;  %v3938_v0 = vld [vmem:[%s5025_s12 + $0x28] sm:$0xf] }
  0x5a   : > { %4430 = vmatmul.mubr.bf16.vlgmr.msra.gmra.mxu1 %v4737_v35  ;;  %v1003_v35 = vld [vmem:[%s5025_s12 + $0x54] sm:$0xe] }
  0x5b   : > { %4478 = vmatpush3.bf16.msra.mxu1 %v4739_v32  ;;  %4433 = vmatprep.mubr.bf16.mxu1 %v4742_v54  ;;  %v1077_v32 = vrot.slane %v1001_v29, 5  ;;  %v3794_v41 = vrot.slane %v1003_v35, 9  ;;  %v4759_v54 = vld [vmem:[%s5904_s1 + $0x140] sm:$0xff]   ;;  %v1636_v4 = vrot.slane %v1634_v59, 5  ;;  %v2116_v20 = vrot.slane %v2114_v10, 4 }
  0x5c   : > { %4448 = vmatpush3.bf16.msra.mxu0 %v4740_v36  ;;  %4479 = vmatprep.subr.bf16.mxu1 %v4741_v43  ;;  %v3935_v29 = vld [vmem:[%s5025_s12 + $0x1c] sm:$0xf] }
  0x5d   : > { %4449 = vmatprep.subr.bf16.mxu0 %v4744_v58  ;;  %v1078_v36 = vsel %vm5154_vm5, %v3793_v31, %v1077_v32  ;;  %v1079_v38 = vrot.slane %v1077_v32, 4  ;;  %v1085_v46 = vsel %vm5154_vm5, %v3794_v41, %v1084_v42  ;;  %v2118_v30 = vsel %vm5154_vm5, %v2116_v20, %v2117_v11  ;;  %v4765_v20 = vld [vmem:[%s5904_s1 + $0x1e8] sm:$0xff]  }
  0x5f   : > { %4480 = vmatpush3.bf16.msra.mxu1 %v4741_v43  ;;  %4402 = vmatmul.mubr.bf16.gmra.mxu0 %v3814_v62  ;;  %v1087_v43 = vrot.slane %v1005_v40, 5  ;;  %v1081_v44 = vsel %vm5154_vm5, %v1079_v38, %v1080_v33  ;;  %v1650_v62 = vshll.u32 %v3877_v57, 16  ;;  %v1674_v33 = vshll.u32 %v3880_v16, 16 }
  0x60   : > { %4481 = vmatprep.subr.bf16.mxu1 %v4745_v61  ;;  %4450 = vmatpush3.bf16.msra.mxu0 %v4744_v58  ;;  %v3817_v45 = vcombine.low %v1078_v36, %v1081_v44  ;;  %v1631_v58 = vshrl.u32 %v3875_v55, 16  ;;  %v3883_v55 = vld [vmem:[%s5025_s12 + $0x2c] sm:$0x1] }
  0x61   : > { %4451 = vmatprep.subr.bf16.mxu0 %v4746_v63  ;;  %4405 = vmatprep.mubr.bf16.mxu0 %v3815_v18  ;;  %v1088_v51 = vsel %vm5154_vm5, %v1086_v47, %v1087_v43  ;;  %v1658_v18 = vshll.u32 %v3878_v12, 16  ;;  %v1676_v42 = vrot.slane %v1674_v33, 5  ;;  %v2128_v12 = vrot.slane %v3938_v0, 5 }
  0x62   : > { %4434 = vmatmul.mubr.bf16.gmra.mxu1 %v4743_v60  ;;  %v3818_v53 = vcombine.low %v1085_v46, %v1088_v51  ;;  %v1640_v60 = vshll.u32 %v3876_v56, 16  ;;  %v3881_v51 = vld [vmem:[%s5025_s12 + $0x24] sm:$0xf] }
  0x63   : > { %4482 = vmatpush3.bf16.msra.mxu1 %v4745_v61  ;;  %4437 = vmatprep.mubr.bf16.mxu1 %v4748_v8  ;;  %v1644_v61 = vshrl.u32 %v3876_v56, 16  ;;  %v1652_v8 = vrot.slane %v1650_v62, 5  ;;  %v1660_v28 = vrot.slane %v1658_v18, 5  ;;  %v1679_v56 = vshrl.u32 %v3881_v51, 16  ;;  %v3886_v18 = vld [vmem:[%s5025_s12 + $0x38] sm:$0x1] }
  0x64   : > { %4483 = vmatprep.subr.bf16.mxu1 %v4747_v3  ;;  %4452 = vmatpush3.bf16.msra.mxu0 %v4746_v63  ;;  %v3931_v63 = vld [vmem:[%s5025_s12 + $0xc] sm:$0xe]  ;;  %v1642_v5 = vrot.slane %v1640_v60, 5  ;;  %v1682_v57 = vshll.u32 %v3881_v51, 16  ;;  %v1698_v62 = vshll.u32 %v3883_v55, 16 }
  0x65   : > { %4453 = vmatprep.subr.bf16.mxu0 %v4750_v21  ;;  %v1646_v6 = vrot.slane %v1644_v61, 4  ;;  %v3955_v9 = vrot.slane %v3931_v63, 9  ;;  %v3937_v63 = vld [vmem:[%s5025_s12 + $0x24] sm:$0xe]  ;;  %v3887_v51 = vld [vmem:[%s5025_s12 + $0x3c] sm:$0xf] }
  0x66   : > { %v3957_v11 = vrot.slane %v3937_v63, 9  ;;  %v3888_v55 = vld [vmem:[%s5025_s12 + $0x40] sm:$0xf]  ;;  %v4769_v63 = vld [vmem:[%s5904_s1 + $0x1d8] sm:$0xff]  }
  0x67   : > { %4484 = vmatpush3.bf16.msra.mxu1 %v4747_v3  ;;  %4406 = vmatmul.mubr.bf16.gmra.mxu0 %v3816_v26  ;;  %v1633_v3 = vrot.slane %v1631_v58, 4  ;;  %v1647_v14 = vor.u32 %v1646_v6, %v1642_v5  ;;  %v2115_v19 = vsel %vm5154_vm5, %v3955_v9, %v2114_v10  ;;  %v1684_v6 = vrot.slane %v1682_v57, 5  ;;  %v4768_v57 = vld [vmem:[%s5904_s1 + $0x198] sm:$0xff]  }
  0x68   : > { %4485 = vmatprep.subr.bf16.mxu1 %v4751_v23  ;;  %4454 = vmatpush3.bf16.msra.mxu0 %v4750_v21  ;;  %v1664_v21 = vshll.u32 %v3879_v15, 16  ;;  %v3979_v38 = vcombine.low %v2115_v19, %v2118_v30  ;;  %v1700_v10 = vrot.slane %v1698_v62, 5  ;;  %v3943_v62 = vld [vmem:[%s5025_s12 + $0x3c] sm:$0xe] }
  0x69   : > { %4455 = vmatprep.subr.bf16.mxu0 %v4752_v25  ;;  %4409 = vmatprep.mubr.bf16.mxu0 %v3817_v45  ;;  %v1637_v13 = vor.u32 %v1636_v4, %v1633_v3  ;;  %v1648_v26 = vrot.slane %v1647_v14, 4  ;;  %v2121_v45 = vrot.slane %v3935_v29, 5  ;;  %v4763_v4 = vld [vmem:[%s5904_s1 + $0x1f0] sm:$0xff]   ;;  %v4764_v14 = vld [vmem:[%s5904_s1 + $0x1a8] sm:$0xff]  }
  0x6a   : > { %4438 = vmatmul.mubr.bf16.gmra.mxu1 %v4749_v22  ;;  %v1668_v22 = vshrl.u32 %v3879_v15, 16  ;;  %v1666_v31 = vrot.slane %v1664_v21, 5 }
  0x6b   : > { %4486 = vmatpush3.bf16.msra.mxu1 %v4751_v23  ;;  %4441 = vmatprep.mubr.bf16.mxu1 %v4754_v34  ;;  %v3934_v23 = vld [vmem:[%s5025_s12 + $0x18] sm:$0xe]  ;;  %v3936_v34 = vld [vmem:[%s5025_s12 + $0x20] sm:$0x1]  ;;  %v1653_v36 = vsel %vm5048_vm2, %v1648_v26, %v1652_v8  ;;  %v3939_v8 = vld [vmem:[%s5025_s12 + $0x2c] sm:$0x1] }
  0x6c   : > { %4487 = vmatprep.subr.bf16.mxu1 %v4753_v27  ;;  %4456 = vmatpush3.bf16.msra.mxu0 %v4752_v25  ;;  %v1638_v25 = vrot.slane %v1637_v13, 4  ;;  %v1670_v32 = vrot.slane %v1668_v22, 4  ;;  %v3956_v43 = vrot.slane %v3934_v23, 9  ;;  %v2124_v46 = vrot.slane %v3936_v34, 5  ;;  %v3884_v13 = vld [vmem:[%s5025_s12 + $0x30] sm:$0xf] }
  0x6d   : > { %4457 = vmatprep.subr.bf16.mxu0 %v4756_v49  ;;  %v2131_v16 = vrot.slane %v3939_v8, 5  ;;  %v1703_v19 = vshrl.u32 %v3884_v13, 16  ;;  %v2129_v22 = vsel %vm5154_vm5, %v3957_v11, %v2128_v12  ;;  %v2130_v23 = vrot.slane %v2128_v12, 4  ;;  %v3941_v26 = vld [vmem:[%s5025_s12 + $0x34] sm:$0xf] }
  0x6e   : > { %v1643_v35 = vsel %vm5048_vm2, %v1638_v25, %v1642_v5  ;;  %v1671_v41 = vor.u32 %v1670_v32, %v1666_v31  ;;  %v1681_v5 = vrot.slane %v1679_v56, 4  ;;  %v1706_v25 = vshll.u32 %v3884_v13, 16  ;;  %v3889_v56 = vld [vmem:[%s5025_s12 + $0x44] sm:$0x1]  ;;  %v3890_v12 = vld [vmem:[%s5025_s12 + $0x48] sm:$0xf] }
  0x6f   : > { %4488 = vmatpush3.bf16.msra.mxu1 %v4753_v27  ;;  %4410 = vmatmul.mubr.bf16.gmra.mxu0 %v3818_v53  ;;  %v1657_v27 = vrot.slane %v1655_v17, 4  ;;  %v3915_v40 = vcombine.low %v1643_v35, %v1653_v36  ;;  %v3885_v17 = vld [vmem:[%s5025_s12 + $0x34] sm:$0xf]  ;;  %v2132_v33 = vsel %vm5154_vm5, %v2130_v23, %v2131_v16  ;;  %v1722_v34 = vshll.u32 %v3886_v18, 16  ;;  %v4766_v35 = vld [vmem:[%s5904_s1 + $0x1a0] sm:$0xff]  }
  0x70   : > { %4489 = vmatprep.subr.bf16.mxu1 %v4757_v50  ;;  %4458 = vmatpush3.bf16.msra.mxu0 %v4756_v49  ;;  %v1672_v47 = vrot.slane %v1671_v41, 4  ;;  %v2122_v49 = vsel %vm5154_vm5, %v3956_v43, %v2121_v45  ;;  %v1685_v15 = vor.u32 %v1684_v6, %v1681_v5  ;;  %v1712_v29 = vshll.u32 %v3885_v17, 16  ;;  %v4767_v41 = vld [vmem:[%s5904_s1 + $0x1e0] sm:$0xff]   ;;  %v3891_v13 = vld [vmem:[%s5025_s12 + $0x4c] sm:$0xf] }
  0x71   : > { %4459 = vmatprep.subr.bf16.mxu0 %v4758_v52  ;;  %v1661_v39 = vor.u32 %v1660_v28, %v1657_v27  ;;  %4461 = vmatprep.mubr.bf16.mxu0 %v3915_v40  ;;  %v1705_v28 = vrot.slane %v1703_v19, 4  ;;  %v1716_v30 = vshrl.u32 %v3885_v17, 16  ;;  %v1746_v5 = vshll.u32 %v3889_v56, 16  ;;  %v3944_v6 = vld [vmem:[%s5025_s12 + $0x40] sm:$0xf] }
  0x72   : > { %4442 = vmatmul.mubr.bf16.gmra.mxu1 %v4755_v48  ;;  %v1677_v53 = vsel %vm5048_vm2, %v1672_v47, %v1676_v42  ;;  %v1686_v27 = vrot.slane %v1685_v15, 4  ;;  %v3959_v17 = vrot.slane %v3943_v62, 9  ;;  %v3892_v18 = vld [vmem:[%s5025_s12 + $0x50] sm:$0x1]  ;;  %v3946_v23 = vld [vmem:[%s5025_s12 + $0x48] sm:$0xe] }
  0x73   : > { %4490 = vmatpush3.bf16.msra.mxu1 %v4757_v50  ;;  %4493 = vmatprep.mubr.bf16.mxu1 %v3979_v38  ;;  %v1662_v44 = vrot.slane %v1661_v39, 4  ;;  %v2123_v50 = vrot.slane %v2121_v45, 4  ;;  %v3981_v38 = vcombine.low %v2129_v22, %v2132_v33  ;;  %v1714_v39 = vrot.slane %v1712_v29, 5  ;;  %v3947_v29 = vld [vmem:[%s5025_s12 + $0x4c] sm:$0xf] }
  0x74   : > { %4491 = vmatprep.subr.bf16.mxu1 %v4759_v54  ;;  %4460 = vmatpush3.bf16.msra.mxu0 %v4758_v52  ;;  %v3882_v52 = vld [vmem:[%s5025_s12 + $0x28] sm:$0xf]  ;;  %v1718_v40 = vrot.slane %v1716_v30, 4  ;;  %v1748_v16 = vrot.slane %v1746_v5, 5  ;;  %v1751_v22 = vshrl.u32 %v3890_v12, 16  ;;  %v4771_v30 = vld [vmem:[%s5904_s1 + $0x1d0] sm:$0xff]  }
  0x75   : > { %4509 = vmatprep.subr.bf16.mxu0 %v5286_v2  ;;  %v1667_v48 = vsel %vm5048_vm2, %v1662_v44, %v1666_v31  ;;  %v1688_v58 = vshll.u32 %v3882_v52, 16  ;;  %v2125_v60 = vsel %vm5154_vm5, %v2123_v50, %v2124_v46  ;;  %v1692_v61 = vshrl.u32 %v3882_v52, 16  ;;  %v3942_v31 = vld [vmem:[%s5025_s12 + $0x38] sm:$0x1]  ;;  %v3949_v5 = vld [vmem:[%s5025_s12 + $0x54] sm:$0xe] }
  0x76   : > { %v3916_v59 = vcombine.low %v1667_v48, %v1677_v53  ;;  %v3980_v3 = vcombine.low %v2122_v49, %v2125_v60  ;;  %v1724_v44 = vrot.slane %v1722_v34, 5  ;;  %v1719_v47 = vor.u32 %v1718_v40, %v1714_v39  ;;  %v3948_v34 = vld [vmem:[%s5025_s12 + $0x50] sm:$0x1] }
  0x77   : > { %4492 = vmatpush3.bf16.msra.mxu1 %v4759_v54  ;;  %v4762_v54 = vld [vmem:[%s5904_s1 + $0x1b0] sm:$0xff]   ;;  %v1690_v7 = vrot.slane %v1688_v58, 5  ;;  %v1694_v9 = vrot.slane %v1692_v61, 4  ;;  %v2135_v48 = vrot.slane %v3941_v26, 5  ;;  %v2138_v49 = vrot.slane %v3942_v31, 5 }
  0x78   : > { %4541 = vmatprep.subr.bf16.mxu1 %v5298_v24  ;;  %4462 = vmatmul.mubr.bf16.vlgmr.msra.gmra.mxu0 %v3916_v59  ;;  %v1720_v52 = vrot.slane %v1719_v47, 4  ;;  %v1727_v59 = vshrl.u32 %v3887_v51, 16  ;;  %v1730_v60 = vshll.u32 %v3887_v51, 16  ;;  %v1736_v61 = vshll.u32 %v3888_v55, 16 }
  0x79   : > { %4510 = vmatpush3.bf16.msra.mxu0 %v5286_v2  ;;  %v1695_v21 = vor.u32 %v1694_v9, %v1690_v7  ;;  %v3940_v2 = vld [vmem:[%s5025_s12 + $0x30] sm:$0xe]  ;;  %v1691_v36 = vsel %vm5048_vm2, %v1686_v27, %v1690_v7  ;;  %v3945_v7 = vld [vmem:[%s5025_s12 + $0x44] sm:$0x1]  ;;  %v1754_v26 = vshll.u32 %v3890_v12, 16  ;;  %v1760_v27 = vshll.u32 %v3891_v13, 16 }
  0x7a   : > { %4494 = vmatmul.mubr.bf16.vlgmr.msra.gmra.mxu1 %v3980_v3  ;;  %4511 = vmatprep.subr.bf16.mxu0 %v4762_v54  ;;  %v3958_v45 = vrot.slane %v3940_v2, 9  ;;  %v1725_v0 = vsel %vm5048_vm2, %v1720_v52, %v1724_v44  ;;  %v1732_v11 = vrot.slane %v1730_v60, 5  ;;  %v3960_v44 = vrot.slane %v3946_v23, 9  ;;  %v3894_v60 = vld [vmem:[%s5025_s12 + $0x58] sm:$0xf] }
  0x7b   : > { %4542 = vmatpush3.bf16.msra.mxu1 %v5298_v24  ;;  %v1696_v32 = vrot.slane %v1695_v21, 4  ;;  %v1708_v24 = vrot.slane %v1706_v25, 5  ;;  %4497 = vmatprep.mubr.bf16.mxu1 %v3981_v38  ;;  %v2145_v21 = vrot.slane %v3945_v7, 5  ;;  %v4770_v25 = vld [vmem:[%s5904_s1 + $0x190] sm:$0xff]   ;;  %v1756_v38 = vrot.slane %v1754_v26, 5 }
  0x7c   : > { %4543 = vmatprep.subr.bf16.mxu1 %v4763_v4  ;;  %v2136_v53 = vsel %vm5154_vm5, %v3958_v45, %v2135_v48  ;;  %v5402_v45 = vld [vmem:[%s5904_s1 + $0x1c8] sm:$0xff]   ;;  %v2149_v52 = vrot.slane %v3947_v29, 5  ;;  %v3896_v12 = vld [vmem:[%s5025_s12 + $0x60] sm:$0xf] }
  0x7d   : > { %4512 = vmatpush3.bf16.msra.mxu0 %v4762_v54  ;;  %v1701_v42 = vsel %vm5048_vm2, %v1696_v32, %v1700_v10  ;;  %v1709_v43 = vor.u32 %v1708_v24, %v1705_v28  ;;  %v2137_v54 = vrot.slane %v2135_v48, 4  ;;  %v1729_v10 = vrot.slane %v1727_v59, 4  ;;  %v3898_v23 = vld [vmem:[%s5025_s12 + $0x68] sm:$0x1] }
  0x7e   : > { %4513 = vmatprep.subr.bf16.mxu0 %v4764_v14  ;;  %v3917_v46 = vcombine.low %v1691_v36, %v1701_v42  ;;  %v1764_v28 = vshrl.u32 %v3891_v13, 16  ;;  %v1753_v24 = vrot.slane %v1751_v22, 4  ;;  %v2151_v59 = vrot.slane %v2149_v52, 4 }
  0x7f   : > { %4544 = vmatpush3.bf16.msra.mxu1 %v4763_v4  ;;  %v1710_v50 = vrot.slane %v1709_v43, 4  ;;  %v2139_v3 = vsel %vm5154_vm5, %v2137_v54, %v2138_v49  ;;  %v1740_v4 = vshrl.u32 %v3888_v55, 16  ;;  %v1733_v19 = vor.u32 %v1732_v11, %v1729_v10  ;;  %v4774_v54 = vld [vmem:[%s5904_s1 + $0x180] sm:$0xff]   ;;  %v3951_v11 = vld [vmem:[%s5025_s12 + $0x5c] sm:$0x1] }
  0x80   : > { %4545 = vmatprep.subr.bf16.mxu1 %v4765_v20  ;;  %4465 = vmatprep.mubr.bf16.mxu0 %v3917_v46  ;;  %v3982_v9 = vcombine.low %v2136_v53, %v2139_v3  ;;  %v1766_v40 = vrot.slane %v1764_v28, 4  ;;  %v1770_v43 = vshll.u32 %v3892_v18, 16  ;;  %v1757_v48 = vor.u32 %v1756_v38, %v1753_v24  ;;  %v4775_v18 = vld [vmem:[%s5904_s1 + $0x1c0] sm:$0xff]   ;;  %v3954_v24 = vld [vmem:[%s5025_s12 + $0x68] sm:$0x1] }
  0x81   : > { %4514 = vmatpush3.bf16.msra.mxu0 %v4764_v14  ;;  %v1715_v58 = vsel %vm5048_vm2, %v1710_v50, %v1714_v39  ;;  %v1738_v14 = vrot.slane %v1736_v61, 5  ;;  %v1742_v15 = vrot.slane %v1740_v4, 4  ;;  %v1734_v31 = vrot.slane %v1733_v19, 4  ;;  %v3895_v61 = vld [vmem:[%s5025_s12 + $0x5c] sm:$0x1] }
  0x82   : > { %4515 = vmatprep.subr.bf16.mxu0 %v4766_v35  ;;  %v3918_v8 = vcombine.low %v1715_v58, %v1725_v0  ;;  %4498 = vmatmul.mubr.bf16.gmra.mxu1 %v3982_v9  ;;  %v1762_v39 = vrot.slane %v1760_v27, 5  ;;  %v1772_v51 = vrot.slane %v1770_v43, 5  ;;  %v2152_v53 = vrot.slane %v3948_v34, 5  ;;  %v3952_v28 = vld [vmem:[%s5025_s12 + $0x60] sm:$0xe] }
  0x83   : > { %4546 = vmatpush3.bf16.msra.mxu1 %v4765_v20  ;;  %v2142_v20 = vrot.slane %v3944_v6, 5  ;;  %v1743_v2 = vor.u32 %v1742_v15, %v1738_v14  ;;  %v1758_v55 = vrot.slane %v1757_v48, 4  ;;  %v2150_v58 = vsel %vm5154_vm5, %v3960_v44, %v2149_v52  ;;  %v3950_v6 = vld [vmem:[%s5025_s12 + $0x58] sm:$0xf] }
  0x84   : > { %4547 = vmatprep.subr.bf16.mxu1 %v4767_v41  ;;  %4466 = vmatmul.mubr.bf16.gmra.mxu0 %v3918_v8  ;;  %v1767_v49 = vor.u32 %v1766_v40, %v1762_v39  ;;  %v1784_v4 = vshll.u32 %v3894_v60, 16  ;;  %v2153_v8 = vsel %vm5154_vm5, %v2151_v59, %v2152_v53  ;;  %v1788_v10 = vshrl.u32 %v3894_v60, 16  ;;  %v4776_v60 = vld [vmem:[%s5025_s12 + $0x18] sm:$0xff]  }
  0x85   : > { %4516 = vmatpush3.bf16.msra.mxu0 %v4766_v35  ;;  %v2143_v32 = vsel %vm5154_vm5, %v3959_v17, %v2142_v20  ;;  %v2144_v33 = vrot.slane %v2142_v20, 4  ;;  %v4772_v35 = vld [vmem:[%s5904_s1 + $0x188] sm:$0xff]   ;;  %v1744_v36 = vrot.slane %v1743_v2, 4  ;;  %v3984_v13 = vcombine.low %v2150_v58, %v2153_v8  ;;  %v3897_v17 = vld [vmem:[%s5025_s12 + $0x64] sm:$0xf] }
  0x86   : > { %4517 = vmatprep.subr.bf16.mxu0 %v4768_v57  ;;  %v1768_v56 = vrot.slane %v1767_v49, 4  ;;  %v1786_v15 = vrot.slane %v1784_v4, 5  ;;  %v1790_v19 = vrot.slane %v1788_v10, 4  ;;  %v3961_v20 = vrot.slane %v3949_v5, 9 }
  0x87   : > { %4548 = vmatpush3.bf16.msra.mxu1 %v4767_v41  ;;  %v1739_v41 = vsel %vm5048_vm2, %v1734_v31, %v1738_v14  ;;  %v2146_v42 = vsel %vm5154_vm5, %v2144_v33, %v2145_v21  ;;  %v1749_v46 = vsel %vm5048_vm2, %v1744_v36, %v1748_v16  ;;  %v1794_v16 = vshll.u32 %v3895_v61, 16  ;;  %v3953_v33 = vld [vmem:[%s5025_s12 + $0x64] sm:$0xf]  ;;  %v4043_v61 = vld [vmem:[%s5025_s12 + $0x18] sm:$0xf] }
  0x88   : > { %4549 = vmatprep.subr.bf16.mxu1 %v4769_v63  ;;  %v3983_v47 = vcombine.low %v2143_v32, %v2146_v42  ;;  %v3919_v50 = vcombine.low %v1739_v41, %v1749_v46  ;;  %v1773_v0 = vsel %vm5048_vm2, %v1768_v56, %v1772_v51  ;;  %v2156_v21 = vrot.slane %v3950_v6, 5 }
  0x89   : > { %4518 = vmatpush3.bf16.msra.mxu0 %v4768_v57  ;;  %v3893_v57 = vld [vmem:[%s5025_s12 + $0x54] sm:$0xf]  ;;  %v2159_v22 = vrot.slane %v3951_v11, 5  ;;  %v1796_v2 = vrot.slane %v1794_v16, 5  ;;  %v1799_v26 = vshrl.u32 %v3896_v12, 16  ;;  %v1802_v27 = vshll.u32 %v3896_v12, 16 }
  0x8a   : > { %4519 = vmatprep.subr.bf16.mxu0 %v4770_v25  ;;  %4501 = vmatprep.mubr.bf16.mxu1 %v3983_v47  ;;  %v1775_v62 = vshrl.u32 %v3893_v57, 16  ;;  %v1778_v3 = vshll.u32 %v3893_v57, 16  ;;  %v1791_v29 = vor.u32 %v1790_v19, %v1786_v15  ;;  %v2158_v31 = vrot.slane %v2156_v21, 4  ;;  %v4047_v16 = vld [vmem:[%s5025_s12 + $0x28] sm:$0xf] }
  0x8b   : > { %4550 = vmatpush3.bf16.msra.mxu1 %v4769_v63  ;;  %4469 = vmatprep.mubr.bf16.mxu0 %v3919_v50  ;;  %v1763_v63 = vsel %vm5048_vm2, %v1758_v55, %v1762_v39  ;;  %v1808_v32 = vshll.u32 %v3897_v17, 16  ;;  %v1804_v36 = vrot.slane %v1802_v27, 5  ;;  %v1812_v38 = vshrl.u32 %v3897_v17, 16  ;;  %v4048_v17 = vld [vmem:[%s5025_s12 + $0x2c] sm:$0x1]  ;;  %v4777_v27 = vld [vmem:[%s5025_s12 + $0x24] sm:$0xff]  }
  0x8c   : > { %4551 = vmatprep.subr.bf16.mxu1 %v4771_v30  ;;  %v3920_v7 = vcombine.low %v1763_v63, %v1773_v0  ;;  %v1777_v9 = vrot.slane %v1775_v62, 4  ;;  %v1780_v14 = vrot.slane %v1778_v3, 5  ;;  %4502 = vmatmul.mubr.bf16.gmra.mxu1 %v3984_v13  ;;  %v1792_v39 = vrot.slane %v1791_v29, 4  ;;  %v4044_v63 = vld [vmem:[%s5025_s12 + $0x1c] sm:$0xf] }
  0x8d   : > { %4520 = vmatpush3.bf16.msra.mxu0 %v4770_v25  ;;  %v2160_v40 = vsel %vm5154_vm5, %v2158_v31, %v2159_v22  ;;  %v1810_v41 = vrot.slane %v1808_v32, 5  ;;  %v1818_v42 = vshll.u32 %v3898_v23, 16  ;;  %v1814_v47 = vrot.slane %v1812_v38, 4  ;;  %v4045_v0 = vld [vmem:[%s5025_s12 + $0x20] sm:$0x1] }
  0x8e   : > { %4521 = vmatprep.subr.bf16.mxu0 %v4772_v35  ;;  %4470 = vmatmul.mubr.bf16.gmra.mxu0 %v3920_v7  ;;  %v1781_v25 = vor.u32 %v1780_v14, %v1777_v9  ;;  %v1797_v48 = vsel %vm5048_vm2, %v1792_v39, %v1796_v2  ;;  %v3962_v50 = vrot.slane %v3952_v28, 9  ;;  %v2163_v51 = vrot.slane %v3953_v33, 5  ;;  %v4046_v13 = vld [vmem:[%s5025_s12 + $0x24] sm:$0xf] }
  0x8f   : > { %4552 = vmatpush3.bf16.msra.mxu1 %v4771_v30  ;;  %v2157_v30 = vsel %vm5154_vm5, %v3961_v20, %v2156_v21  ;;  %v1820_v49 = vrot.slane %v1818_v42, 5  ;;  %v2166_v55 = vrot.slane %v3954_v24, 5  ;;  %v2710_v3 = vshrl.u32 %v4043_v61, 16  ;;  %v4780_v24 = vld [vmem:[%s5025_s12 + $0x30] sm:$0xff]  }
  0x90   : > { %4553 = vmatprep.subr.bf16.mxu1 %v5402_v45  ;;  %v1782_v34 = vrot.slane %v1781_v25, 4  ;;  %v3985_v44 = vcombine.low %v2157_v30, %v2160_v40  ;;  %v2164_v56 = vsel %vm5154_vm5, %v3962_v50, %v2163_v51  ;;  %v2165_v57 = vrot.slane %v2163_v51, 4  ;;  %v4050_v40 = vld [vmem:[%s5025_s12 + $0x34] sm:$0xf] }
  0x91   : > { %4522 = vmatpush3.bf16.msra.mxu0 %v4772_v35  ;;  %v1801_v35 = vrot.slane %v1799_v26, 4  ;;  %v2713_v4 = vshll.u32 %v4043_v61, 16  ;;  %v2719_v7 = vshll.u32 %v4044_v63, 16  ;;  %v2723_v8 = vshrl.u32 %v4044_v63, 16  ;;  %v4054_v63 = vld [vmem:[%s5025_s12 + $0x44] sm:$0x1] }
  0x92   : > { %4523 = vmatprep.subr.bf16.mxu0 %v4774_v54  ;;  %v1787_v43 = vsel %vm5048_vm2, %v1782_v34, %v1786_v15  ;;  %4505 = vmatprep.mubr.bf16.mxu1 %v3985_v44  ;;  %v2167_v62 = vsel %vm5154_vm5, %v2165_v57, %v2166_v55  ;;  %v2712_v10 = vrot.slane %v2710_v3, 4  ;;  %v2729_v12 = vshll.u32 %v4045_v0, 16  ;;  %v4052_v57 = vld [vmem:[%s5025_s12 + $0x3c] sm:$0xf] }
  0x93   : > { %4554 = vmatpush3.bf16.msra.mxu1 %v5402_v45  ;;  %v1805_v46 = vor.u32 %v1804_v36, %v1801_v35  ;;  %v5443_v45 = vld [vmem:[%s5904_s1 + $0x238] sm:$0xff]   ;;  %v3921_v52 = vcombine.low %v1787_v43, %v1797_v48  ;;  %v3986_v6 = vcombine.low %v2164_v56, %v2167_v62  ;;  %v2715_v11 = vrot.slane %v2713_v4, 5  ;;  %v4049_v36 = vld [vmem:[%s5025_s12 + $0x30] sm:$0xf] }
  0x94   : > { %4555 = vmatprep.subr.bf16.mxu1 %v4775_v18  ;;  %v2721_v14 = vrot.slane %v2719_v7, 5  ;;  %v2725_v15 = vrot.slane %v2723_v8, 4  ;;  %v2731_v19 = vrot.slane %v2729_v12, 5  ;;  %v2734_v20 = vshrl.u32 %v4046_v13, 16  ;;  %v4781_v12 = vld [vmem:[%s5025_s12 + $0x3c] sm:$0xff]  }
  0x95   : > { %4524 = vmatpush3.bf16.msra.mxu0 %v4774_v54  ;;  %v1806_v53 = vrot.slane %v1805_v46, 4  ;;  %v1815_v54 = vor.u32 %v1814_v47, %v1810_v41  ;;  %4473 = vmatprep.mubr.bf16.mxu0 %v3921_v52  ;;  %v2737_v21 = vshll.u32 %v4046_v13, 16  ;;  %v2743_v23 = vshll.u32 %v4047_v16, 16  ;;  %v4779_v47 = vld [vmem:[%s5904_s1 + $0x230] sm:$0xff]  }
  0x96   : > { %4573 = vmatprep.subr.bf16.mxu0 %v5443_v45  ;;  %4506 = vmatmul.mubr.bf16.gmra.mxu1 %v3986_v6  ;;  %v2726_v22 = vor.u32 %v2725_v15, %v2721_v14  ;;  %v2747_v25 = vshrl.u32 %v4047_v16, 16  ;;  %v2753_v2 = vshll.u32 %v4048_v17, 16  ;;  %v2736_v28 = vrot.slane %v2734_v20, 4  ;;  %v4055_v20 = vld [vmem:[%s5025_s12 + $0x48] sm:$0xf] }
  0x97   : > { %4556 = vmatpush3.bf16.msra.mxu1 %v4775_v18  ;;  %v1811_v58 = vsel %vm5048_vm2, %v1806_v53, %v1810_v41  ;;  %v1816_v59 = vrot.slane %v1815_v54, 4  ;;  %v2716_v18 = vor.u32 %v2715_v11, %v2712_v10  ;;  %v2739_v29 = vrot.slane %v2737_v21, 5  ;;  %v4051_v41 = vld [vmem:[%s5025_s12 + $0x38] sm:$0x1] }
  0x98   : > { %4605 = vmatprep.subr.bf16.mxu1 %v5443_v45  ;;  %v2727_v30 = vrot.slane %v2726_v22, 4  ;;  %v2745_v31 = vrot.slane %v2743_v23, 5  ;;  %v2749_v32 = vrot.slane %v2747_v25, 4  ;;  %v2755_v33 = vrot.slane %v2753_v2, 5  ;;  %v4057_v23 = vld [vmem:[%s5025_s12 + $0x50] sm:$0x1] }
  0x99   : > { %v1821_v5 = vsel %vm5048_vm2, %v1816_v59, %v1820_v49  ;;  %v2717_v26 = vrot.slane %v2716_v18, 4  ;;  %v2740_v35 = vor.u32 %v2739_v29, %v2736_v28  ;;  %v2758_v42 = vshrl.u32 %v4049_v36, 16  ;;  %v5483_v59 = vld [vmem:[%s5904_s1 + $0x228] sm:$0xff]   ;;  %v5496_v18 = vld [vmem:[%s5904_s1 + $0x220] sm:$0xff]  }
  0x9a   : > { %v3922_v9 = vcombine.low %v1811_v58, %v1821_v5  ;;  %v2732_v38 = vsel %vm5048_vm2, %v2727_v30, %v2731_v19  ;;  %v2750_v39 = vor.u32 %v2749_v32, %v2745_v31  ;;  %v2761_v43 = vshll.u32 %v4049_v36, 16  ;;  %v4053_v58 = vld [vmem:[%s5025_s12 + $0x40] sm:$0xf]  ;;  %v4784_v19 = vld [vmem:[%s5025_s12 + $0x48] sm:$0xff]  }
  0x9b   : > { %v2722_v34 = vsel %vm5048_vm2, %v2717_v26, %v2721_v14  ;;  %v2741_v46 = vrot.slane %v2740_v35, 4  ;;  %v2767_v48 = vshll.u32 %v4050_v40, 16  ;;  %v2771_v49 = vshrl.u32 %v4050_v40, 16 }
  0x9c   : > { %4474 = vmatmul.mubr.bf16.gmra.mxu0 %v3922_v9  ;;  %v4083_v44 = vcombine.low %v2722_v34, %v2732_v38  ;;  %v2751_v50 = vrot.slane %v2750_v39, 4  ;;  %v2760_v51 = vrot.slane %v2758_v42, 4  ;;  %v2763_v52 = vrot.slane %v2761_v43, 5  ;;  %v4059_v38 = vld [vmem:[%s5025_s12 + $0x58] sm:$0xf] }
  0x9d   : > { %4525 = vmatprep.mubr.bf16.mxu0 %v4776_v60  ;;  %v2777_v53 = vshll.u32 %v4051_v41, 16  ;;  %v2746_v54 = vsel %vm5048_vm2, %v2741_v46, %v2745_v31  ;;  %v2769_v55 = vrot.slane %v2767_v48, 5  ;;  %v2773_v56 = vrot.slane %v2771_v49, 4  ;;  %v4785_v43 = vld [vmem:[%s5025_s12 + $0x54] sm:$0xff]  }
  0x9e   : > { %4557 = vmatprep.mubr.bf16.mxu1 %v4083_v44  ;;  %v2756_v60 = vsel %vm5048_vm2, %v2751_v50, %v2755_v33  ;;  %v2764_v61 = vor.u32 %v2763_v52, %v2760_v51  ;;  %v2782_v0 = vshrl.u32 %v4052_v57, 16  ;;  %v2785_v5 = vshll.u32 %v4052_v57, 16  ;;  %v4060_v44 = vld [vmem:[%s5025_s12 + $0x5c] sm:$0x1] }
  0x9f   : > { %v2779_v62 = vrot.slane %v2777_v53, 5  ;;  %v4084_v3 = vcombine.low %v2746_v54, %v2756_v60  ;;  %v2774_v4 = vor.u32 %v2773_v56, %v2769_v55  ;;  %v2791_v6 = vshll.u32 %v4053_v58, 16  ;;  %v4788_v60 = vld [vmem:[%s5025_s12 + $0x60] sm:$0xff]  }
  0xa0   : > { %v2765_v7 = vrot.slane %v2764_v61, 4  ;;  %v2784_v8 = vrot.slane %v2782_v0, 4  ;;  %v2795_v9 = vshrl.u32 %v4053_v58, 16  ;;  %v2801_v10 = vshll.u32 %v4054_v63, 16  ;;  %v5527_v0 = vld [vmem:[%s5904_s1 + $0x210] sm:$0xff]  }
  0xa1   : > { %4558 = vmatmul.mubr.bf16.vlgmr.msra.gmra.mxu1 %v4084_v3  ;;  %v2775_v11 = vrot.slane %v2774_v4, 4  ;;  %v2787_v13 = vrot.slane %v2785_v5, 5  ;;  %v2793_v14 = vrot.slane %v2791_v6, 5  ;;  %v2806_v25 = vshrl.u32 %v4055_v20, 16  ;;  %v4061_v3 = vld [vmem:[%s5025_s12 + $0x60] sm:$0xf] }
  0xa2   : > { %4613 = vmatpush3.bf16.msra.mxu1 %v5443_v45  ;;  %v2770_v15 = vsel %vm5048_vm2, %v2765_v7, %v2769_v55  ;;  %v2797_v16 = vrot.slane %v2795_v9, 4  ;;  %v2803_v17 = vrot.slane %v2801_v10, 5  ;;  %v2809_v2 = vshll.u32 %v4055_v20, 16  ;;  %v4786_v55 = vld [vmem:[%s5904_s1 + $0x218] sm:$0xff]   ;;  %v4062_v5 = vld [vmem:[%s5025_s12 + $0x64] sm:$0xf] }
  0xa3   : > { %4606 = vmatprep.subr.bf16.mxu1 %v4779_v47  ;;  %v2780_v21 = vsel %vm5048_vm2, %v2775_v11, %v2779_v62  ;;  %v2788_v22 = vor.u32 %v2787_v13, %v2784_v8  ;;  %v2808_v31 = vrot.slane %v2806_v25, 4  ;;  %v2825_v33 = vshll.u32 %v4057_v23, 16  ;;  %v4063_v6 = vld [vmem:[%s5025_s12 + $0x68] sm:$0x1] }
  0xa4   : > { %4526 = vmatmul.mubr.bf16.vlgmr.msra.gmra.mxu0 %v4777_v27  ;;  %v4085_v26 = vcombine.low %v2770_v15, %v2780_v21  ;;  %v2798_v27 = vor.u32 %v2797_v16, %v2793_v14  ;;  %v2811_v32 = vrot.slane %v2809_v2, 5  ;;  %v2839_v50 = vshll.u32 %v4059_v38, 16  ;;  %v4064_v16 = vld [vmem:[%s5025_s12 + $0x6c] sm:$0xf] }
  0xa5   : > { %4574 = vmatpush3.bf16.msra.mxu0 %v5443_v45  ;;  %4529 = vmatprep.mubr.bf16.mxu0 %v4780_v24  ;;  %v4056_v45 = vld [vmem:[%s5025_s12 + $0x4c] sm:$0xf]  ;;  %v2789_v30 = vrot.slane %v2788_v22, 4  ;;  %v4058_v24 = vld [vmem:[%s5025_s12 + $0x54] sm:$0xf]  ;;  %v2827_v42 = vrot.slane %v2825_v33, 5 }
  0xa6   : > { %4575 = vmatprep.subr.bf16.mxu0 %v4779_v47  ;;  %v2815_v28 = vshll.u32 %v4056_v45, 16  ;;  %v2819_v29 = vshrl.u32 %v4056_v45, 16  ;;  %4614 = vmatpush3.bf16.msra.mxu1 %v4779_v47  ;;  %v2799_v34 = vrot.slane %v2798_v27, 4  ;;  %v2830_v39 = vshrl.u32 %v4058_v24, 16  ;;  %v4789_v21 = vld [vmem:[%s5025_s12 + $0x6c] sm:$0xff]  }
  0xa7   : > { %4561 = vmatprep.mubr.bf16.mxu1 %v4085_v26  ;;  %v2794_v40 = vsel %vm5048_vm2, %v2789_v30, %v2793_v14  ;;  %4607 = vmatprep.subr.bf16.mxu1 %v5483_v59  ;;  %v2812_v41 = vor.u32 %v2811_v32, %v2808_v31  ;;  %v2833_v46 = vshll.u32 %v4058_v24, 16  ;;  %v2843_v54 = vshrl.u32 %v4059_v38, 16  ;;  %v4065_v22 = vld [vmem:[%s5025_s12 + $0x70] sm:$0xf]  ;;  %v4066_v45 = vld [vmem:[%s5025_s12 + $0x74] sm:$0x1] }
  0xa8   : > { %v2817_v35 = vrot.slane %v2815_v28, 5  ;;  %v2821_v36 = vrot.slane %v2819_v29, 4  ;;  %v2832_v49 = vrot.slane %v2830_v39, 4  ;;  %v2841_v57 = vrot.slane %v2839_v50, 5  ;;  %v5554_v39 = vld [vmem:[%s5904_s1 + $0x200] sm:$0xff]  }
  0xa9   : > { %4576 = vmatpush3.bf16.msra.mxu0 %v4779_v47  ;;  %v2804_v47 = vsel %vm5048_vm2, %v2799_v34, %v2803_v17  ;;  %v2813_v52 = vrot.slane %v2812_v41, 4  ;;  %v2835_v53 = vrot.slane %v2833_v46, 5  ;;  %v2849_v58 = vshll.u32 %v4060_v44, 16  ;;  %v4101_v44 = vld [vmem:[%s5025_s12 + $0x20] sm:$0x1] }
  0xaa   : > { %4577 = vmatprep.subr.bf16.mxu0 %v5483_v59  ;;  %v2822_v48 = vor.u32 %v2821_v36, %v2817_v35  ;;  %v4086_v51 = vcombine.low %v2794_v40, %v2804_v47  ;;  %4615 = vmatpush3.bf16.msra.mxu1 %v5483_v59  ;;  %v2845_v63 = vrot.slane %v2843_v54, 4  ;;  %v2854_v7 = vshrl.u32 %v4061_v3, 16  ;;  %v4099_v40 = vld [vmem:[%s5025_s12 + $0x18] sm:$0xe]  ;;  %v4111_v50 = vld [vmem:[%s5025_s12 + $0x48] sm:$0xe] }
  0xab   : > { %4608 = vmatprep.subr.bf16.mxu1 %v5496_v18  ;;  %v2818_v61 = vsel %vm5048_vm2, %v2813_v52, %v2817_v35  ;;  %v2836_v62 = vor.u32 %v2835_v53, %v2832_v49  ;;  %v2851_v4 = vrot.slane %v2849_v58, 5  ;;  %v2857_v11 = vshll.u32 %v4061_v3, 16 }
  0xac   : > { %4530 = vmatmul.mubr.bf16.gmra.mxu0 %v4781_v12  ;;  %v2823_v56 = vrot.slane %v2822_v48, 4  ;;  %4562 = vmatmul.mubr.bf16.gmra.mxu1 %v4086_v51  ;;  %v2846_v10 = vor.u32 %v2845_v63, %v2841_v57  ;;  %v2856_v12 = vrot.slane %v2854_v7, 4  ;;  %v2863_v13 = vshll.u32 %v4062_v5, 16  ;;  %v4112_v51 = vld [vmem:[%s5025_s12 + $0x4c] sm:$0xf] }
  0xad   : > { %4578 = vmatpush3.bf16.msra.mxu0 %v5483_v59  ;;  %4533 = vmatprep.mubr.bf16.mxu0 %v4784_v19  ;;  %v2837_v9 = vrot.slane %v2836_v62, 4  ;;  %v2867_v14 = vshrl.u32 %v4062_v5, 16  ;;  %v2873_v15 = vshll.u32 %v4063_v6, 16  ;;  %v2859_v20 = vrot.slane %v2857_v11, 5  ;;  %v4103_v63 = vld [vmem:[%s5025_s12 + $0x28] sm:$0xf] }
  0xae   : > { %4579 = vmatprep.subr.bf16.mxu0 %v5496_v18  ;;  %v2828_v59 = vsel %vm5048_vm2, %v2823_v56, %v2827_v42  ;;  %4616 = vmatpush3.bf16.msra.mxu1 %v5496_v18  ;;  %v2847_v19 = vrot.slane %v2846_v10, 4  ;;  %v2865_v23 = vrot.slane %v2863_v13, 5  ;;  %v2878_v26 = vshrl.u32 %v4064_v16, 16  ;;  %v4113_v56 = vld [vmem:[%s5025_s12 + $0x50] sm:$0x1] }
  0xaf   : > { %v4087_v8 = vcombine.low %v2818_v61, %v2828_v59  ;;  %v2842_v17 = vsel %vm5048_vm2, %v2837_v9, %v2841_v57  ;;  %4609 = vmatprep.subr.bf16.mxu1 %v4786_v55  ;;  %v2869_v25 = vrot.slane %v2867_v14, 4  ;;  %v2875_v2 = vrot.slane %v2873_v15, 5  ;;  %v4102_v57 = vld [vmem:[%s5025_s12 + $0x24] sm:$0xe]  ;;  %v4104_v5 = vld [vmem:[%s5025_s12 + $0x2c] sm:$0x1] }
  0xb0   : > { %v2852_v27 = vsel %vm5048_vm2, %v2847_v19, %v2851_v4  ;;  %v2860_v28 = vor.u32 %v2859_v20, %v2856_v12  ;;  %v2881_v29 = vshll.u32 %v4064_v16, 16  ;;  %v2887_v30 = vshll.u32 %v4065_v22, 16  ;;  %v4114_v10 = vld [vmem:[%s5025_s12 + $0x54] sm:$0xe]  ;;  %v4115_v11 = vld [vmem:[%s5025_s12 + $0x58] sm:$0xf] }
  0xb1   : > { %4580 = vmatpush3.bf16.msra.mxu0 %v5496_v18  ;;  %4565 = vmatprep.mubr.bf16.mxu1 %v4087_v8  ;;  %v5545_v18 = vld [vmem:[%s5904_s1 + $0x208] sm:$0xff]   ;;  %v4088_v31 = vcombine.low %v2842_v17, %v2852_v27  ;;  %v2870_v32 = vor.u32 %v2869_v25, %v2865_v23  ;;  %v2880_v33 = vrot.slane %v2878_v26, 4  ;;  %v2891_v24 = vshrl.u32 %v4065_v22, 16  ;;  %v4116_v16 = vld [vmem:[%s5025_s12 + $0x5c] sm:$0x1] }
  0xb2   : > { %4581 = vmatprep.subr.bf16.mxu0 %v4786_v55  ;;  %4617 = vmatpush3.bf16.msra.mxu1 %v4786_v55  ;;  %v2861_v34 = vrot.slane %v2860_v28, 4  ;;  %v2883_v35 = vrot.slane %v2881_v29, 5  ;;  %v2889_v36 = vrot.slane %v2887_v30, 5  ;;  %v2897_v38 = vshll.u32 %v4066_v45, 16  ;;  %v4105_v17 = vld [vmem:[%s5025_s12 + $0x30] sm:$0xe] }
  0xb3   : > { %4610 = vmatprep.subr.bf16.mxu1 %v5527_v0  ;;  %v2871_v41 = vrot.slane %v2870_v32, 4  ;;  %v2893_v42 = vrot.slane %v2891_v24, 4  ;;  %v4123_v49 = vrot.slane %v4099_v40, 9  ;;  %v4127_v61 = vrot.slane %v4111_v50, 9  ;;  %v4106_v22 = vld [vmem:[%s5025_s12 + $0x34] sm:$0xf] }
  0xb4   : > { %4534 = vmatmul.mubr.bf16.gmra.mxu0 %v4785_v43  ;;  %4566 = vmatmul.mubr.bf16.gmra.mxu1 %v4088_v31  ;;  %v4100_v43 = vld [vmem:[%s5025_s12 + $0x1c] sm:$0xf]  ;;  %v2866_v46 = vsel %vm5048_vm2, %v2861_v34, %v2865_v23  ;;  %v2884_v47 = vor.u32 %v2883_v35, %v2880_v33  ;;  %v2899_v48 = vrot.slane %v2897_v38, 5  ;;  %v3221_v62 = vrot.slane %v4112_v51, 5  ;;  %v4107_v45 = vld [vmem:[%s5025_s12 + $0x38] sm:$0x1] }
  0xb5   : > { %4537 = vmatprep.mubr.bf16.mxu0 %v4788_v60  ;;  %4582 = vmatpush3.bf16.msra.mxu0 %v4786_v55  ;;  %v2876_v52 = vsel %vm5048_vm2, %v2871_v41, %v2875_v2  ;;  %v2894_v53 = vor.u32 %v2893_v42, %v2889_v36  ;;  %v3193_v54 = vrot.slane %v4100_v43, 5  ;;  %v3196_v55 = vrot.slane %v4101_v44, 5  ;;  %v4117_v26 = vld [vmem:[%s5025_s12 + $0x60] sm:$0xe]  ;;  %v4118_v27 = vld [vmem:[%s5025_s12 + $0x64] sm:$0xf] }
  0xb6   : > { %4583 = vmatprep.subr.bf16.mxu0 %v5527_v0  ;;  %4618 = vmatpush3.bf16.msra.mxu1 %v5527_v0  ;;  %v4089_v58 = vcombine.low %v2866_v46, %v2876_v52  ;;  %v2885_v60 = vrot.slane %v2884_v47, 4  ;;  %v3224_v4 = vrot.slane %v4113_v56, 5  ;;  %v3222_v7 = vsel %vm5154_vm5, %v4127_v61, %v3221_v62  ;;  %v4119_v32 = vld [vmem:[%s5025_s12 + $0x68] sm:$0x1]  ;;  %v4109_v38 = vld [vmem:[%s5025_s12 + $0x40] sm:$0xf] }
  0xb7   : > { %4611 = vmatprep.subr.bf16.mxu1 %v5545_v18  ;;  %v2895_v3 = vrot.slane %v2894_v53, 4  ;;  %v3195_v59 = vrot.slane %v3193_v54, 4  ;;  %v3223_v8 = vrot.slane %v3221_v62, 4  ;;  %v4124_v9 = vrot.slane %v4102_v57, 9  ;;  %v4120_v44 = vld [vmem:[%s5025_s12 + $0x6c] sm:$0xe] }
  0xb8   : > { %4569 = vmatprep.mubr.bf16.mxu1 %v4089_v58  ;;  %v2890_v6 = vsel %vm5048_vm2, %v2885_v60, %v2889_v36  ;;  %v3200_v14 = vrot.slane %v4103_v63, 5  ;;  %v3203_v15 = vrot.slane %v4104_v5, 5  ;;  %v4128_v37 = vrot.slane %v4114_v10, 9  ;;  %v4108_v36 = vld [vmem:[%s5025_s12 + $0x3c] sm:$0xe] }
  0xb9   : > { %4584 = vmatpush3.bf16.msra.mxu0 %v5527_v0  ;;  %v3194_v0 = vsel %vm5154_vm5, %v4123_v49, %v3193_v54  ;;  %v2900_v12 = vsel %vm5048_vm2, %v2895_v3, %v2899_v48  ;;  %v3197_v13 = vsel %vm5154_vm5, %v3195_v59, %v3196_v55  ;;  %v3228_v2 = vrot.slane %v4115_v11, 5  ;;  %v4121_v50 = vld [vmem:[%s5025_s12 + $0x70] sm:$0xf]  ;;  %v4122_v55 = vld [vmem:[%s5025_s12 + $0x74] sm:$0x1] }
  0xba   : > { %4585 = vmatprep.subr.bf16.mxu0 %v5545_v18  ;;  %4619 = vmatpush3.bf16.msra.mxu1 %v5545_v18  ;;  %v4090_v19 = vcombine.low %v2890_v6, %v2900_v12  ;;  %v4147_v20 = vcombine.low %v3194_v0, %v3197_v13  ;;  %v3201_v23 = vsel %vm5154_vm5, %v4124_v9, %v3200_v14  ;;  %v3202_v25 = vrot.slane %v3200_v14, 4 }
  0xbb   : > { %4612 = vmatprep.subr.bf16.mxu1 %v5554_v39  ;;  %v3231_v28 = vrot.slane %v4116_v16, 5  ;;  %v4125_v29 = vrot.slane %v4105_v17, 9  ;;  %v3207_v30 = vrot.slane %v4106_v22, 5  ;;  %v3210_v31 = vrot.slane %v4107_v45, 5 }
  0xbc   : > { %4538 = vmatmul.mubr.bf16.gmra.mxu0 %v4789_v21  ;;  %v3225_v21 = vsel %vm5154_vm5, %v3223_v8, %v3224_v4  ;;  %4570 = vmatmul.mubr.bf16.gmra.mxu1 %v4090_v19  ;;  %v3204_v33 = vsel %vm5154_vm5, %v3202_v25, %v3203_v15  ;;  %v3229_v24 = vsel %vm5154_vm5, %v4128_v37, %v3228_v2  ;;  %v3230_v34 = vrot.slane %v3228_v2, 4 }
  0xbd   : > { %4586 = vmatpush3.bf16.msra.mxu0 %v5545_v18  ;;  %v4151_v18 = vcombine.low %v3222_v7, %v3225_v21  ;;  %4589 = vmatprep.mubr.bf16.mxu0 %v4147_v20  ;;  %v4129_v35 = vrot.slane %v4117_v26, 9  ;;  %v4148_v40 = vcombine.low %v3201_v23, %v3204_v33  ;;  %v3208_v41 = vsel %vm5154_vm5, %v4125_v29, %v3207_v30 }
  0xbe   : > { %4587 = vmatprep.subr.bf16.mxu0 %v5554_v39  ;;  %4620 = vmatpush3.bf16.msra.mxu1 %v5554_v39  ;;  %v3209_v42 = vrot.slane %v3207_v30, 4  ;;  %v3235_v43 = vrot.slane %v4118_v27, 5  ;;  %v3232_v46 = vsel %vm5154_vm5, %v3230_v34, %v3231_v28  ;;  %v3238_v47 = vrot.slane %v4119_v32, 5 }
  0xbf   : > { %4597 = vmatprep.mubr.bf16.mxu1 %v4151_v18  ;;  %v4126_v48 = vrot.slane %v4108_v36, 9  ;;  %v3214_v49 = vrot.slane %v4109_v38, 5  ;;  %v4152_v51 = vcombine.low %v3229_v24, %v3232_v46  ;;  %v4130_v62 = vrot.slane %v4120_v44, 9 }
  0xc0   : > { %v3211_v52 = vsel %vm5154_vm5, %v3209_v42, %v3210_v31  ;;  %v3236_v53 = vsel %vm5154_vm5, %v4129_v35, %v3235_v43  ;;  %v3237_v54 = vrot.slane %v3235_v43, 4  ;;  %v3242_v63 = vrot.slane %v4121_v50, 5 }
  0xc1   : > { %4588 = vmatpush3.bf16.msra.mxu0 %v5554_v39  ;;  %v4110_v39 = vld [vmem:[%s5025_s12 + $0x44] sm:$0x1]  ;;  %v4149_v56 = vcombine.low %v3208_v41, %v3211_v52  ;;  %v3215_v57 = vsel %vm5154_vm5, %v4126_v48, %v3214_v49  ;;  %v3216_v58 = vrot.slane %v3214_v49, 4  ;;  %v3245_v3 = vrot.slane %v4122_v55, 5  ;;  %s256_s12 = sand.u32 1, %s4860_s16  }
  0xc2   : > { %v3217_v60 = vrot.slane %v4110_v39, 5  ;;  %v3239_v61 = vsel %vm5154_vm5, %v3237_v54, %v3238_v47  ;;  %v3244_v5 = vrot.slane %v3242_v63, 4  ;;  %v3243_v6 = vsel %vm5154_vm5, %v4130_v62, %v3242_v63  ;;  %s3737_s27 = sshll.u32 %s256_s12, 7  ;;  %s5852_s24 = scalar_lea.sflag [#allocation4], %s256_s12 }
  0xc3   : > { %v4153_v0 = vcombine.low %v3236_v53, %v3239_v61  ;;  %s5794_s8 = scalar_lea.vmem [#allocation3], %s3737_s27  ;;  %s4798_s27 = scalar_lea.vmem %s4797_s5, 4096 }
  0xc4   : > { %4590 = vmatmul.mubr.bf16.vlgmr.msra.gmra.mxu0 %v4148_v40  ;;  %v3218_v59 = vsel %vm5154_vm5, %v3216_v58, %v3217_v60  ;;  %4598 = vmatmul.mubr.bf16.vlgmr.msra.gmra.mxu1 %v4152_v51  ;;  %v3246_v7 = vsel %vm5154_vm5, %v3244_v5, %v3245_v3  ;;  %s3601_s10 = sshll.u32 %s5794_s8, 4  ;;  %s5846_s10 = int_to_ptr.vmem [resolvable:$true] %s3601_s10 }
  0xc5   : > { %4593 = vmatprep.mubr.bf16.mxu0 %v4149_v56  ;;  %v4150_v4 = vcombine.low %v3215_v57, %v3218_v59  ;;  %4601 = vmatprep.mubr.bf16.mxu1 %v4153_v0  ;;  %v4154_v8 = vcombine.low %v3243_v6, %v3246_v7  ;;  %s4792_s30 = scalar_lea.vmem %s5846_s10, 2048  ;;  %p4799_p4 = scmp.lt.s32.totalorder %s5846_s10, %s4797_s5 }
  0xc6   : > { %p4793_p0 = scmp.ne.s32.totalorder %s5846_s10, %s4792_s30  ;;  %p4800_p5 = scmp.lt.s32.totalorder %s4798_s27, %s4792_s30 }
  0xc8   : > { %p4794_p1 = pnand %p4793_p0, %p4965_p3  ;;  %p4801_p6 = por %p4800_p5, %p4799_p4 }
  0xca   : > { %p4795_p2 = pneg %p4794_p1 }
  0xcc   : > { %4594 = vmatmul.mubr.bf16.gmra.mxu0 %v4150_v4  ;;  %4602 = vmatmul.mubr.bf16.gmra.mxu1 %v4154_v8  ;;  %p4802_p7 = pnand %p4801_p6, %p4795_p2 }
  0xf7   : > { %v4335_v9 = vpop.f32.mrf.mxu0 }
  0xf8   : > { %v4367_v10 = vpop.f32.mrf.mxu1 }
  0xf9   : > { %v952_v11 = vadd.f32 %v4367_v10, %v4335_v9  ;;  %v442_v12 = vpop.f32.mrf.mxu0 }
  0xfa   : > { %v871_v13 = vpop.f32.mrf.mxu1 }
  0xfb   : > { %v950_v14 = vadd.f32 %v871_v13, %v442_v12  ;;  %v4336_v15 = vpop.f32.mrf.mxu0 }
  0xfc   : > { %v4368_v16 = vpop.f32.mrf.mxu1 }
  0xfd   : > { %v953_v17 = vadd.f32 %v4368_v16, %v4336_v15  ;;  %v445_v19 = vpop.f32.mrf.mxu0 }
  0xfe   : > { %v874_v20 = vpop.f32.mrf.mxu1 }
  0xff   : > { %v951_v21 = vadd.f32 %v874_v20, %v445_v19  ;;  %v4339_v37 = vpop.f32.mrf.mxu0 }
 0x101   : > { %v458_v22 = vpop.f32.mrf.mxu0 }
 0x102   : > { %v4371_v45 = vpop.f32.mrf.mxu1 }
 0x103   : > { %v956_v1 = vadd.f32 %v4371_v45, %v4339_v37  ;;  %v4340_v18 = vpop.f32.mrf.mxu0 }
 0x104   : > { %v887_v23 = vpop.f32.mrf.mxu1 }
 0x105   : > { %v954_v25 = vadd.f32 %v887_v23, %v458_v22  ;;  %v461_v2 = vpop.f32.mrf.mxu0 }
 0x106   : > { %v4372_v26 = vpop.f32.mrf.mxu1 }
 0x107   : > { %v957_v27 = vadd.f32 %v4372_v26, %v4340_v18  ;;  %v4343_v28 = vpop.f32.mrf.mxu0 }
 0x108   : > { %v890_v29 = vpop.f32.mrf.mxu1 }
 0x109   : > { %v955_v30 = vadd.f32 %v890_v29, %v461_v2  ;;  %v474_v31 = vpop.f32.mrf.mxu0 }
 0x10a   : > { %v4375_v33 = vpop.f32.mrf.mxu1 }
 0x10b   : > { %v4344_v32 = vpop.f32.mrf.mxu0  ;;  %v960_v34 = vadd.f32 %v4375_v33, %v4343_v28 }
 0x10c   : > { %v903_v35 = vpop.f32.mrf.mxu1 }
 0x10d   : > { %v477_v24 = vpop.f32.mrf.mxu0  ;;  %v958_v38 = vadd.f32 %v903_v35, %v474_v31 }
 0x10e   : > { %v4376_v40 = vpop.f32.mrf.mxu1 }
 0x10f   : > { %v4347_v36 = vpop.f32.mrf.mxu0  ;;  %v961_v42 = vadd.f32 %v4376_v40, %v4344_v32 }
 0x110   : > { %v906_v43 = vpop.f32.mrf.mxu1 }
 0x111   : > { %v490_v41 = vpop.f32.mrf.mxu0  ;;  %v959_v39 = vadd.f32 %v906_v43, %v477_v24 }
 0x112   : > { %v4379_v46 = vpop.f32.mrf.mxu1 }
 0x113   : > { %v4348_v44 = vpop.f32.mrf.mxu0  ;;  %v964_v48 = vadd.f32 %v4379_v46, %v4347_v36 }
 0x114   : > { %v919_v49 = vpop.f32.mrf.mxu1 }
 0x115   : > { %v493_v47 = vpop.f32.mrf.mxu0  ;;  %v962_v50 = vadd.f32 %v919_v49, %v490_v41 }
 0x116   : > { %v4380_v51 = vpop.f32.mrf.mxu1 }
 0x117   : > { %v4399_v52 = vpop.f32.mrf.mxu0  ;;  %v965_v53 = vadd.f32 %v4380_v51, %v4348_v44 }
 0x118   : > { %v1301_v54 = vadd.f32 %v4399_v52, %v952_v11  ;;  %v922_v55 = vpop.f32.mrf.mxu1 }
 0x119   : > { %v1220_v56 = vpop.f32.mrf.mxu0  ;;  %v963_v57 = vadd.f32 %v922_v55, %v493_v47 }
 0x11a   : > { %v1299_v58 = vadd.f32 %v1220_v56, %v950_v14  ;;  %v4431_v60 = vpop.f32.mrf.mxu1 }
 0x11b   : > { %v4400_v61 = vpop.f32.mrf.mxu0  ;;  %v5630_v62 = vadd.f32 %v4431_v60, %v1301_v54 }
 0x11c   : > { %v1302_v63 = vadd.f32 %v4400_v61, %v953_v17  ;;  %v1495_v3 = vpop.f32.mrf.mxu1 }
 0x11d   : > { %v1223_v0 = vpop.f32.mrf.mxu0  ;;  %v5632_v59 = vadd.f32 %v1495_v3, %v1299_v58 }
 0x11e   : > { %v1300_v4 = vadd.f32 %v1223_v0, %v951_v21  ;;  %v4432_v5 = vpop.f32.mrf.mxu1 }
 0x11f   : > { %v5634_v6 = vadd.f32 %v4432_v5, %v1302_v63  ;;  %v4403_v7 = vpop.f32.mrf.mxu0 }
 0x120   : > { %v1498_v8 = vpop.f32.mrf.mxu1  ;;  %v1305_v9 = vadd.f32 %v4403_v7, %v956_v1 }
 0x121   : > { %v5636_v10 = vadd.f32 %v1498_v8, %v1300_v4  ;;  %v1236_v11 = vpop.f32.mrf.mxu0 }
 0x122   : > { %v4435_v12 = vpop.f32.mrf.mxu1  ;;  %v1303_v13 = vadd.f32 %v1236_v11, %v954_v25 }
 0x123   : > { %v5638_v14 = vadd.f32 %v4435_v12, %v1305_v9  ;;  %v4404_v15 = vpop.f32.mrf.mxu0 }
 0x124   : > { %v1511_v16 = vpop.f32.mrf.mxu1  ;;  %v1306_v17 = vadd.f32 %v4404_v15, %v957_v27 }
 0x125   : > { %v5640_v19 = vadd.f32 %v1511_v16, %v1303_v13  ;;  %v1239_v20 = vpop.f32.mrf.mxu0 }
 0x126   : > { %v4436_v21 = vpop.f32.mrf.mxu1  ;;  %v1304_v37 = vadd.f32 %v1239_v20, %v955_v30 }
 0x127   : > { %v5642_v22 = vadd.f32 %v4436_v21, %v1306_v17  ;;  %v4407_v18 = vpop.f32.mrf.mxu0 }
 0x128   : > { %v1514_v45 = vpop.f32.mrf.mxu1  ;;  %v1309_v23 = vadd.f32 %v4407_v18, %v960_v34 }
 0x129   : > { %v5644_v1 = vadd.f32 %v1514_v45, %v1304_v37  ;;  %v1252_v26 = vpop.f32.mrf.mxu0 }
 0x12a   : > { %v4439_v2 = vpop.f32.mrf.mxu1  ;;  %v1307_v28 = vadd.f32 %v1252_v26, %v958_v38 }
 0x12b   : > { %v5646_v25 = vadd.f32 %v4439_v2, %v1309_v23  ;;  %v4408_v31 = vpop.f32.mrf.mxu0 }
 0x12c   : > { %v1527_v29 = vpop.f32.mrf.mxu1  ;;  %v1310_v32 = vadd.f32 %v4408_v31, %v961_v42 }
 0x12d   : > { %v5648_v27 = vadd.f32 %v1527_v29, %v1307_v28  ;;  %v1255_v24 = vpop.f32.mrf.mxu0 }
 0x12e   : > { %v4440_v33 = vpop.f32.mrf.mxu1  ;;  %v1308_v35 = vadd.f32 %v1255_v24, %v959_v39 }
 0x12f   : > { %v5650_v30 = vadd.f32 %v4440_v33, %v1310_v32  ;;  %v4411_v41 = vpop.f32.mrf.mxu0 }
 0x130   : > { %v1530_v36 = vpop.f32.mrf.mxu1  ;;  %v1313_v34 = vadd.f32 %v4411_v41, %v964_v48 }
 0x131   : > { %v5652_v40 = vadd.f32 %v1530_v36, %v1308_v35  ;;  %v1268_v44 = vpop.f32.mrf.mxu0 }
 0x132   : > { %v4443_v43 = vpop.f32.mrf.mxu1  ;;  %v1311_v38 = vadd.f32 %v1268_v44, %v962_v50 }
 0x133   : > { %v5654_v46 = vadd.f32 %v4443_v43, %v1313_v34  ;;  %v4412_v49 = vpop.f32.mrf.mxu0 }
 0x134   : > { %v1543_v47 = vpop.f32.mrf.mxu1  ;;  %v1314_v42 = vadd.f32 %v4412_v49, %v965_v53 }
 0x135   : > { %v5656_v51 = vadd.f32 %v1543_v47, %v1311_v38  ;;  %v1271_v54 = vpop.f32.mrf.mxu0 }
 0x136   : > { %v4444_v52 = vpop.f32.mrf.mxu1  ;;  %v1312_v39 = vadd.f32 %v1271_v54, %v963_v57 }
 0x137   : > { %v5658_v55 = vadd.f32 %v4444_v52, %v1314_v42 }
 0x138   : > { %v1546_v56 = vpop.f32.mrf.mxu1  ;;  %v4463_v60 = vpop.f32.mrf.mxu0 }
 0x139   : > { %v5660_v58 = vadd.f32 %v1546_v56, %v1312_v39 }
 0x13a   : > { %v5662_v48 = vpop.f32.mrf.mxu1  ;;  %v1953_v61 = vpop.f32.mrf.mxu0 }
 0x13c   : > { %v5664_v63 = vpop.f32.mrf.mxu1  ;;  %v4464_v50 = vpop.f32.mrf.mxu0 }
 0x13e   : > { %v5666_v3 = vpop.f32.mrf.mxu1  ;;  %v1956_v0 = vpop.f32.mrf.mxu0 }
 0x140   : > { %v5668_v4 = vpop.f32.mrf.mxu1 }
 0x142   : > { %v5670_v5 = vpop.f32.mrf.mxu1 }
 0x144   : > { %v4467_v53 = vpop.f32.mrf.mxu0  ;;  %v5672_v57 = vpop.f32.mrf.mxu1 }
 0x146   : > { %v1969_v7 = vpop.f32.mrf.mxu0  ;;  %v5674_v9 = vpop.f32.mrf.mxu1 }
 0x148   : > { %v4468_v8 = vpop.f32.mrf.mxu0  ;;  %v5676_v12 = vpop.f32.mrf.mxu1 }
 0x14a   : > { %v1972_v11 = vpop.f32.mrf.mxu0 }
 0x14c   : > { %v5678_v15 = vpop.f32.mrf.mxu1 }
 0x14e   : > { %v4471_v13 = vpop.f32.mrf.mxu0  ;;  %v5680_v17 = vpop.f32.mrf.mxu1 }
 0x150   : > { %v1985_v16 = vpop.f32.mrf.mxu0  ;;  %v5682_v20 = vpop.f32.mrf.mxu1 }
 0x152   : > { %v4472_v21 = vpop.f32.mrf.mxu0  ;;  %v5684_v37 = vpop.f32.mrf.mxu1 }
 0x153   : > { %5914 = vst [vmem:[#allocation6_spill] sm:$0xff] %v5684_v37 }
 0x154   : > { %v1988_v45 = vpop.f32.mrf.mxu0 }
 0x156   : > { %v5686_v18 = vpop.f32.mrf.mxu1 }
 0x157   : > { %5915 = vst [vmem:[#allocation7_spill] sm:$0xff] %v5686_v18  ;;  %v2035_v18 = vadd.f32 %v4464_v50, %v5634_v6 }
 0x158   : > { %v5688_v2 = vpop.f32.mrf.mxu1 }
 0x159   : > { %5916 = vst [vmem:[#allocation8_spill] sm:$0xff] %v5688_v2  ;;  %v2032_v2 = vadd.f32 %v1953_v61, %v5632_v59  ;;  %v2381_v61 = vadd.f32 %v5666_v3, %v2035_v18 }
 0x15a   : > { %v5690_v29 = vpop.f32.mrf.mxu1 }
 0x15b   : > { %5917 = vst [vmem:[#allocation9_spill] sm:$0xff] %v5690_v29  ;;  %v2378_v6 = vadd.f32 %v5664_v63, %v2032_v2 }
 0x15c   : > { %v4475_v23 = vpop.f32.mrf.mxu0  ;;  %v5692_v32 = vpop.f32.mrf.mxu1 }
 0x15d   : > { %5918 = vst [vmem:[#allocation10_spill] sm:$0xff] %v5692_v32  ;;  %v2046_v63 = vadd.f32 %v4475_v23, %v5654_v46 }
 0x15e   : > { %v2001_v26 = vpop.f32.mrf.mxu0 }
 0x160   : > { %v4476_v28 = vpop.f32.mrf.mxu0 }
 0x161   : > { %v5694_v35 = vpop.f32.mrf.mxu1 }
 0x162   : > { %v2004_v31 = vpop.f32.mrf.mxu0  ;;  %5919 = vst [vmem:[#allocation11_spill] sm:$0xff] %v5694_v35 }
 0x163   : > { %v5696_v41 = vpop.f32.mrf.mxu1 }
 0x164   : > { %v4527_v33 = vpop.f32.mrf.mxu0  ;;  %5920 = vst [vmem:[#allocation12_spill] sm:$0xff] %v5696_v41 }
 0x165   : > { %v5698_v43 = vpop.f32.mrf.mxu1 }
 0x166   : > { %v2574_v24 = vpop.f32.mrf.mxu0  ;;  %5921 = vst [vmem:[#allocation13_spill] sm:$0xff] %v5698_v43 }
 0x167   : > { %v5700_v38 = vpop.f32.mrf.mxu1 }
 0x168   : > { %v4528_v36 = vpop.f32.mrf.mxu0  ;;  %5922 = vst [vmem:[#allocation14_spill] sm:$0xff] %v5700_v38  ;;  %v2034_v38 = vadd.f32 %v4463_v60, %v5630_v62 }
 0x16a   : > { %v2577_v34 = vpop.f32.mrf.mxu0  ;;  %v2380_v59 = vadd.f32 %v5662_v48, %v2034_v38  ;;  %v2041_v48 = vadd.f32 %v1988_v45, %v5652_v40 }
 0x16c   : > { %v4531_v44 = vpop.f32.mrf.mxu0  ;;  %v5702_v42 = vpop.f32.mrf.mxu1 }
 0x16d   : > { %5923 = vst [vmem:[#allocation15_spill] sm:$0xff] %v5702_v42 }
 0x16e   : > { %v2590_v47 = vpop.f32.mrf.mxu0  ;;  %v5704_v54 = vpop.f32.mrf.mxu1 }
 0x16f   : > { %5924 = vst [vmem:[#allocation16_spill] sm:$0xff] %v5704_v54  ;;  %v2033_v54 = vadd.f32 %v1956_v0, %v5636_v10  ;;  %v2042_v10 = vadd.f32 %v4471_v13, %v5646_v25  ;;  %v2044_v25 = vadd.f32 %v2001_v26, %v5656_v51  ;;  %v5930_v13 = vld [vmem:[#allocation6_spill] sm:$0xff] }
 0x170   : > { %v4532_v49 = vpop.f32.mrf.mxu0  ;;  %v5706_v56 = vpop.f32.mrf.mxu1 }
 0x171   : > { %5925 = vst [vmem:[#allocation17_spill] sm:$0xff] %v5706_v56  ;;  %v2038_v56 = vadd.f32 %v4467_v53, %v5638_v14  ;;  %v2040_v14 = vadd.f32 %v1985_v16, %v5648_v27  ;;  %v2655_v53 = vadd.f32 %v4527_v33, %v2380_v59  ;;  %v5931_v16 = vld [vmem:[#allocation7_spill] sm:$0xff] }
 0x172   : > { %v2593_v52 = vpop.f32.mrf.mxu0  ;;  %v5708_v35 = vpop.f32.mrf.mxu1 }
 0x173   : > { %5926 = vst [vmem:[#allocation18_spill] sm:$0xff] %v5708_v35  ;;  %v2036_v35 = vadd.f32 %v1969_v7, %v5640_v19  ;;  %v2379_v19 = vadd.f32 %v5668_v4, %v2033_v54  ;;  %v2384_v50 = vadd.f32 %v5670_v5, %v2038_v56  ;;  %v2047_v4 = vadd.f32 %v4476_v28, %v5658_v55 }
 0x174   : > { %v4535_v39 = vpop.f32.mrf.mxu0  ;;  %v5714_v43 = vpop.f32.mrf.mxu1  ;;  %v2388_v5 = vadd.f32 %v5678_v15, %v2042_v10  ;;  %v2045_v7 = vadd.f32 %v2004_v31, %v5660_v58  ;;  %v2392_v55 = vadd.f32 %v5931_v16, %v2046_v63  ;;  %v5934_v58 = vld [vmem:[#allocation11_spill] sm:$0xff]  ;;  %v5936_v31 = vld [vmem:[#allocation12_spill] sm:$0xff] }
 0x175   : > { %5929 = vst [vmem:[#allocation21_spill] sm:$0xff] %v5714_v43  ;;  %v2037_v43 = vadd.f32 %v1972_v11, %v5644_v1  ;;  %v2382_v0 = vadd.f32 %v5672_v57, %v2036_v35  ;;  %v2653_v57 = vadd.f32 %v2574_v24, %v2378_v6  ;;  %v2656_v11 = vadd.f32 %v4528_v36, %v2381_v61  ;;  %v5939_v54 = vld [vmem:[#allocation15_spill] sm:$0xff] }
 0x176   : > { %v2606_v32 = vpop.f32.mrf.mxu0  ;;  %v5721_v37 = vpop.f32.mrf.mxu1  ;;  %v2654_v51 = vadd.f32 %v2577_v34, %v2379_v19  ;;  %v3113_v2 = vadd.f32 %v5934_v58, %v2655_v53  ;;  %v2663_v28 = vadd.f32 %v4535_v39, %v2388_v5  ;;  %v5940_v59 = vld [vmem:[#allocation16_spill] sm:$0xff] }
 0x177   : > { %v2383_v3 = vadd.f32 %v5676_v12, %v2037_v43  ;;  %v2387_v12 = vadd.f32 %v5930_v13, %v2041_v48  ;;  %v2657_v15 = vadd.f32 %v2590_v47, %v2382_v0  ;;  %v3111_v33 = vadd.f32 %v5936_v31, %v2653_v57  ;;  %v5762_v43 = vld [vmem:[%s5905_s2] ss:$0 sm:$0xff] }
 0x178   : > { %v5710_v41 = vpop.f32.mrf.mxu0  ;;  %v5728_v62 = vpop.f32.mrf.mxu1  ;;  %v5938_v47 = vld [vmem:[#allocation14_spill] sm:$0xff]  ;;  %v5943_v0 = vld [vmem:[#allocation17_spill] sm:$0xff] }
 0x179   : > { %5927 = vst [vmem:[#allocation19_spill] sm:$0xff] %v5710_v41  ;;  %v2658_v24 = vadd.f32 %v2593_v52, %v2383_v3  ;;  %v3115_v6 = vadd.f32 %v5940_v59, %v2657_v15 }
 0x17a   : > { %v5712_v29 = vpop.f32.mrf.mxu0  ;;  %v5738_v1 = vpop.f32.mrf.mxu1 }
 0x17b   : > { %5928 = vst [vmem:[#allocation20_spill] sm:$0xff] %v5712_v29  ;;  %v2039_v29 = vadd.f32 %v4468_v8, %v5642_v22  ;;  %v2043_v22 = vadd.f32 %v4472_v21, %v5650_v30  ;;  %v2386_v30 = vadd.f32 %v5680_v17, %v2040_v14  ;;  %v5932_v21 = vld [vmem:[#allocation8_spill] sm:$0xff]  ;;  %v5933_v17 = vld [vmem:[#allocation9_spill] sm:$0xff] }
 0x17c   : > { %v4539_v42 = vpop.f32.mrf.mxu0  ;;  %v4571_v8 = vpop.f32.mrf.mxu1  ;;  %v2390_v45 = vadd.f32 %v5932_v21, %v2044_v25  ;;  %v2393_v23 = vadd.f32 %v5933_v17, %v2047_v4  ;;  %v5944_v63 = vld [vmem:[#allocation21_spill] sm:$0xff]  ;;  %v5945_v4 = vld [vmem:[#allocation18_spill] sm:$0xff] }
 0x17d   : > { %v2385_v27 = vadd.f32 %v5674_v9, %v2039_v29  ;;  %v2389_v46 = vadd.f32 %v5682_v20, %v2043_v22  ;;  %v2659_v9 = vadd.f32 %v4531_v44, %v2384_v50  ;;  %v5935_v29 = vld [vmem:[#allocation10_spill] sm:$0xff]  ;;  %v2661_v35 = vadd.f32 %v2606_v32, %v2386_v30  ;;  %v5937_v44 = vld [vmem:[#allocation13_spill] sm:$0xff] }
 0x17e   : > { %v5724_v41 = vpop.f32.mrf.mxu0  ;;  %v3080_v18 = vpop.f32.mrf.mxu1  ;;  %v2391_v20 = vadd.f32 %v5935_v29, %v2045_v7  ;;  %v3114_v38 = vadd.f32 %v5937_v44, %v2656_v11  ;;  %v2667_v61 = vadd.f32 %v4539_v42, %v2392_v55  ;;  %v5773_v50 = vld [vmem:[%s5906_s3] ss:$0 sm:$0xff]  ;;  %v3121_v25 = vadd.f32 %v5944_v63, %v2663_v28 }
 0x17f   : > { %v2660_v26 = vadd.f32 %v4532_v49, %v2385_v27  ;;  %v3112_v49 = vadd.f32 %v5938_v47, %v2654_v51  ;;  %v3117_v39 = vadd.f32 %v5939_v54, %v2659_v9  ;;  %v5783_v53 = vadd.f32 %v5945_v4, %v2658_v24 }
 0x180   : > { %v4540_v60 = vpop.f32.mrf.mxu0  ;;  %v4572_v36 = vpop.f32.mrf.mxu1  ;;  %v5941_v52 = vld [vmem:[#allocation19_spill] sm:$0xff]  ;;  %v3119_v42 = vadd.f32 %v5721_v37, %v2661_v35  ;;  %v2665_v5 = vadd.f32 %v5724_v41, %v2390_v45  ;;  %v3125_v16 = vadd.f32 %v4571_v8, %v2667_v61 }
 0x181   : > { %v2664_v32 = vadd.f32 %v5941_v52, %v2389_v46  ;;  %v5776_v48 = vadd.f32 %v5943_v0, %v2660_v26  ;;  %v2668_v30 = vadd.f32 %v4540_v60, %v2393_v23 }
 0x182   : > { %v2625_v40 = vpop.f32.mrf.mxu0  ;;  %v5942_v10 = vld [vmem:[#allocation20_spill] sm:$0xff]  ;;  %v3083_v19 = vpop.f32.mrf.mxu1  ;;  %v3123_v17 = vadd.f32 %v3080_v18, %v2665_v5 }
 0x183   : > { %v2662_v14 = vadd.f32 %v5942_v10, %v2387_v12  ;;  %v3122_v13 = vadd.f32 %v5728_v62, %v2664_v32  ;;  %v2666_v55 = vadd.f32 %v2625_v40, %v2391_v20  ;;  %v3126_v23 = vadd.f32 %v4572_v36, %v2668_v30 }
 0x184   : > { %v4591_v34 = vpop.f32.mrf.mxu0  ;;  %v4599_v7 = vpop.f32.mrf.mxu1 }
 0x185   : > { %v3459_v56 = vadd.f32 %v4591_v34, %v3113_v2  ;;  %v3467_v11 = vadd.f32 %v4599_v7, %v3121_v25  ;;  %v3120_v12 = vadd.f32 %v5738_v1, %v2662_v14  ;;  %v3124_v29 = vadd.f32 %v3083_v19, %v2666_v55 }
 0x186   : > { %v3378_v22 = vpop.f32.mrf.mxu0  ;;  %v3410_v21 = vpop.f32.mrf.mxu1 }
 0x187   : > { %v3514_v27 = vmul.f32 %v5762_v43, %v3459_v56  ;;  %v3457_v3 = vadd.f32 %v3378_v22, %v3111_v33  ;;  %v3522_v41 = vmul.f32 %v5762_v43, %v3467_v11  ;;  %v3465_v45 = vadd.f32 %v3410_v21, %v3119_v42 }
 0x188   : > { %v4592_v57 = vpop.f32.mrf.mxu0  ;;  %v4600_v2 = vpop.f32.mrf.mxu1 }
 0x189   : > { %v3537_v46 = vadd.f32 %v5773_v50, %v3514_v27  ;;  %v3512_v51 = vmul.f32 %v5762_v43, %v3457_v3  ;;  %v3460_v9 = vadd.f32 %v4592_v57, %v3114_v38  ;;  %v3545_v62 = vadd.f32 %v5773_v50, %v3522_v41 }
 0x18a   : > { %v3381_v15 = vpop.f32.mrf.mxu0  ;;  %v3520_v8 = vmul.f32 %v5762_v43, %v3465_v45  ;;  %v3468_v40 = vadd.f32 %v4600_v2, %v3122_v13  ;;  %v3413_v31 = vpop.f32.mrf.mxu1 }
 0x18b   : > { %v3553_v37 = vmax.f32 %v3537_v46, 0.0  ;;  %v3535_v60 = vadd.f32 %v5773_v50, %v3512_v51  ;;  %v3515_v58 = vmul.f32 %v5762_v43, %v3460_v9  ;;  %v3458_v26 = vadd.f32 %v3381_v15, %v3112_v49 }
 0x18c   : > { %v4595_v28 = vpop.f32.mrf.mxu0  ;;  %v3561_v35 = vmax.f32 %v3545_v62, 0.0  ;;  %v3543_v36 = vadd.f32 %v5773_v50, %v3520_v8  ;;  %v3523_v34 = vmul.f32 %v5762_v43, %v3468_v40  ;;  %v3466_v44 = vadd.f32 %v3413_v31, %v3120_v12  ;;  %v4603_v54 = vpop.f32.mrf.mxu1 }
 0x18d   : > { %3569 = vst [vmem:[%s5794_s8 + $0x10] sm:$0xff] %v3553_v37  ;;  %v3551_v1 = vmax.f32 %v3535_v60, 0.0  ;;  %v3538_v18 = vadd.f32 %v5773_v50, %v3515_v58  ;;  %v3513_v20 = vmul.f32 %v5762_v43, %v3458_v26  ;;  %v3463_v33 = vadd.f32 %v4595_v28, %v3117_v39 }
 0x18e   : > { %v3394_v24 = vpop.f32.mrf.mxu0  ;;  %3577 = vst [vmem:[%s5794_s8 + $0x50] sm:$0xff] %v3561_v35  ;;  %v3559_v39 = vmax.f32 %v3543_v36, 0.0  ;;  %v3546_v52 = vadd.f32 %v5773_v50, %v3523_v34  ;;  %v3521_v32 = vmul.f32 %v5762_v43, %v3466_v44  ;;  %v3471_v10 = vadd.f32 %v4603_v54, %v3125_v16  ;;  %v3426_v22 = vpop.f32.mrf.mxu1 }
 0x18f   : > { %3567 = vst [vmem:[%s5794_s8] sm:$0xff] %v3551_v1  ;;  %v3554_v38 = vmax.f32 %v3538_v18, 0.0  ;;  %v3536_v47 = vadd.f32 %v5773_v50, %v3513_v20  ;;  %v3518_v49 = vmul.f32 %v5762_v43, %v3463_v33  ;;  %v3461_v56 = vadd.f32 %v3394_v24, %v3115_v6 }
 0x190   : > { %v4596_v59 = vpop.f32.mrf.mxu0  ;;  %3575 = vst [vmem:[%s5794_s8 + $0x40] sm:$0xff] %v3559_v39  ;;  %v3562_v63 = vmax.f32 %v3546_v52, 0.0  ;;  %v3544_v25 = vadd.f32 %v5773_v50, %v3521_v32  ;;  %v3526_v27 = vmul.f32 %v5762_v43, %v3471_v10  ;;  %v3469_v3 = vadd.f32 %v3426_v22, %v3123_v17  ;;  %v4604_v30 = vpop.f32.mrf.mxu1 }
 0x191   : > { %3570 = vst [vmem:[%s5794_s8 + $0x18] sm:$0xff] %v3554_v38  ;;  %v3552_v14 = vmax.f32 %v3536_v47, 0.0  ;;  %v3541_v61 = vadd.f32 %v5773_v50, %v3518_v49  ;;  %v3516_v19 = vmul.f32 %v5762_v43, %v3461_v56  ;;  %v3464_v6 = vadd.f32 %v4596_v59, %v5776_v48 }
 0x192   : > { %v3397_v0 = vpop.f32.mrf.mxu0  ;;  %3578 = vst [vmem:[%s5794_s8 + $0x58] sm:$0xff] %v3562_v63  ;;  %v3560_v7 = vmax.f32 %v3544_v25, 0.0  ;;  %v3549_v57 = vadd.f32 %v5773_v50, %v3526_v27  ;;  %v3524_v46 = vmul.f32 %v5762_v43, %v3469_v3  ;;  %v3472_v11 = vadd.f32 %v4604_v30, %v3126_v23  ;;  %v3429_v12 = vpop.f32.mrf.mxu1 }
 0x193   : > { %3568 = vst [vmem:[%s5794_s8 + $0x8] sm:$0xff] %v3552_v14  ;;  %v3557_v4 = vmax.f32 %v3541_v61, 0.0  ;;  %v3539_v42 = vadd.f32 %v5773_v50, %v3516_v19  ;;  %v3519_v5 = vmul.f32 %v5762_v43, %v3464_v6  ;;  %v3462_v48 = vadd.f32 %v3397_v0, %v5783_v53 }
 0x194   : > { %3576 = vst [vmem:[%s5794_s8 + $0x48] sm:$0xff] %v3560_v7  ;;  %v3565_v53 = vmax.f32 %v3549_v57, 0.0  ;;  %v3547_v16 = vadd.f32 %v5773_v50, %v3524_v46  ;;  %v3527_v55 = vmul.f32 %v5762_v43, %v3472_v11  ;;  %v3470_v21 = vadd.f32 %v3429_v12, %v3124_v29 }
 0x195   : > { %3573 = vst [vmem:[%s5794_s8 + $0x30] sm:$0xff] %v3557_v4  ;;  %v3555_v51 = vmax.f32 %v3539_v42, 0.0  ;;  %v3542_v9 = vadd.f32 %v5773_v50, %v3519_v5  ;;  %v3517_v13 = vmul.f32 %v5762_v43, %v3462_v48 }
 0x196   : > { %3581 = vst [vmem:[%s5794_s8 + $0x70] sm:$0xff] %v3565_v53  ;;  %v3563_v41 = vmax.f32 %v3547_v16, 0.0  ;;  %v3550_v60 = vadd.f32 %v5773_v50, %v3527_v55  ;;  %v3525_v45 = vmul.f32 %v5762_v43, %v3470_v21 }
 0x197   : > { %3571 = vst [vmem:[%s5794_s8 + $0x20] sm:$0xff] %v3555_v51  ;;  %v3558_v15 = vmax.f32 %v3542_v9, 0.0  ;;  %v3540_v37 = vadd.f32 %v5773_v50, %v3517_v13 }
 0x198   : > { %3579 = vst [vmem:[%s5794_s8 + $0x60] sm:$0xff] %v3563_v41  ;;  %v3566_v23 = vmax.f32 %v3550_v60, 0.0  ;;  %v3548_v58 = vadd.f32 %v5773_v50, %v3525_v45 }
 0x199   : > { %3574 = vst [vmem:[%s5794_s8 + $0x38] sm:$0xff] %v3558_v15  ;;  %v3556_v17 = vmax.f32 %v3540_v37, 0.0 }
 0x19a   : > { %3582 = vst [vmem:[%s5794_s8 + $0x78] sm:$0xff] %v3566_v23  ;;  %v3564_v43 = vmax.f32 %v3548_v58, 0.0 }
 0x19b   : > { %3572 = vst [vmem:[%s5794_s8 + $0x28] sm:$0xff] %v3556_v17 }
 0x19c   : > { %3580 = vst [vmem:[%s5794_s8 + $0x68] sm:$0xff] %v3564_v43 }
 0x19d   : > { %4805 = shalt.err (!%p4802_p7)
}
 0x19e   : > { %s4806_s12 = scalar_lea.hbm %s5844_s23, 2048  ;;  %s4810_s6 = scalar_lea.hbm %s5907_s4, 8192 }
 0x19f   : > { %p4807_p9 = scmp.ne.s32.totalorder %s5844_s23, %s4806_s12  ;;  %p4811_p12 = scmp.lt.s32.totalorder %s5844_s23, %s5907_s4 }
 0x1a0   : > { %p4812_p13 = scmp.lt.s32.totalorder %s4810_s6, %s4806_s12 }
 0x1a1   : > { %p4808_p10 = pnand %p4807_p9, %p4965_p3 }
 0x1a2   : > { %p4813_p0 = por %p4812_p13, %p4811_p12 }
 0x1a3   : > { %p4809_p11 = pneg %p4808_p10 }
 0x1a5   : > { %p4814_p1 = pnand %p4813_p0, %p4809_p11 }
 0x1a7   : > { %4817 = shalt.err (!%p4814_p1)
}
 0x1a8   : > { %s4887_s11 = smov 128   ;;  %s4888_s13 = smov 8  }
 0x1a9   : > { %4623 = dma.vmem_to_hbm [thread:$0]  (%p4965_p3), %s5846_s10, 2048, %s5844_s23, %s5852_s24, %s4887_s11, %s4887_s11, %s4888_s13  }
 0x1aa PF: > { %p4629_p2 = scmp.ge.s32.totalorder %s4884_s22, 2  ;;  %s3616_s30 = sand.u32 1, %s4856_s15  }
 0x1ab   : > { %s3617_s14 = scalar_lea.sflag [#allocation4], %s3616_s30 }
 0x1ac   : > { %p4626_p4 = pnand %p4629_p2, %p4974_p8 }
 0x1ae   : > { %p4627_p5 = pneg %p4626_p4 }
 0x1b0   : > { %4851 = dma.done.wait (%p4627_p5), %s3617_s14, 2048  }
 0x1b1   : > { %4853 = vsyncadd (%p4627_p5), %s3617_s14, 4294965248  ;;  %s17_s22 = sadd.s32 1, %s4884_s22   ;;  %s5946_s15 = smov %s4860_s16 }
 0x1b2   : > { %p14_p6 = scmp.ge.s32.totalorder %s17_s22, 6   ;;  %s5947_s16 = smov %s4864_s17 }
 0x1b3   : > { %s5948_s17 = smov %s4983_s7  ;;  %s5949_s18 = smov %s4876_s20 }
 0x1b4   : > { %s5950_s19 = smov %s4880_s21  ;;  %s5951_s20 = smov %s5954_s25 }
 0x1b5   : > { %s5952_s21 = smov %s5958_s26  ;;  %16 = sbr.rel (!%p14_p6) target bundleno = 5 (0x5), region = 90 }
 0x1ba   :  { %3622 = vsyncpa [#allocation4], 1 }
 0x1bb   :  { %3624 = vsyncpa [#allocation4 + $0x1], 1 }

// kernel: tpu_custom_call.1
= control target key start
LH: loop header
LB: loop body
LE: loop exit
PB: predicated region body
PF: predicated region fallthrough
CT: control target
= control target key end

     0   :  { %9 = vsyncpa [#allocation4], 0  ;;  %s5903_s0 = inlined_call_operand.vmem [shape: bf16[2,2,10,18,128], index: 0, kind: input, shape index: {}]   ;;  %s5904_s1 = inlined_call_operand.vmem [shape: bf16[9,128,128], index: 1, kind: input, shape index: {}]   ;;  %s5905_s2 = inlined_call_operand.vmem [shape: f32[1,128], index: 2, kind: input, shape index: {}]   ;;  %s5906_s3 = inlined_call_operand.vmem [shape: f32[1,128], index: 3, kind: input, shape index: {}]   ;;  %s5907_s4 = inlined_call_operand.hbm [shape: f32[2,16,16,128], index: 4, kind: output, shape index: {}]  }
   0x1   :  { %11 = vsyncpa [#allocation4 + $0x1], 0  ;;  %s4914_s15 = smov 0   ;;  %s4916_s16 = smov 0  }
   0x2   :  { %s4918_s17 = smov 0   ;;  %s4920_s18 = smov 0  }
   0x3   :  { %s4922_s19 = smov 0   ;;  %s4924_s20 = smov 0  }
   0x4   :  { %s4926_s21 = smov 0   ;;  %s4928_s22 = smov 0  }
   0x5 LB: > { %s3729_s23 = sadd.s32 4294967295, %s4884_s22   ;;  %s3730_s24 = sadd.s32 4294967294, %s4884_s22   ;;  %s4884_s22 = sphi %s4928_s22, %s17_s22   ;;  %s4880_s21 = sphi %s4926_s21, %s5952_s21   ;;  %s4876_s20 = sphi %s4924_s20, %s5951_s20   ;;  %s4872_s19 = sphi %s4922_s19, %s5950_s19   ;;  %s4868_s18 = sphi %s4920_s18, %s5949_s18   ;;  %s4864_s17 = sphi %s4918_s17, %s5948_s17   ;;  %s4860_s16 = sphi %s4916_s16, %s5947_s16   ;;  %s4856_s15 = sphi %s4914_s15, %s5946_s15  }
   0x6   : > { %s29_s25 = sadd.s32 1, %s4876_s20  ;;  %s36_s26 = sadd.s32 1, %s4880_s21 }
   0x7   : > { %p30_p0 = scmp.ge.s32.totalorder %s29_s25, 2  ;;  %p163_p1 = scmp.ne.s32.totalorder %s4864_s17, %s4860_s16 }
   0x8   : > { %p164_p2 = scmp.eq.s32.totalorder %s3729_s23, 3  ;;  %p169_p5 = scmp.ne.s32.totalorder %s4860_s16, %s4856_s15 }
   0x9   : > { %s5954_s25 = smov (%p30_p0, %s29_s25), 0  ;;  %s5956_s26 = smov (!%p30_p0, %s36_s26), %s4880_s21 }
   0xa   : > { %s147_s27 = ssub.s32 %s4876_s20, %s5954_s25  ;;  %p4965_p3 = por %p164_p2, %p163_p1 }
   0xb   : > { %p38_p4 = scmp.ge.s32.totalorder %s5956_s26, 2  ;;  %p170_p6 = scmp.eq.s32.totalorder %s3730_s24, 3 }
   0xc   : > { %p3736_p7 = scmp.ge.s32.totalorder %s4884_s22, 1  ;;  %p219_p9 = scmp.lt.s32.totalorder %s4884_s22, 5 }
   0xd   : > { %s5958_s26 = smov (%p38_p4, %s5956_s26), 0  ;;  %p4974_p8 = por %p170_p6, %p169_p5 }
   0xe   : > { %s146_s30 = ssub.s32 %s4880_s21, %s5958_s26  ;;  %s153_s5 = sadd.s32 1, %s4864_s17 }
   0xf   : > { %s148_s6 = sor.u32 %s147_s27, %s146_s30  ;;  %p220_p10 = pnand %p3736_p7, %p219_p9 }
  0x10   : > { %p151_p11 = scmp.eq.s32.totalorder %s148_s6, 0 }
  0x11   : > { %223 = sbr.rel (%p220_p10) target bundleno = 426 (0x1aa), region = 36 }
  0x12   : > { %s4983_s7 = scalar_select %p151_p11, %s4864_s17, %s153_s5  }
  0x16   : > { %v4696_v0 = vld [vmem:[%s5904_s1 + $0x38] sm:$0xff]   ;;  %p259_p12 = scmp.lt.s32.totalorder %s4872_s19, 1  ;;  %p261_p13 = scmp.lt.s32.totalorder %s4868_s18, 1  ;;  %v4698_v2 = vld [vmem:[%s5904_s1 + $0x30] sm:$0xff]   ;;  %v4700_v4 = vld [vmem:[%s5904_s1 + $0x28] sm:$0xff]   ;;  %vm1030_vm3 = vcmask 1042432  }
  0x17   : > { %v4697_v1 = vld [vmem:[%s5904_s1 + $0x78] sm:$0xff]   ;;  %4317 = vmatprep.subr.bf16.mxu0 %v4696_v0  ;;  %v4699_v3 = vld [vmem:[%s5904_s1 + $0x70] sm:$0xff]   ;;  %v4701_v5 = vld [vmem:[%s5904_s1 + $0x68] sm:$0xff]   ;;  %vm545_vm0 = vsmask.f32 3328  ;;  %vm1031_vm4 = vcmask 1046532  }
  0x18   : > { %s260_s14 = scalar_select %p259_p12, %s4872_s19, 1  ;;  %4349 = vmatprep.subr.bf16.mxu1 %v4697_v1  ;;  %4318 = vmatpush3.bf16.msra.mxu0 %v4696_v0  ;;  %v4702_v6 = vld [vmem:[%s5904_s1 + $0x20] sm:$0xff]   ;;  %v4704_v8 = vld [vmem:[%s5904_s1 + $0x18] sm:$0xff]   ;;  %v4706_v10 = vld [vmem:[%s5904_s1 + $0x10] sm:$0xff]   ;;  %vm546_vm1 = vsmask.f32 7440 }
  0x19   : > { %s262_s27 = scalar_select %p261_p13, %s4868_s18, 1  ;;  %4350 = vmatpush3.bf16.msra.mxu1 %v4697_v1  ;;  %4319 = vmatprep.subr.bf16.mxu0 %v4698_v2  ;;  %v4703_v7 = vld [vmem:[%s5904_s1 + $0x60] sm:$0xff]   ;;  %v4705_v9 = vld [vmem:[%s5904_s1 + $0x58] sm:$0xff]   ;;  %v4707_v11 = vld [vmem:[%s5904_s1 + $0x50] sm:$0xff]  }
  0x1a   : > { %s4622_s6 = smul.u32 60, %s260_s14  ;;  %4351 = vmatprep.subr.bf16.mxu1 %v4699_v3  ;;  %v4708_v16 = vld [vmem:[%s5904_s1 + $0x8] sm:$0xff]   ;;  %v4710_v31 = vld [vmem:[%s5904_s1] sm:$0xff]   ;;  %vm5048_vm2 = vmor %vm545_vm0, %vm546_vm1  ;;  %s4172_s9 = sshll.u32 %s4868_s18, 4 }
  0x1b   : > { %s4621_s10 = smul.u32 30, %s262_s27  ;;  %v4709_v19 = vld [vmem:[%s5904_s1 + $0x48] sm:$0xff]   ;;  %v4711_v45 = vld [vmem:[%s5904_s1 + $0x40] sm:$0xff]   ;;  %v4714_v56 = vld [vmem:[%s5904_s1 + $0xb8] sm:$0xff]  }
  0x1c   : > { %4320 = vmatpush3.bf16.msra.mxu0 %v4698_v2  ;;  %v4715_v57 = vld [vmem:[%s5904_s1 + $0xf8] sm:$0xff]   ;;  %v4716_v63 = vld [vmem:[%s5904_s1 + $0xb0] sm:$0xff]   ;;  %vm5154_vm5 = vmor %vm1030_vm3, %vm1031_vm4 }
  0x1d   : > { %4352 = vmatpush3.bf16.msra.mxu1 %v4699_v3  ;;  %4321 = vmatprep.subr.bf16.mxu0 %v4700_v4  ;;  %s265_s13 = sadd.s32 %s4622_s6, %s4621_s10  ;;  %v4717_v3 = vld [vmem:[%s5904_s1 + $0xf0] sm:$0xff]   ;;  %s4168_s6 = sshll.u32 %s4872_s19, 5 }
  0x1e   : > { %4353 = vmatprep.subr.bf16.mxu1 %v4701_v5  ;;  %s3738_s14 = sshll.u32 %s265_s13, 2  ;;  %s3598_s18 = sadd.s32 %s4172_s9, %s4168_s6 }
  0x1f   : > { %s5025_s12 = scalar_lea.vmem %s5903_s0, %s3738_s14  ;;  %s4169_s19 = sshll.u32 %s3598_s18, 7 }
  0x20   : > { %4322 = vmatpush3.bf16.msra.mxu0 %v4700_v4  ;;  %v4712_v12 = vld [vmem:[%s5025_s12] sm:$0xff]   ;;  %v523_v15 = vld [vmem:[%s5025_s12 + $0x8] sm:$0x1]  ;;  %v524_v25 = vld [vmem:[%s5025_s12 + $0xc] sm:$0xf]  ;;  %s5844_s23 = scalar_lea.hbm %s5907_s4, %s4169_s19  ;;  %s4886_s14 = smov [#allocation3]  }
  0x21   : > { %4354 = vmatpush3.bf16.msra.mxu1 %v4701_v5  ;;  %4323 = vmatprep.subr.bf16.mxu0 %v4702_v6  ;;  %v521_v13 = vld [vmem:[%s5025_s12] sm:$0xf]  ;;  %v522_v14 = vld [vmem:[%s5025_s12 + $0x4] sm:$0xf]  ;;  %v568_v22 = vshll.u32 %v523_v15, 16  ;;  %v573_v30 = vshrl.u32 %v524_v25, 16 }
  0x22   : > { %4355 = vmatprep.subr.bf16.mxu1 %v4703_v7  ;;  %4333 = vmatprep.mubr.bf16.mxu0 %v4712_v12  ;;  %v549_v17 = vshrl.u32 %v521_v13, 16  ;;  %v552_v18 = vshll.u32 %v521_v13, 16  ;;  %v558_v20 = vshll.u32 %v522_v14, 16  ;;  %v562_v21 = vshrl.u32 %v522_v14, 16  ;;  %v525_v29 = vld [vmem:[%s5025_s12 + $0x10] sm:$0xf] }
  0x23   : > { %v570_v28 = vrot.slane %v568_v22, 5  ;;  %v526_v33 = vld [vmem:[%s5025_s12 + $0x14] sm:$0x1]  ;;  %v576_v34 = vshll.u32 %v524_v25, 16  ;;  %v582_v35 = vshll.u32 %v525_v29, 16  ;;  %v586_v36 = vshrl.u32 %v525_v29, 16 }
  0x24   : > { %4324 = vmatpush3.bf16.msra.mxu0 %v4702_v6  ;;  %v551_v23 = vrot.slane %v549_v17, 4  ;;  %v554_v24 = vrot.slane %v552_v18, 5  ;;  %v560_v26 = vrot.slane %v558_v20, 5  ;;  %v564_v27 = vrot.slane %v562_v21, 4  ;;  %v4713_v53 = vld [vmem:[%s5025_s12 + $0xc] sm:$0xff]   ;;  %v4718_v4 = vld [vmem:[%s5025_s12 + $0x18] sm:$0xff]  }
  0x25   : > { %4356 = vmatpush3.bf16.msra.mxu1 %v4703_v7  ;;  %4325 = vmatprep.subr.bf16.mxu0 %v4704_v8  ;;  %v575_v39 = vrot.slane %v573_v30, 4  ;;  %v592_v40 = vshll.u32 %v526_v33, 16  ;;  %v578_v42 = vrot.slane %v576_v34, 5  ;;  %v584_v43 = vrot.slane %v582_v35, 5  ;;  %v527_v58 = vld [vmem:[%s5025_s12 + $0x18] sm:$0xf] }
  0x26   : > { %4357 = vmatprep.subr.bf16.mxu1 %v4705_v9  ;;  %v555_v32 = vor.u32 %v554_v24, %v551_v23  ;;  %v565_v38 = vor.u32 %v564_v27, %v560_v26  ;;  %v588_v44 = vrot.slane %v586_v36, 4  ;;  %v528_v59 = vld [vmem:[%s5025_s12 + $0x1c] sm:$0xf]  ;;  %v529_v60 = vld [vmem:[%s5025_s12 + $0x20] sm:$0x1]  ;;  %v597_v0 = vshrl.u32 %v527_v58, 16 }
  0x27   : > { %v594_v47 = vrot.slane %v592_v40, 5  ;;  %v579_v49 = vor.u32 %v578_v42, %v575_v39  ;;  %v600_v1 = vshll.u32 %v527_v58, 16  ;;  %v606_v5 = vshll.u32 %v528_v59, 16  ;;  %v532_v12 = vld [vmem:[%s5025_s12 + $0x2c] sm:$0x1]  ;;  %v4719_v30 = vld [vmem:[%s5025_s12 + $0x24] sm:$0xff]  }
  0x28   : > { %4326 = vmatpush3.bf16.msra.mxu0 %v4704_v8  ;;  %v556_v41 = vrot.slane %v555_v32, 4  ;;  %v566_v46 = vrot.slane %v565_v38, 4  ;;  %v589_v50 = vor.u32 %v588_v44, %v584_v43  ;;  %v610_v6 = vshrl.u32 %v528_v59, 16  ;;  %v530_v8 = vld [vmem:[%s5025_s12 + $0x24] sm:$0xf]  ;;  %v4720_v21 = vld [vmem:[%s5904_s1 + $0xa8] sm:$0xff]  }
  0x29   : > { %4358 = vmatpush3.bf16.msra.mxu1 %v4705_v9  ;;  %4327 = vmatprep.subr.bf16.mxu0 %v4706_v10  ;;  %v580_v54 = vrot.slane %v579_v49, 4  ;;  %v616_v7 = vshll.u32 %v529_v60, 16  ;;  %v599_v9 = vrot.slane %v597_v0, 4  ;;  %v608_v13 = vrot.slane %v606_v5, 5  ;;  %v4721_v32 = vld [vmem:[%s5904_s1 + $0xe8] sm:$0xff]   ;;  %v4722_v36 = vld [vmem:[%s5904_s1 + $0xa0] sm:$0xff]  }
  0x2a   : > { %4359 = vmatprep.subr.bf16.mxu1 %v4707_v11  ;;  %v561_v48 = vsel %vm5048_vm2, %v556_v41, %v560_v26  ;;  %v571_v51 = vsel %vm5048_vm2, %v566_v46, %v570_v28  ;;  %v590_v55 = vrot.slane %v589_v50, 4  ;;  %v612_v14 = vrot.slane %v610_v6, 4  ;;  %v4723_v39 = vld [vmem:[%s5904_s1 + $0xe0] sm:$0xff]   ;;  %v4724_v40 = vld [vmem:[%s5025_s12 + $0x30] sm:$0xff]   ;;  %v535_v46 = vld [vmem:[%s5025_s12 + $0x38] sm:$0x1] }
  0x2b   : > { %v3771_v52 = vcombine.low %v561_v48, %v571_v51  ;;  %v585_v61 = vsel %vm5048_vm2, %v580_v54, %v584_v43  ;;  %v618_v15 = vrot.slane %v616_v7, 5  ;;  %v624_v18 = vshll.u32 %v530_v8, 16  ;;  %v533_v41 = vld [vmem:[%s5025_s12 + $0x30] sm:$0xf]  ;;  %v536_v54 = vld [vmem:[%s5025_s12 + $0x3c] sm:$0xf] }
  0x2c   : > { %4328 = vmatpush3.bf16.msra.mxu0 %v4706_v10  ;;  %v595_v62 = vsel %vm5048_vm2, %v590_v55, %v594_v47  ;;  %v602_v10 = vrot.slane %v600_v1, 5  ;;  %v613_v22 = vor.u32 %v612_v14, %v608_v13  ;;  %v640_v24 = vshll.u32 %v532_v12, 16  ;;  %v537_v59 = vld [vmem:[%s5025_s12 + $0x40] sm:$0xf]  ;;  %v4726_v60 = vld [vmem:[%s5904_s1 + $0x98] sm:$0xff]   ;;  %s4796_s5 = sshll.u32 %s4886_s14, 4  ;;  %s4797_s5 = int_to_ptr.vmem [resolvable:$false] %s4796_s5 }
  0x2d   : > { %4360 = vmatpush3.bf16.msra.mxu1 %v4707_v11  ;;  %4329 = vmatprep.subr.bf16.mxu0 %v4708_v16  ;;  %v3772_v2 = vcombine.low %v585_v61, %v595_v62  ;;  %v531_v11 = vld [vmem:[%s5025_s12 + $0x28] sm:$0xf]  ;;  %v626_v26 = vrot.slane %v624_v18, 5  ;;  %v645_v47 = vshrl.u32 %v533_v41, 16  ;;  %v648_v48 = vshll.u32 %v533_v41, 16  ;;  %v4727_v7 = vld [vmem:[%s5904_s1 + $0xd8] sm:$0xff]  }
  0x2e   : > { %4361 = vmatprep.subr.bf16.mxu1 %v4709_v19  ;;  %4365 = vmatprep.mubr.bf16.mxu1 %v3771_v52  ;;  %v603_v17 = vor.u32 %v602_v10, %v599_v9  ;;  %v634_v20 = vshrl.u32 %v531_v11, 16  ;;  %v614_v29 = vrot.slane %v613_v22, 4  ;;  %v538_v0 = vld [vmem:[%s5025_s12 + $0x44] sm:$0x1]  ;;  %v669_v1 = vshrl.u32 %v536_v54, 16 }
  0x2f   : > { %v682_v5 = vshrl.u32 %v537_v59, 16  ;;  %v688_v6 = vshll.u32 %v538_v0, 16  ;;  %v4735_v0 = vld [vmem:[%s5904_s1 + $0xc0] sm:$0xff]  }
  0x30   : > { %4330 = vmatpush3.bf16.msra.mxu0 %v4708_v16  ;;  %v621_v16 = vshrl.u32 %v530_v8, 16  ;;  %v604_v25 = vrot.slane %v603_v17, 4  ;;  %v636_v28 = vrot.slane %v634_v20, 4  ;;  %v619_v38 = vsel %vm5048_vm2, %v614_v29, %v618_v15  ;;  %v4729_v20 = vld [vmem:[%s5904_s1 + $0xd0] sm:$0xff]  }
  0x31   : > { %4362 = vmatpush3.bf16.msra.mxu1 %v4709_v19  ;;  %4331 = vmatprep.subr.bf16.mxu0 %v4710_v31  ;;  %v630_v19 = vshll.u32 %v531_v11, 16  ;;  %v671_v9 = vrot.slane %v669_v1, 4  ;;  %v541_v29 = vld [vmem:[%s5025_s12 + $0x50] sm:$0x1] }
  0x32   : > { %4363 = vmatprep.subr.bf16.mxu1 %v4711_v45  ;;  %v623_v23 = vrot.slane %v621_v16, 4  ;;  %v609_v33 = vsel %vm5048_vm2, %v604_v25, %v608_v13  ;;  %v684_v13 = vrot.slane %v682_v5, 4  ;;  %v4728_v16 = vld [vmem:[%s5904_s1 + $0x90] sm:$0xff]  }
  0x33   : > { %v632_v27 = vrot.slane %v630_v19, 5  ;;  %v3773_v42 = vcombine.low %v609_v33, %v619_v38  ;;  %v690_v19 = vrot.slane %v688_v6, 5  ;;  %v4731_v33 = vld [vmem:[%s5025_s12 + $0x54] sm:$0xff]   ;;  %v712_v38 = vshll.u32 %v541_v29, 16  ;;  %v982_v6 = vld [vmem:[%s5025_s12] sm:$0xe] }
  0x34   : > { %4332 = vmatpush3.bf16.msra.mxu0 %v4710_v31  ;;  %v642_v31 = vrot.slane %v640_v24, 5  ;;  %v627_v34 = vor.u32 %v626_v26, %v623_v23  ;;  %v4730_v23 = vld [vmem:[%s5025_s12 + $0x48] sm:$0xff]  }
  0x35   : > { %4364 = vmatpush3.bf16.msra.mxu1 %v4711_v45  ;;  %4381 = vmatprep.subr.bf16.mxu0 %v4714_v56  ;;  %v637_v35 = vor.u32 %v636_v28, %v632_v27  ;;  %v534_v45 = vld [vmem:[%s5025_s12 + $0x34] sm:$0xf]  ;;  %v539_v26 = vld [vmem:[%s5025_s12 + $0x48] sm:$0xf] }
  0x36   : > { %4413 = vmatprep.subr.bf16.mxu1 %v4715_v57  ;;  %v628_v43 = vrot.slane %v627_v34, 4  ;;  %v654_v49 = vshll.u32 %v534_v45, 16  ;;  %v658_v50 = vshrl.u32 %v534_v45, 16  ;;  %v4732_v34 = vld [vmem:[%s5904_s1 + $0x88] sm:$0xff]  }
  0x37   : > { %4334 = vmatmul.mubr.bf16.vlgmr.msra.gmra.mxu0 %v4713_v53  ;;  %v638_v44 = vrot.slane %v637_v35, 4  ;;  %v664_v53 = vshll.u32 %v535_v46, 16  ;;  %v714_v46 = vrot.slane %v712_v38, 5  ;;  %v988_v38 = vld [vmem:[%s5025_s12 + $0x18] sm:$0xe] }
  0x38   : > { %4366 = vmatmul.mubr.bf16.vlgmr.msra.gmra.mxu1 %v3772_v2  ;;  %4382 = vmatpush3.bf16.msra.mxu0 %v4714_v56  ;;  %v633_v51 = vsel %vm5048_vm2, %v628_v43, %v632_v27  ;;  %v647_v56 = vrot.slane %v645_v47, 4  ;;  %v656_v58 = vrot.slane %v654_v49, 5  ;;  %v660_v61 = vrot.slane %v658_v50, 4  ;;  %v540_v27 = vld [vmem:[%s5025_s12 + $0x4c] sm:$0xf] }
  0x39   : > { %4414 = vmatpush3.bf16.msra.mxu1 %v4715_v57  ;;  %4383 = vmatprep.subr.bf16.mxu0 %v4716_v63  ;;  %v643_v52 = vsel %vm5048_vm2, %v638_v44, %v642_v31  ;;  %v650_v57 = vrot.slane %v648_v48, 5  ;;  %v666_v62 = vrot.slane %v664_v53, 5  ;;  %v672_v2 = vshll.u32 %v536_v54, 16  ;;  %v542_v43 = vld [vmem:[%s5025_s12 + $0x54] sm:$0xf]  ;;  %v4733_v44 = vld [vmem:[%s5904_s1 + $0xc8] sm:$0xff]  }
  0x3a   : > { %4415 = vmatprep.subr.bf16.mxu1 %v4717_v3  ;;  %4337 = vmatprep.mubr.bf16.mxu0 %v4718_v4  ;;  %v3774_v55 = vcombine.low %v633_v51, %v643_v52  ;;  %v678_v4 = vshll.u32 %v537_v59, 16  ;;  %v661_v8 = vor.u32 %v660_v61, %v656_v58  ;;  %v696_v31 = vshll.u32 %v539_v26, 16  ;;  %v543_v47 = vld [vmem:[%s5025_s12 + $0x58] sm:$0xf]  ;;  %v544_v48 = vld [vmem:[%s5025_s12 + $0x5c] sm:$0x1] }
  0x3b   : > { %4369 = vmatprep.mubr.bf16.mxu1 %v3773_v42  ;;  %v674_v10 = vrot.slane %v672_v2, 5  ;;  %v717_v50 = vshrl.u32 %v542_v43, 16  ;;  %v720_v51 = vshll.u32 %v542_v43, 16  ;;  %v726_v52 = vshll.u32 %v543_v47, 16  ;;  %v4734_v53 = vld [vmem:[%s5904_s1 + $0x80] sm:$0xff]   ;;  %v4741_v43 = vld [vmem:[%s5904_s1 + $0x170] sm:$0xff]  }
  0x3c   : > { %4384 = vmatpush3.bf16.msra.mxu0 %v4716_v63  ;;  %v4725_v63 = vld [vmem:[%s5025_s12 + $0x3c] sm:$0xff]   ;;  %v680_v12 = vrot.slane %v678_v4, 5  ;;  %v662_v14 = vrot.slane %v661_v8, 4  ;;  %v698_v41 = vrot.slane %v696_v31, 5  ;;  %v984_v8 = vld [vmem:[%s5025_s12 + $0x8] sm:$0x1] }
  0x3d   : > { %4416 = vmatpush3.bf16.msra.mxu1 %v4717_v3  ;;  %4385 = vmatprep.subr.bf16.mxu0 %v4720_v21  ;;  %v651_v3 = vor.u32 %v650_v57, %v647_v56  ;;  %v675_v15 = vor.u32 %v674_v10, %v671_v9  ;;  %v736_v56 = vshll.u32 %v544_v48, 16  ;;  %v722_v59 = vrot.slane %v720_v51, 5  ;;  %v4738_v31 = vld [vmem:[%s5904_s1 + $0x138] sm:$0xff]   ;;  %v992_v48 = vld [vmem:[%s5025_s12 + $0x28] sm:$0xf] }
  0x3e   : > { %4417 = vmatprep.subr.bf16.mxu1 %v4721_v32  ;;  %v685_v18 = vor.u32 %v684_v13, %v680_v12  ;;  %v1056_v51 = vrot.slane %v992_v48, 5  ;;  %v4755_v48 = vld [vmem:[%s5025_s12 + $0x60] sm:$0xff]  }
  0x3f   : > { %4338 = vmatmul.mubr.bf16.gmra.mxu0 %v4719_v30  ;;  %v652_v11 = vrot.slane %v651_v3, 4  ;;  %v676_v22 = vrot.slane %v675_v15, 4  ;;  %v693_v30 = vshrl.u32 %v539_v26, 16  ;;  %v4736_v15 = vld [vmem:[%s5025_s12 + $0xc] sm:$0xff]  }
  0x40   : > { %4386 = vmatpush3.bf16.msra.mxu0 %v4720_v21  ;;  %4341 = vmatprep.mubr.bf16.mxu0 %v4724_v40  ;;  %v667_v21 = vsel %vm5048_vm2, %v662_v14, %v666_v62  ;;  %v686_v25 = vrot.slane %v685_v18, 4  ;;  %v1038_v14 = vrot.slane %v984_v8, 5  ;;  %v4748_v8 = vld [vmem:[%s5025_s12 + $0x3c] sm:$0xff]  }
  0x41   : > { %4418 = vmatpush3.bf16.msra.mxu1 %v4721_v32  ;;  %4387 = vmatprep.subr.bf16.mxu0 %v4722_v36  ;;  %v657_v17 = vsel %vm5048_vm2, %v652_v11, %v656_v58  ;;  %v681_v28 = vsel %vm5048_vm2, %v676_v22, %v680_v12  ;;  %v702_v32 = vshll.u32 %v540_v27, 16  ;;  %v695_v40 = vrot.slane %v693_v30, 4 }
  0x42   : > { %4370 = vmatmul.mubr.bf16.gmra.mxu1 %v3774_v55  ;;  %4419 = vmatprep.subr.bf16.mxu1 %v4723_v39  ;;  %v3775_v24 = vcombine.low %v657_v17, %v667_v21  ;;  %v691_v35 = vsel %vm5048_vm2, %v686_v25, %v690_v19  ;;  %v730_v55 = vshrl.u32 %v543_v47, 16  ;;  %v719_v58 = vrot.slane %v717_v50, 4  ;;  %v987_v21 = vld [vmem:[%s5025_s12 + $0x14] sm:$0x1] }
  0x43   : > { %v704_v42 = vrot.slane %v702_v32, 5  ;;  %v699_v49 = vor.u32 %v698_v41, %v695_v40  ;;  %v3787_v11 = vrot.slane %v982_v6, 9  ;;  %v1045_v25 = vrot.slane %v987_v21, 5  ;;  %v4739_v32 = vld [vmem:[%s5904_s1 + $0x178] sm:$0xff]   ;;  %v990_v40 = vld [vmem:[%s5025_s12 + $0x20] sm:$0x1] }
  0x44   : > { %4388 = vmatpush3.bf16.msra.mxu0 %v4722_v36  ;;  %4373 = vmatprep.mubr.bf16.mxu1 %v3775_v24  ;;  %v706_v36 = vshrl.u32 %v540_v27, 16  ;;  %v732_v62 = vrot.slane %v730_v55, 4  ;;  %v723_v3 = vor.u32 %v722_v59, %v719_v58  ;;  %v3789_v41 = vrot.slane %v988_v38, 9  ;;  %v4744_v58 = vld [vmem:[%s5904_s1 + $0x128] sm:$0xff]   ;;  %v4750_v21 = vld [vmem:[%s5904_s1 + $0x118] sm:$0xff]  }
  0x45   : > { %4420 = vmatpush3.bf16.msra.mxu1 %v4723_v39  ;;  %4389 = vmatprep.subr.bf16.mxu0 %v4726_v60  ;;  %v3776_v39 = vcombine.low %v681_v28, %v691_v35  ;;  %v700_v57 = vrot.slane %v699_v49, 4  ;;  %v4737_v35 = vld [vmem:[%s5025_s12 + $0x18] sm:$0xff]   ;;  %v993_v49 = vld [vmem:[%s5025_s12 + $0x2c] sm:$0x1] }
  0x46   : > { %4421 = vmatprep.subr.bf16.mxu1 %v4727_v7  ;;  %v708_v45 = vrot.slane %v706_v36, 4  ;;  %v724_v10 = vrot.slane %v723_v3, 4  ;;  %v4740_v36 = vld [vmem:[%s5904_s1 + $0x130] sm:$0xff]   ;;  %v4747_v3 = vld [vmem:[%s5904_s1 + $0x160] sm:$0xff]  }
  0x47   : > { %4342 = vmatmul.mubr.bf16.gmra.mxu0 %v4725_v63  ;;  %v738_v63 = vrot.slane %v736_v56, 5  ;;  %v705_v2 = vsel %vm5048_vm2, %v700_v57, %v704_v42  ;;  %v1058_v57 = vrot.slane %v1056_v51, 4 }
  0x48   : > { %4390 = vmatpush3.bf16.msra.mxu0 %v4726_v60  ;;  %4345 = vmatprep.mubr.bf16.mxu0 %v4730_v23  ;;  %v709_v54 = vor.u32 %v708_v45, %v704_v42  ;;  %v728_v60 = vrot.slane %v726_v52, 5  ;;  %v991_v45 = vld [vmem:[%s5025_s12 + $0x24] sm:$0xe]  ;;  %v1059_v52 = vrot.slane %v993_v49, 5  ;;  %v4756_v49 = vld [vmem:[%s5904_s1 + $0x108] sm:$0xff]  }
  0x49   : > { %4422 = vmatpush3.bf16.msra.mxu1 %v4727_v7  ;;  %4391 = vmatprep.subr.bf16.mxu0 %v4728_v16  ;;  %v983_v7 = vld [vmem:[%s5025_s12 + $0x4] sm:$0xf]  ;;  %v3790_v50 = vrot.slane %v991_v45, 9 }
  0x4a   : > { %4423 = vmatprep.subr.bf16.mxu1 %v4729_v20  ;;  %4374 = vmatmul.mubr.bf16.gmra.mxu1 %v3776_v39  ;;  %v710_v61 = vrot.slane %v709_v54, 4  ;;  %v733_v5 = vor.u32 %v732_v62, %v728_v60  ;;  %v1035_v12 = vrot.slane %v983_v7, 5  ;;  %v729_v17 = vsel %vm5048_vm2, %v724_v10, %v728_v60  ;;  %v989_v39 = vld [vmem:[%s5025_s12 + $0x1c] sm:$0xf]  ;;  %v4742_v54 = vld [vmem:[%s5025_s12 + $0x24] sm:$0xff]   ;;  %v4743_v60 = vld [vmem:[%s5025_s12 + $0x30] sm:$0xff]  }
  0x4b   : > { %v1049_v42 = vrot.slane %v989_v39, 5  ;;  %v1057_v56 = vsel %vm5154_vm5, %v3790_v50, %v1056_v51  ;;  %v1060_v59 = vsel %vm5154_vm5, %v1058_v57, %v1059_v52  ;;  %v1004_v39 = vld [vmem:[%s5025_s12 + $0x58] sm:$0xf]  ;;  %v4757_v50 = vld [vmem:[%s5904_s1 + $0x148] sm:$0xff]   ;;  %v4758_v52 = vld [vmem:[%s5904_s1 + $0x100] sm:$0xff]  }
  0x4c   : > { %4392 = vmatpush3.bf16.msra.mxu0 %v4728_v16  ;;  %v715_v4 = vsel %vm5048_vm2, %v710_v61, %v714_v46  ;;  %v734_v13 = vrot.slane %v733_v5, 4  ;;  %v985_v16 = vld [vmem:[%s5025_s12 + $0xc] sm:$0xe]  ;;  %v1036_v18 = vsel %vm5154_vm5, %v3787_v11, %v1035_v12  ;;  %v1037_v19 = vrot.slane %v1035_v12, 4  ;;  %v998_v12 = vld [vmem:[%s5025_s12 + $0x40] sm:$0xf] }
  0x4d   : > { %4393 = vmatprep.subr.bf16.mxu0 %v4732_v34  ;;  %4424 = vmatpush3.bf16.msra.mxu1 %v4729_v20  ;;  %v3777_v9 = vcombine.low %v705_v2, %v715_v4  ;;  %v986_v20 = vld [vmem:[%s5025_s12 + $0x10] sm:$0xf]  ;;  %v3788_v22 = vrot.slane %v985_v16, 9  ;;  %v1050_v46 = vsel %vm5154_vm5, %v3789_v41, %v1049_v42  ;;  %v1051_v47 = vrot.slane %v1049_v42, 4  ;;  %v4745_v61 = vld [vmem:[%s5904_s1 + $0x168] sm:$0xff]  }
  0x4e   : > { %4425 = vmatprep.subr.bf16.mxu1 %v4733_v44  ;;  %v739_v23 = vsel %vm5048_vm2, %v734_v13, %v738_v63  ;;  %v1042_v24 = vrot.slane %v986_v20, 5  ;;  %v1039_v27 = vsel %vm5154_vm5, %v1037_v19, %v1038_v14  ;;  %v3814_v62 = vcombine.low %v1057_v56, %v1060_v59  ;;  %v4746_v63 = vld [vmem:[%s5904_s1 + $0x120] sm:$0xff]   ;;  %v995_v2 = vld [vmem:[%s5025_s12 + $0x34] sm:$0xf]  ;;  %v996_v4 = vld [vmem:[%s5025_s12 + $0x38] sm:$0x1] }
  0x4f   : > { %4346 = vmatmul.mubr.bf16.gmra.mxu0 %v4731_v33  ;;  %4377 = vmatprep.mubr.bf16.mxu1 %v3777_v9  ;;  %v3778_v26 = vcombine.low %v729_v17, %v739_v23  ;;  %v3811_v28 = vcombine.low %v1036_v18, %v1039_v27  ;;  %v1063_v6 = vrot.slane %v995_v2, 5  ;;  %v1066_v7 = vrot.slane %v996_v4, 5  ;;  %v997_v9 = vld [vmem:[%s5025_s12 + $0x3c] sm:$0xe]  ;;  %v999_v13 = vld [vmem:[%s5025_s12 + $0x44] sm:$0x1] }
  0x50   : > { %4394 = vmatpush3.bf16.msra.mxu0 %v4732_v34  ;;  %v1043_v29 = vsel %vm5154_vm5, %v3788_v22, %v1042_v24  ;;  %v1044_v30 = vrot.slane %v1042_v24, 4  ;;  %v3792_v14 = vrot.slane %v997_v9, 9  ;;  %v1073_v16 = vrot.slane %v999_v13, 5  ;;  %v4749_v22 = vld [vmem:[%s5025_s12 + $0x48] sm:$0xff]   ;;  %v4751_v23 = vld [vmem:[%s5904_s1 + $0x158] sm:$0xff]   ;;  %v4753_v27 = vld [vmem:[%s5904_s1 + $0x150] sm:$0xff]  }
  0x51   : > { %4395 = vmatprep.subr.bf16.mxu0 %v4734_v53  ;;  %4426 = vmatpush3.bf16.msra.mxu1 %v4733_v44  ;;  %v1052_v44 = vrot.slane %v990_v40, 5  ;;  %v1065_v11 = vrot.slane %v1063_v6, 4  ;;  %v1005_v40 = vld [vmem:[%s5025_s12 + $0x5c] sm:$0x1]  ;;  %v1084_v42 = vrot.slane %v1004_v39, 5 }
  0x52   : > { %4427 = vmatprep.subr.bf16.mxu1 %v4735_v0  ;;  %4378 = vmatmul.mubr.bf16.gmra.mxu1 %v3778_v26  ;;  %v1046_v33 = vsel %vm5154_vm5, %v1044_v30, %v1045_v25  ;;  %v4752_v25 = vld [vmem:[%s5904_s1 + $0x110] sm:$0xff]   ;;  %v5286_v2 = vld [vmem:[%s5904_s1 + $0x1b8] sm:$0xff]  }
  0x53   : > { %4397 = vmatprep.mubr.bf16.mxu0 %v3811_v28  ;;  %4429 = vmatprep.mubr.bf16.mxu1 %v4736_v15  ;;  %v3812_v34 = vcombine.low %v1043_v29, %v1046_v33  ;;  %v1070_v15 = vrot.slane %v998_v12, 5  ;;  %v1067_v17 = vsel %vm5154_vm5, %v1065_v11, %v1066_v7  ;;  %v1000_v28 = vld [vmem:[%s5025_s12 + $0x48] sm:$0xe]  ;;  %v1001_v29 = vld [vmem:[%s5025_s12 + $0x4c] sm:$0xf] }
  0x54   : > { %4396 = vmatpush3.bf16.msra.mxu0 %v4734_v53  ;;  %v1053_v53 = vsel %vm5154_vm5, %v1051_v47, %v1052_v44  ;;  %v1002_v30 = vld [vmem:[%s5025_s12 + $0x50] sm:$0x1]  ;;  %v1086_v47 = vrot.slane %v1084_v42, 4  ;;  %v3877_v57 = vld [vmem:[%s5025_s12 + $0x14] sm:$0x1] }
  0x55   : > { %4428 = vmatpush3.bf16.msra.mxu1 %v4735_v0  ;;  %4445 = vmatprep.subr.bf16.mxu0 %v4738_v31  ;;  %v3813_v55 = vcombine.low %v1050_v46, %v1053_v53  ;;  %v994_v0 = vld [vmem:[%s5025_s12 + $0x30] sm:$0xe]  ;;  %v1071_v19 = vsel %vm5154_vm5, %v3792_v14, %v1070_v15  ;;  %v1072_v20 = vrot.slane %v1070_v15, 4  ;;  %v1080_v33 = vrot.slane %v1002_v30, 5  ;;  %v3933_v7 = vld [vmem:[%s5025_s12 + $0x14] sm:$0x1] }
  0x56   : > { %4477 = vmatprep.subr.bf16.mxu1 %v4739_v32  ;;  %v3791_v5 = vrot.slane %v994_v0, 9  ;;  %v3876_v56 = vld [vmem:[%s5025_s12 + $0x10] sm:$0xf]  ;;  %v2117_v11 = vrot.slane %v3933_v7, 5  ;;  %v3878_v12 = vld [vmem:[%s5025_s12 + $0x18] sm:$0xf] }
  0x57   : > { %4398 = vmatmul.mubr.bf16.vlgmr.msra.gmra.mxu0 %v3812_v34  ;;  %v1074_v24 = vsel %vm5154_vm5, %v1072_v20, %v1073_v16  ;;  %v4754_v34 = vld [vmem:[%s5025_s12 + $0x54] sm:$0xff]   ;;  %v3932_v0 = vld [vmem:[%s5025_s12 + $0x10] sm:$0xf]  ;;  %v3879_v15 = vld [vmem:[%s5025_s12 + $0x1c] sm:$0xf] }
  0x58   : > { %4446 = vmatpush3.bf16.msra.mxu0 %v4738_v31  ;;  %4401 = vmatprep.mubr.bf16.mxu0 %v3813_v55  ;;  %v1064_v10 = vsel %vm5154_vm5, %v3791_v5, %v1063_v6  ;;  %v3816_v26 = vcombine.low %v1071_v19, %v1074_v24  ;;  %v3793_v31 = vrot.slane %v1000_v28, 9  ;;  %v3875_v55 = vld [vmem:[%s5025_s12 + $0xc] sm:$0xf]  ;;  %v3880_v16 = vld [vmem:[%s5025_s12 + $0x20] sm:$0x1]  ;;  %v5298_v24 = vld [vmem:[%s5904_s1 + $0x1f8] sm:$0xff]  }
  0x59   : > { %4447 = vmatprep.subr.bf16.mxu0 %v4740_v36  ;;  %v3815_v18 = vcombine.low %v1064_v10, %v1067_v17  ;;  %v1634_v59 = vshll.u32 %v3875_v55, 16  ;;  %v2114_v10 = vrot.slane %v3932_v0, 5  ;;  %v1655_v17 = vshrl.u32 %v3878_v12, 16  ;;  %v3938_v0 = vld [vmem:[%s5025_s12 + $0x28] sm:$0xf] }
  0x5a   : > { %4430 = vmatmul.mubr.bf16.vlgmr.msra.gmra.mxu1 %v4737_v35  ;;  %v1003_v35 = vld [vmem:[%s5025_s12 + $0x54] sm:$0xe] }
  0x5b   : > { %4478 = vmatpush3.bf16.msra.mxu1 %v4739_v32  ;;  %4433 = vmatprep.mubr.bf16.mxu1 %v4742_v54  ;;  %v1077_v32 = vrot.slane %v1001_v29, 5  ;;  %v3794_v41 = vrot.slane %v1003_v35, 9  ;;  %v4759_v54 = vld [vmem:[%s5904_s1 + $0x140] sm:$0xff]   ;;  %v1636_v4 = vrot.slane %v1634_v59, 5  ;;  %v2116_v20 = vrot.slane %v2114_v10, 4 }
  0x5c   : > { %4448 = vmatpush3.bf16.msra.mxu0 %v4740_v36  ;;  %4479 = vmatprep.subr.bf16.mxu1 %v4741_v43  ;;  %v3935_v29 = vld [vmem:[%s5025_s12 + $0x1c] sm:$0xf] }
  0x5d   : > { %4449 = vmatprep.subr.bf16.mxu0 %v4744_v58  ;;  %v1078_v36 = vsel %vm5154_vm5, %v3793_v31, %v1077_v32  ;;  %v1079_v38 = vrot.slane %v1077_v32, 4  ;;  %v1085_v46 = vsel %vm5154_vm5, %v3794_v41, %v1084_v42  ;;  %v2118_v30 = vsel %vm5154_vm5, %v2116_v20, %v2117_v11  ;;  %v4765_v20 = vld [vmem:[%s5904_s1 + $0x1e8] sm:$0xff]  }
  0x5f   : > { %4480 = vmatpush3.bf16.msra.mxu1 %v4741_v43  ;;  %4402 = vmatmul.mubr.bf16.gmra.mxu0 %v3814_v62  ;;  %v1087_v43 = vrot.slane %v1005_v40, 5  ;;  %v1081_v44 = vsel %vm5154_vm5, %v1079_v38, %v1080_v33  ;;  %v1650_v62 = vshll.u32 %v3877_v57, 16  ;;  %v1674_v33 = vshll.u32 %v3880_v16, 16 }
  0x60   : > { %4481 = vmatprep.subr.bf16.mxu1 %v4745_v61  ;;  %4450 = vmatpush3.bf16.msra.mxu0 %v4744_v58  ;;  %v3817_v45 = vcombine.low %v1078_v36, %v1081_v44  ;;  %v1631_v58 = vshrl.u32 %v3875_v55, 16  ;;  %v3883_v55 = vld [vmem:[%s5025_s12 + $0x2c] sm:$0x1] }
  0x61   : > { %4451 = vmatprep.subr.bf16.mxu0 %v4746_v63  ;;  %4405 = vmatprep.mubr.bf16.mxu0 %v3815_v18  ;;  %v1088_v51 = vsel %vm5154_vm5, %v1086_v47, %v1087_v43  ;;  %v1658_v18 = vshll.u32 %v3878_v12, 16  ;;  %v1676_v42 = vrot.slane %v1674_v33, 5  ;;  %v2128_v12 = vrot.slane %v3938_v0, 5 }
  0x62   : > { %4434 = vmatmul.mubr.bf16.gmra.mxu1 %v4743_v60  ;;  %v3818_v53 = vcombine.low %v1085_v46, %v1088_v51  ;;  %v1640_v60 = vshll.u32 %v3876_v56, 16  ;;  %v3881_v51 = vld [vmem:[%s5025_s12 + $0x24] sm:$0xf] }
  0x63   : > { %4482 = vmatpush3.bf16.msra.mxu1 %v4745_v61  ;;  %4437 = vmatprep.mubr.bf16.mxu1 %v4748_v8  ;;  %v1644_v61 = vshrl.u32 %v3876_v56, 16  ;;  %v1652_v8 = vrot.slane %v1650_v62, 5  ;;  %v1660_v28 = vrot.slane %v1658_v18, 5  ;;  %v1679_v56 = vshrl.u32 %v3881_v51, 16  ;;  %v3886_v18 = vld [vmem:[%s5025_s12 + $0x38] sm:$0x1] }
  0x64   : > { %4483 = vmatprep.subr.bf16.mxu1 %v4747_v3  ;;  %4452 = vmatpush3.bf16.msra.mxu0 %v4746_v63  ;;  %v3931_v63 = vld [vmem:[%s5025_s12 + $0xc] sm:$0xe]  ;;  %v1642_v5 = vrot.slane %v1640_v60, 5  ;;  %v1682_v57 = vshll.u32 %v3881_v51, 16  ;;  %v1698_v62 = vshll.u32 %v3883_v55, 16 }
  0x65   : > { %4453 = vmatprep.subr.bf16.mxu0 %v4750_v21  ;;  %v1646_v6 = vrot.slane %v1644_v61, 4  ;;  %v3955_v9 = vrot.slane %v3931_v63, 9  ;;  %v3937_v63 = vld [vmem:[%s5025_s12 + $0x24] sm:$0xe]  ;;  %v3887_v51 = vld [vmem:[%s5025_s12 + $0x3c] sm:$0xf] }
  0x66   : > { %v3957_v11 = vrot.slane %v3937_v63, 9  ;;  %v3888_v55 = vld [vmem:[%s5025_s12 + $0x40] sm:$0xf]  ;;  %v4769_v63 = vld [vmem:[%s5904_s1 + $0x1d8] sm:$0xff]  }
  0x67   : > { %4484 = vmatpush3.bf16.msra.mxu1 %v4747_v3  ;;  %4406 = vmatmul.mubr.bf16.gmra.mxu0 %v3816_v26  ;;  %v1633_v3 = vrot.slane %v1631_v58, 4  ;;  %v1647_v14 = vor.u32 %v1646_v6, %v1642_v5  ;;  %v2115_v19 = vsel %vm5154_vm5, %v3955_v9, %v2114_v10  ;;  %v1684_v6 = vrot.slane %v1682_v57, 5  ;;  %v4768_v57 = vld [vmem:[%s5904_s1 + $0x198] sm:$0xff]  }
  0x68   : > { %4485 = vmatprep.subr.bf16.mxu1 %v4751_v23  ;;  %4454 = vmatpush3.bf16.msra.mxu0 %v4750_v21  ;;  %v1664_v21 = vshll.u32 %v3879_v15, 16  ;;  %v3979_v38 = vcombine.low %v2115_v19, %v2118_v30  ;;  %v1700_v10 = vrot.slane %v1698_v62, 5  ;;  %v3943_v62 = vld [vmem:[%s5025_s12 + $0x3c] sm:$0xe] }
  0x69   : > { %4455 = vmatprep.subr.bf16.mxu0 %v4752_v25  ;;  %4409 = vmatprep.mubr.bf16.mxu0 %v3817_v45  ;;  %v1637_v13 = vor.u32 %v1636_v4, %v1633_v3  ;;  %v1648_v26 = vrot.slane %v1647_v14, 4  ;;  %v2121_v45 = vrot.slane %v3935_v29, 5  ;;  %v4763_v4 = vld [vmem:[%s5904_s1 + $0x1f0] sm:$0xff]   ;;  %v4764_v14 = vld [vmem:[%s5904_s1 + $0x1a8] sm:$0xff]  }
  0x6a   : > { %4438 = vmatmul.mubr.bf16.gmra.mxu1 %v4749_v22  ;;  %v1668_v22 = vshrl.u32 %v3879_v15, 16  ;;  %v1666_v31 = vrot.slane %v1664_v21, 5 }
  0x6b   : > { %4486 = vmatpush3.bf16.msra.mxu1 %v4751_v23  ;;  %4441 = vmatprep.mubr.bf16.mxu1 %v4754_v34  ;;  %v3934_v23 = vld [vmem:[%s5025_s12 + $0x18] sm:$0xe]  ;;  %v3936_v34 = vld [vmem:[%s5025_s12 + $0x20] sm:$0x1]  ;;  %v1653_v36 = vsel %vm5048_vm2, %v1648_v26, %v1652_v8  ;;  %v3939_v8 = vld [vmem:[%s5025_s12 + $0x2c] sm:$0x1] }
  0x6c   : > { %4487 = vmatprep.subr.bf16.mxu1 %v4753_v27  ;;  %4456 = vmatpush3.bf16.msra.mxu0 %v4752_v25  ;;  %v1638_v25 = vrot.slane %v1637_v13, 4  ;;  %v1670_v32 = vrot.slane %v1668_v22, 4  ;;  %v3956_v43 = vrot.slane %v3934_v23, 9  ;;  %v2124_v46 = vrot.slane %v3936_v34, 5  ;;  %v3884_v13 = vld [vmem:[%s5025_s12 + $0x30] sm:$0xf] }
  0x6d   : > { %4457 = vmatprep.subr.bf16.mxu0 %v4756_v49  ;;  %v2131_v16 = vrot.slane %v3939_v8, 5  ;;  %v1703_v19 = vshrl.u32 %v3884_v13, 16  ;;  %v2129_v22 = vsel %vm5154_vm5, %v3957_v11, %v2128_v12  ;;  %v2130_v23 = vrot.slane %v2128_v12, 4  ;;  %v3941_v26 = vld [vmem:[%s5025_s12 + $0x34] sm:$0xf] }
  0x6e   : > { %v1643_v35 = vsel %vm5048_vm2, %v1638_v25, %v1642_v5  ;;  %v1671_v41 = vor.u32 %v1670_v32, %v1666_v31  ;;  %v1681_v5 = vrot.slane %v1679_v56, 4  ;;  %v1706_v25 = vshll.u32 %v3884_v13, 16  ;;  %v3889_v56 = vld [vmem:[%s5025_s12 + $0x44] sm:$0x1]  ;;  %v3890_v12 = vld [vmem:[%s5025_s12 + $0x48] sm:$0xf] }
  0x6f   : > { %4488 = vmatpush3.bf16.msra.mxu1 %v4753_v27  ;;  %4410 = vmatmul.mubr.bf16.gmra.mxu0 %v3818_v53  ;;  %v1657_v27 = vrot.slane %v1655_v17, 4  ;;  %v3915_v40 = vcombine.low %v1643_v35, %v1653_v36  ;;  %v3885_v17 = vld [vmem:[%s5025_s12 + $0x34] sm:$0xf]  ;;  %v2132_v33 = vsel %vm5154_vm5, %v2130_v23, %v2131_v16  ;;  %v1722_v34 = vshll.u32 %v3886_v18, 16  ;;  %v4766_v35 = vld [vmem:[%s5904_s1 + $0x1a0] sm:$0xff]  }
  0x70   : > { %4489 = vmatprep.subr.bf16.mxu1 %v4757_v50  ;;  %4458 = vmatpush3.bf16.msra.mxu0 %v4756_v49  ;;  %v1672_v47 = vrot.slane %v1671_v41, 4  ;;  %v2122_v49 = vsel %vm5154_vm5, %v3956_v43, %v2121_v45  ;;  %v1685_v15 = vor.u32 %v1684_v6, %v1681_v5  ;;  %v1712_v29 = vshll.u32 %v3885_v17, 16  ;;  %v4767_v41 = vld [vmem:[%s5904_s1 + $0x1e0] sm:$0xff]   ;;  %v3891_v13 = vld [vmem:[%s5025_s12 + $0x4c] sm:$0xf] }
  0x71   : > { %4459 = vmatprep.subr.bf16.mxu0 %v4758_v52  ;;  %v1661_v39 = vor.u32 %v1660_v28, %v1657_v27  ;;  %4461 = vmatprep.mubr.bf16.mxu0 %v3915_v40  ;;  %v1705_v28 = vrot.slane %v1703_v19, 4  ;;  %v1716_v30 = vshrl.u32 %v3885_v17, 16  ;;  %v1746_v5 = vshll.u32 %v3889_v56, 16  ;;  %v3944_v6 = vld [vmem:[%s5025_s12 + $0x40] sm:$0xf] }
  0x72   : > { %4442 = vmatmul.mubr.bf16.gmra.mxu1 %v4755_v48  ;;  %v1677_v53 = vsel %vm5048_vm2, %v1672_v47, %v1676_v42  ;;  %v1686_v27 = vrot.slane %v1685_v15, 4  ;;  %v3959_v17 = vrot.slane %v3943_v62, 9  ;;  %v3892_v18 = vld [vmem:[%s5025_s12 + $0x50] sm:$0x1]  ;;  %v3946_v23 = vld [vmem:[%s5025_s12 + $0x48] sm:$0xe] }
  0x73   : > { %4490 = vmatpush3.bf16.msra.mxu1 %v4757_v50  ;;  %4493 = vmatprep.mubr.bf16.mxu1 %v3979_v38  ;;  %v1662_v44 = vrot.slane %v1661_v39, 4  ;;  %v2123_v50 = vrot.slane %v2121_v45, 4  ;;  %v3981_v38 = vcombine.low %v2129_v22, %v2132_v33  ;;  %v1714_v39 = vrot.slane %v1712_v29, 5  ;;  %v3947_v29 = vld [vmem:[%s5025_s12 + $0x4c] sm:$0xf] }
  0x74   : > { %4491 = vmatprep.subr.bf16.mxu1 %v4759_v54  ;;  %4460 = vmatpush3.bf16.msra.mxu0 %v4758_v52  ;;  %v3882_v52 = vld [vmem:[%s5025_s12 + $0x28] sm:$0xf]  ;;  %v1718_v40 = vrot.slane %v1716_v30, 4  ;;  %v1748_v16 = vrot.slane %v1746_v5, 5  ;;  %v1751_v22 = vshrl.u32 %v3890_v12, 16  ;;  %v4771_v30 = vld [vmem:[%s5904_s1 + $0x1d0] sm:$0xff]  }
  0x75   : > { %4509 = vmatprep.subr.bf16.mxu0 %v5286_v2  ;;  %v1667_v48 = vsel %vm5048_vm2, %v1662_v44, %v1666_v31  ;;  %v1688_v58 = vshll.u32 %v3882_v52, 16  ;;  %v2125_v60 = vsel %vm5154_vm5, %v2123_v50, %v2124_v46  ;;  %v1692_v61 = vshrl.u32 %v3882_v52, 16  ;;  %v3942_v31 = vld [vmem:[%s5025_s12 + $0x38] sm:$0x1]  ;;  %v3949_v5 = vld [vmem:[%s5025_s12 + $0x54] sm:$0xe] }
  0x76   : > { %v3916_v59 = vcombine.low %v1667_v48, %v1677_v53  ;;  %v3980_v3 = vcombine.low %v2122_v49, %v2125_v60  ;;  %v1724_v44 = vrot.slane %v1722_v34, 5  ;;  %v1719_v47 = vor.u32 %v1718_v40, %v1714_v39  ;;  %v3948_v34 = vld [vmem:[%s5025_s12 + $0x50] sm:$0x1] }
  0x77   : > { %4492 = vmatpush3.bf16.msra.mxu1 %v4759_v54  ;;  %v4762_v54 = vld [vmem:[%s5904_s1 + $0x1b0] sm:$0xff]   ;;  %v1690_v7 = vrot.slane %v1688_v58, 5  ;;  %v1694_v9 = vrot.slane %v1692_v61, 4  ;;  %v2135_v48 = vrot.slane %v3941_v26, 5  ;;  %v2138_v49 = vrot.slane %v3942_v31, 5 }
  0x78   : > { %4541 = vmatprep.subr.bf16.mxu1 %v5298_v24  ;;  %4462 = vmatmul.mubr.bf16.vlgmr.msra.gmra.mxu0 %v3916_v59  ;;  %v1720_v52 = vrot.slane %v1719_v47, 4  ;;  %v1727_v59 = vshrl.u32 %v3887_v51, 16  ;;  %v1730_v60 = vshll.u32 %v3887_v51, 16  ;;  %v1736_v61 = vshll.u32 %v3888_v55, 16 }
  0x79   : > { %4510 = vmatpush3.bf16.msra.mxu0 %v5286_v2  ;;  %v1695_v21 = vor.u32 %v1694_v9, %v1690_v7  ;;  %v3940_v2 = vld [vmem:[%s5025_s12 + $0x30] sm:$0xe]  ;;  %v1691_v36 = vsel %vm5048_vm2, %v1686_v27, %v1690_v7  ;;  %v3945_v7 = vld [vmem:[%s5025_s12 + $0x44] sm:$0x1]  ;;  %v1754_v26 = vshll.u32 %v3890_v12, 16  ;;  %v1760_v27 = vshll.u32 %v3891_v13, 16 }
  0x7a   : > { %4494 = vmatmul.mubr.bf16.vlgmr.msra.gmra.mxu1 %v3980_v3  ;;  %4511 = vmatprep.subr.bf16.mxu0 %v4762_v54  ;;  %v3958_v45 = vrot.slane %v3940_v2, 9  ;;  %v1725_v0 = vsel %vm5048_vm2, %v1720_v52, %v1724_v44  ;;  %v1732_v11 = vrot.slane %v1730_v60, 5  ;;  %v3960_v44 = vrot.slane %v3946_v23, 9  ;;  %v3894_v60 = vld [vmem:[%s5025_s12 + $0x58] sm:$0xf] }
  0x7b   : > { %4542 = vmatpush3.bf16.msra.mxu1 %v5298_v24  ;;  %v1696_v32 = vrot.slane %v1695_v21, 4  ;;  %v1708_v24 = vrot.slane %v1706_v25, 5  ;;  %4497 = vmatprep.mubr.bf16.mxu1 %v3981_v38  ;;  %v2145_v21 = vrot.slane %v3945_v7, 5  ;;  %v4770_v25 = vld [vmem:[%s5904_s1 + $0x190] sm:$0xff]   ;;  %v1756_v38 = vrot.slane %v1754_v26, 5 }
  0x7c   : > { %4543 = vmatprep.subr.bf16.mxu1 %v4763_v4  ;;  %v2136_v53 = vsel %vm5154_vm5, %v3958_v45, %v2135_v48  ;;  %v5402_v45 = vld [vmem:[%s5904_s1 + $0x1c8] sm:$0xff]   ;;  %v2149_v52 = vrot.slane %v3947_v29, 5  ;;  %v3896_v12 = vld [vmem:[%s5025_s12 + $0x60] sm:$0xf] }
  0x7d   : > { %4512 = vmatpush3.bf16.msra.mxu0 %v4762_v54  ;;  %v1701_v42 = vsel %vm5048_vm2, %v1696_v32, %v1700_v10  ;;  %v1709_v43 = vor.u32 %v1708_v24, %v1705_v28  ;;  %v2137_v54 = vrot.slane %v2135_v48, 4  ;;  %v1729_v10 = vrot.slane %v1727_v59, 4  ;;  %v3898_v23 = vld [vmem:[%s5025_s12 + $0x68] sm:$0x1] }
  0x7e   : > { %4513 = vmatprep.subr.bf16.mxu0 %v4764_v14  ;;  %v3917_v46 = vcombine.low %v1691_v36, %v1701_v42  ;;  %v1764_v28 = vshrl.u32 %v3891_v13, 16  ;;  %v1753_v24 = vrot.slane %v1751_v22, 4  ;;  %v2151_v59 = vrot.slane %v2149_v52, 4 }
  0x7f   : > { %4544 = vmatpush3.bf16.msra.mxu1 %v4763_v4  ;;  %v1710_v50 = vrot.slane %v1709_v43, 4  ;;  %v2139_v3 = vsel %vm5154_vm5, %v2137_v54, %v2138_v49  ;;  %v1740_v4 = vshrl.u32 %v3888_v55, 16  ;;  %v1733_v19 = vor.u32 %v1732_v11, %v1729_v10  ;;  %v4774_v54 = vld [vmem:[%s5904_s1 + $0x180] sm:$0xff]   ;;  %v3951_v11 = vld [vmem:[%s5025_s12 + $0x5c] sm:$0x1] }
  0x80   : > { %4545 = vmatprep.subr.bf16.mxu1 %v4765_v20  ;;  %4465 = vmatprep.mubr.bf16.mxu0 %v3917_v46  ;;  %v3982_v9 = vcombine.low %v2136_v53, %v2139_v3  ;;  %v1766_v40 = vrot.slane %v1764_v28, 4  ;;  %v1770_v43 = vshll.u32 %v3892_v18, 16  ;;  %v1757_v48 = vor.u32 %v1756_v38, %v1753_v24  ;;  %v4775_v18 = vld [vmem:[%s5904_s1 + $0x1c0] sm:$0xff]   ;;  %v3954_v24 = vld [vmem:[%s5025_s12 + $0x68] sm:$0x1] }
  0x81   : > { %4514 = vmatpush3.bf16.msra.mxu0 %v4764_v14  ;;  %v1715_v58 = vsel %vm5048_vm2, %v1710_v50, %v1714_v39  ;;  %v1738_v14 = vrot.slane %v1736_v61, 5  ;;  %v1742_v15 = vrot.slane %v1740_v4, 4  ;;  %v1734_v31 = vrot.slane %v1733_v19, 4  ;;  %v3895_v61 = vld [vmem:[%s5025_s12 + $0x5c] sm:$0x1] }
  0x82   : > { %4515 = vmatprep.subr.bf16.mxu0 %v4766_v35  ;;  %v3918_v8 = vcombine.low %v1715_v58, %v1725_v0  ;;  %4498 = vmatmul.mubr.bf16.gmra.mxu1 %v3982_v9  ;;  %v1762_v39 = vrot.slane %v1760_v27, 5  ;;  %v1772_v51 = vrot.slane %v1770_v43, 5  ;;  %v2152_v53 = vrot.slane %v3948_v34, 5  ;;  %v3952_v28 = vld [vmem:[%s5025_s12 + $0x60] sm:$0xe] }
  0x83   : > { %4546 = vmatpush3.bf16.msra.mxu1 %v4765_v20  ;;  %v2142_v20 = vrot.slane %v3944_v6, 5  ;;  %v1743_v2 = vor.u32 %v1742_v15, %v1738_v14  ;;  %v1758_v55 = vrot.slane %v1757_v48, 4  ;;  %v2150_v58 = vsel %vm5154_vm5, %v3960_v44, %v2149_v52  ;;  %v3950_v6 = vld [vmem:[%s5025_s12 + $0x58] sm:$0xf] }
  0x84   : > { %4547 = vmatprep.subr.bf16.mxu1 %v4767_v41  ;;  %4466 = vmatmul.mubr.bf16.gmra.mxu0 %v3918_v8  ;;  %v1767_v49 = vor.u32 %v1766_v40, %v1762_v39  ;;  %v1784_v4 = vshll.u32 %v3894_v60, 16  ;;  %v2153_v8 = vsel %vm5154_vm5, %v2151_v59, %v2152_v53  ;;  %v1788_v10 = vshrl.u32 %v3894_v60, 16  ;;  %v4776_v60 = vld [vmem:[%s5025_s12 + $0x18] sm:$0xff]  }
  0x85   : > { %4516 = vmatpush3.bf16.msra.mxu0 %v4766_v35  ;;  %v2143_v32 = vsel %vm5154_vm5, %v3959_v17, %v2142_v20  ;;  %v2144_v33 = vrot.slane %v2142_v20, 4  ;;  %v4772_v35 = vld [vmem:[%s5904_s1 + $0x188] sm:$0xff]   ;;  %v1744_v36 = vrot.slane %v1743_v2, 4  ;;  %v3984_v13 = vcombine.low %v2150_v58, %v2153_v8  ;;  %v3897_v17 = vld [vmem:[%s5025_s12 + $0x64] sm:$0xf] }
  0x86   : > { %4517 = vmatprep.subr.bf16.mxu0 %v4768_v57  ;;  %v1768_v56 = vrot.slane %v1767_v49, 4  ;;  %v1786_v15 = vrot.slane %v1784_v4, 5  ;;  %v1790_v19 = vrot.slane %v1788_v10, 4  ;;  %v3961_v20 = vrot.slane %v3949_v5, 9 }
  0x87   : > { %4548 = vmatpush3.bf16.msra.mxu1 %v4767_v41  ;;  %v1739_v41 = vsel %vm5048_vm2, %v1734_v31, %v1738_v14  ;;  %v2146_v42 = vsel %vm5154_vm5, %v2144_v33, %v2145_v21  ;;  %v1749_v46 = vsel %vm5048_vm2, %v1744_v36, %v1748_v16  ;;  %v1794_v16 = vshll.u32 %v3895_v61, 16  ;;  %v3953_v33 = vld [vmem:[%s5025_s12 + $0x64] sm:$0xf]  ;;  %v4043_v61 = vld [vmem:[%s5025_s12 + $0x18] sm:$0xf] }
  0x88   : > { %4549 = vmatprep.subr.bf16.mxu1 %v4769_v63  ;;  %v3983_v47 = vcombine.low %v2143_v32, %v2146_v42  ;;  %v3919_v50 = vcombine.low %v1739_v41, %v1749_v46  ;;  %v1773_v0 = vsel %vm5048_vm2, %v1768_v56, %v1772_v51  ;;  %v2156_v21 = vrot.slane %v3950_v6, 5 }
  0x89   : > { %4518 = vmatpush3.bf16.msra.mxu0 %v4768_v57  ;;  %v3893_v57 = vld [vmem:[%s5025_s12 + $0x54] sm:$0xf]  ;;  %v2159_v22 = vrot.slane %v3951_v11, 5  ;;  %v1796_v2 = vrot.slane %v1794_v16, 5  ;;  %v1799_v26 = vshrl.u32 %v3896_v12, 16  ;;  %v1802_v27 = vshll.u32 %v3896_v12, 16 }
  0x8a   : > { %4519 = vmatprep.subr.bf16.mxu0 %v4770_v25  ;;  %4501 = vmatprep.mubr.bf16.mxu1 %v3983_v47  ;;  %v1775_v62 = vshrl.u32 %v3893_v57, 16  ;;  %v1778_v3 = vshll.u32 %v3893_v57, 16  ;;  %v1791_v29 = vor.u32 %v1790_v19, %v1786_v15  ;;  %v2158_v31 = vrot.slane %v2156_v21, 4  ;;  %v4047_v16 = vld [vmem:[%s5025_s12 + $0x28] sm:$0xf] }
  0x8b   : > { %4550 = vmatpush3.bf16.msra.mxu1 %v4769_v63  ;;  %4469 = vmatprep.mubr.bf16.mxu0 %v3919_v50  ;;  %v1763_v63 = vsel %vm5048_vm2, %v1758_v55, %v1762_v39  ;;  %v1808_v32 = vshll.u32 %v3897_v17, 16  ;;  %v1804_v36 = vrot.slane %v1802_v27, 5  ;;  %v1812_v38 = vshrl.u32 %v3897_v17, 16  ;;  %v4048_v17 = vld [vmem:[%s5025_s12 + $0x2c] sm:$0x1]  ;;  %v4777_v27 = vld [vmem:[%s5025_s12 + $0x24] sm:$0xff]  }
  0x8c   : > { %4551 = vmatprep.subr.bf16.mxu1 %v4771_v30  ;;  %v3920_v7 = vcombine.low %v1763_v63, %v1773_v0  ;;  %v1777_v9 = vrot.slane %v1775_v62, 4  ;;  %v1780_v14 = vrot.slane %v1778_v3, 5  ;;  %4502 = vmatmul.mubr.bf16.gmra.mxu1 %v3984_v13  ;;  %v1792_v39 = vrot.slane %v1791_v29, 4  ;;  %v4044_v63 = vld [vmem:[%s5025_s12 + $0x1c] sm:$0xf] }
  0x8d   : > { %4520 = vmatpush3.bf16.msra.mxu0 %v4770_v25  ;;  %v2160_v40 = vsel %vm5154_vm5, %v2158_v31, %v2159_v22  ;;  %v1810_v41 = vrot.slane %v1808_v32, 5  ;;  %v1818_v42 = vshll.u32 %v3898_v23, 16  ;;  %v1814_v47 = vrot.slane %v1812_v38, 4  ;;  %v4045_v0 = vld [vmem:[%s5025_s12 + $0x20] sm:$0x1] }
  0x8e   : > { %4521 = vmatprep.subr.bf16.mxu0 %v4772_v35  ;;  %4470 = vmatmul.mubr.bf16.gmra.mxu0 %v3920_v7  ;;  %v1781_v25 = vor.u32 %v1780_v14, %v1777_v9  ;;  %v1797_v48 = vsel %vm5048_vm2, %v1792_v39, %v1796_v2  ;;  %v3962_v50 = vrot.slane %v3952_v28, 9  ;;  %v2163_v51 = vrot.slane %v3953_v33, 5  ;;  %v4046_v13 = vld [vmem:[%s5025_s12 + $0x24] sm:$0xf] }
  0x8f   : > { %4552 = vmatpush3.bf16.msra.mxu1 %v4771_v30  ;;  %v2157_v30 = vsel %vm5154_vm5, %v3961_v20, %v2156_v21  ;;  %v1820_v49 = vrot.slane %v1818_v42, 5  ;;  %v2166_v55 = vrot.slane %v3954_v24, 5  ;;  %v2710_v3 = vshrl.u32 %v4043_v61, 16  ;;  %v4780_v24 = vld [vmem:[%s5025_s12 + $0x30] sm:$0xff]  }
  0x90   : > { %4553 = vmatprep.subr.bf16.mxu1 %v5402_v45  ;;  %v1782_v34 = vrot.slane %v1781_v25, 4  ;;  %v3985_v44 = vcombine.low %v2157_v30, %v2160_v40  ;;  %v2164_v56 = vsel %vm5154_vm5, %v3962_v50, %v2163_v51  ;;  %v2165_v57 = vrot.slane %v2163_v51, 4  ;;  %v4050_v40 = vld [vmem:[%s5025_s12 + $0x34] sm:$0xf] }
  0x91   : > { %4522 = vmatpush3.bf16.msra.mxu0 %v4772_v35  ;;  %v1801_v35 = vrot.slane %v1799_v26, 4  ;;  %v2713_v4 = vshll.u32 %v4043_v61, 16  ;;  %v2719_v7 = vshll.u32 %v4044_v63, 16  ;;  %v2723_v8 = vshrl.u32 %v4044_v63, 16  ;;  %v4054_v63 = vld [vmem:[%s5025_s12 + $0x44] sm:$0x1] }
  0x92   : > { %4523 = vmatprep.subr.bf16.mxu0 %v4774_v54  ;;  %v1787_v43 = vsel %vm5048_vm2, %v1782_v34, %v1786_v15  ;;  %4505 = vmatprep.mubr.bf16.mxu1 %v3985_v44  ;;  %v2167_v62 = vsel %vm5154_vm5, %v2165_v57, %v2166_v55  ;;  %v2712_v10 = vrot.slane %v2710_v3, 4  ;;  %v2729_v12 = vshll.u32 %v4045_v0, 16  ;;  %v4052_v57 = vld [vmem:[%s5025_s12 + $0x3c] sm:$0xf] }
  0x93   : > { %4554 = vmatpush3.bf16.msra.mxu1 %v5402_v45  ;;  %v1805_v46 = vor.u32 %v1804_v36, %v1801_v35  ;;  %v5443_v45 = vld [vmem:[%s5904_s1 + $0x238] sm:$0xff]   ;;  %v3921_v52 = vcombine.low %v1787_v43, %v1797_v48  ;;  %v3986_v6 = vcombine.low %v2164_v56, %v2167_v62  ;;  %v2715_v11 = vrot.slane %v2713_v4, 5  ;;  %v4049_v36 = vld [vmem:[%s5025_s12 + $0x30] sm:$0xf] }
  0x94   : > { %4555 = vmatprep.subr.bf16.mxu1 %v4775_v18  ;;  %v2721_v14 = vrot.slane %v2719_v7, 5  ;;  %v2725_v15 = vrot.slane %v2723_v8, 4  ;;  %v2731_v19 = vrot.slane %v2729_v12, 5  ;;  %v2734_v20 = vshrl.u32 %v4046_v13, 16  ;;  %v4781_v12 = vld [vmem:[%s5025_s12 + $0x3c] sm:$0xff]  }
  0x95   : > { %4524 = vmatpush3.bf16.msra.mxu0 %v4774_v54  ;;  %v1806_v53 = vrot.slane %v1805_v46, 4  ;;  %v1815_v54 = vor.u32 %v1814_v47, %v1810_v41  ;;  %4473 = vmatprep.mubr.bf16.mxu0 %v3921_v52  ;;  %v2737_v21 = vshll.u32 %v4046_v13, 16  ;;  %v2743_v23 = vshll.u32 %v4047_v16, 16  ;;  %v4779_v47 = vld [vmem:[%s5904_s1 + $0x230] sm:$0xff]  }
  0x96   : > { %4573 = vmatprep.subr.bf16.mxu0 %v5443_v45  ;;  %4506 = vmatmul.mubr.bf16.gmra.mxu1 %v3986_v6  ;;  %v2726_v22 = vor.u32 %v2725_v15, %v2721_v14  ;;  %v2747_v25 = vshrl.u32 %v4047_v16, 16  ;;  %v2753_v2 = vshll.u32 %v4048_v17, 16  ;;  %v2736_v28 = vrot.slane %v2734_v20, 4  ;;  %v4055_v20 = vld [vmem:[%s5025_s12 + $0x48] sm:$0xf] }
  0x97   : > { %4556 = vmatpush3.bf16.msra.mxu1 %v4775_v18  ;;  %v1811_v58 = vsel %vm5048_vm2, %v1806_v53, %v1810_v41  ;;  %v1816_v59 = vrot.slane %v1815_v54, 4  ;;  %v2716_v18 = vor.u32 %v2715_v11, %v2712_v10  ;;  %v2739_v29 = vrot.slane %v2737_v21, 5  ;;  %v4051_v41 = vld [vmem:[%s5025_s12 + $0x38] sm:$0x1] }
  0x98   : > { %4605 = vmatprep.subr.bf16.mxu1 %v5443_v45  ;;  %v2727_v30 = vrot.slane %v2726_v22, 4  ;;  %v2745_v31 = vrot.slane %v2743_v23, 5  ;;  %v2749_v32 = vrot.slane %v2747_v25, 4  ;;  %v2755_v33 = vrot.slane %v2753_v2, 5  ;;  %v4057_v23 = vld [vmem:[%s5025_s12 + $0x50] sm:$0x1] }
  0x99   : > { %v1821_v5 = vsel %vm5048_vm2, %v1816_v59, %v1820_v49  ;;  %v2717_v26 = vrot.slane %v2716_v18, 4  ;;  %v2740_v35 = vor.u32 %v2739_v29, %v2736_v28  ;;  %v2758_v42 = vshrl.u32 %v4049_v36, 16  ;;  %v5483_v59 = vld [vmem:[%s5904_s1 + $0x228] sm:$0xff]   ;;  %v5496_v18 = vld [vmem:[%s5904_s1 + $0x220] sm:$0xff]  }
  0x9a   : > { %v3922_v9 = vcombine.low %v1811_v58, %v1821_v5  ;;  %v2732_v38 = vsel %vm5048_vm2, %v2727_v30, %v2731_v19  ;;  %v2750_v39 = vor.u32 %v2749_v32, %v2745_v31  ;;  %v2761_v43 = vshll.u32 %v4049_v36, 16  ;;  %v4053_v58 = vld [vmem:[%s5025_s12 + $0x40] sm:$0xf]  ;;  %v4784_v19 = vld [vmem:[%s5025_s12 + $0x48] sm:$0xff]  }
  0x9b   : > { %v2722_v34 = vsel %vm5048_vm2, %v2717_v26, %v2721_v14  ;;  %v2741_v46 = vrot.slane %v2740_v35, 4  ;;  %v2767_v48 = vshll.u32 %v4050_v40, 16  ;;  %v2771_v49 = vshrl.u32 %v4050_v40, 16 }
  0x9c   : > { %4474 = vmatmul.mubr.bf16.gmra.mxu0 %v3922_v9  ;;  %v4083_v44 = vcombine.low %v2722_v34, %v2732_v38  ;;  %v2751_v50 = vrot.slane %v2750_v39, 4  ;;  %v2760_v51 = vrot.slane %v2758_v42, 4  ;;  %v2763_v52 = vrot.slane %v2761_v43, 5  ;;  %v4059_v38 = vld [vmem:[%s5025_s12 + $0x58] sm:$0xf] }
  0x9d   : > { %4525 = vmatprep.mubr.bf16.mxu0 %v4776_v60  ;;  %v2777_v53 = vshll.u32 %v4051_v41, 16  ;;  %v2746_v54 = vsel %vm5048_vm2, %v2741_v46, %v2745_v31  ;;  %v2769_v55 = vrot.slane %v2767_v48, 5  ;;  %v2773_v56 = vrot.slane %v2771_v49, 4  ;;  %v4785_v43 = vld [vmem:[%s5025_s12 + $0x54] sm:$0xff]  }
  0x9e   : > { %4557 = vmatprep.mubr.bf16.mxu1 %v4083_v44  ;;  %v2756_v60 = vsel %vm5048_vm2, %v2751_v50, %v2755_v33  ;;  %v2764_v61 = vor.u32 %v2763_v52, %v2760_v51  ;;  %v2782_v0 = vshrl.u32 %v4052_v57, 16  ;;  %v2785_v5 = vshll.u32 %v4052_v57, 16  ;;  %v4060_v44 = vld [vmem:[%s5025_s12 + $0x5c] sm:$0x1] }
  0x9f   : > { %v2779_v62 = vrot.slane %v2777_v53, 5  ;;  %v4084_v3 = vcombine.low %v2746_v54, %v2756_v60  ;;  %v2774_v4 = vor.u32 %v2773_v56, %v2769_v55  ;;  %v2791_v6 = vshll.u32 %v4053_v58, 16  ;;  %v4788_v60 = vld [vmem:[%s5025_s12 + $0x60] sm:$0xff]  }
  0xa0   : > { %v2765_v7 = vrot.slane %v2764_v61, 4  ;;  %v2784_v8 = vrot.slane %v2782_v0, 4  ;;  %v2795_v9 = vshrl.u32 %v4053_v58, 16  ;;  %v2801_v10 = vshll.u32 %v4054_v63, 16  ;;  %v5527_v0 = vld [vmem:[%s5904_s1 + $0x210] sm:$0xff]  }
  0xa1   : > { %4558 = vmatmul.mubr.bf16.vlgmr.msra.gmra.mxu1 %v4084_v3  ;;  %v2775_v11 = vrot.slane %v2774_v4, 4  ;;  %v2787_v13 = vrot.slane %v2785_v5, 5  ;;  %v2793_v14 = vrot.slane %v2791_v6, 5  ;;  %v2806_v25 = vshrl.u32 %v4055_v20, 16  ;;  %v4061_v3 = vld [vmem:[%s5025_s12 + $0x60] sm:$0xf] }
  0xa2   : > { %4613 = vmatpush3.bf16.msra.mxu1 %v5443_v45  ;;  %v2770_v15 = vsel %vm5048_vm2, %v2765_v7, %v2769_v55  ;;  %v2797_v16 = vrot.slane %v2795_v9, 4  ;;  %v2803_v17 = vrot.slane %v2801_v10, 5  ;;  %v2809_v2 = vshll.u32 %v4055_v20, 16  ;;  %v4786_v55 = vld [vmem:[%s5904_s1 + $0x218] sm:$0xff]   ;;  %v4062_v5 = vld [vmem:[%s5025_s12 + $0x64] sm:$0xf] }
  0xa3   : > { %4606 = vmatprep.subr.bf16.mxu1 %v4779_v47  ;;  %v2780_v21 = vsel %vm5048_vm2, %v2775_v11, %v2779_v62  ;;  %v2788_v22 = vor.u32 %v2787_v13, %v2784_v8  ;;  %v2808_v31 = vrot.slane %v2806_v25, 4  ;;  %v2825_v33 = vshll.u32 %v4057_v23, 16  ;;  %v4063_v6 = vld [vmem:[%s5025_s12 + $0x68] sm:$0x1] }
  0xa4   : > { %4526 = vmatmul.mubr.bf16.vlgmr.msra.gmra.mxu0 %v4777_v27  ;;  %v4085_v26 = vcombine.low %v2770_v15, %v2780_v21  ;;  %v2798_v27 = vor.u32 %v2797_v16, %v2793_v14  ;;  %v2811_v32 = vrot.slane %v2809_v2, 5  ;;  %v2839_v50 = vshll.u32 %v4059_v38, 16  ;;  %v4064_v16 = vld [vmem:[%s5025_s12 + $0x6c] sm:$0xf] }
  0xa5   : > { %4574 = vmatpush3.bf16.msra.mxu0 %v5443_v45  ;;  %4529 = vmatprep.mubr.bf16.mxu0 %v4780_v24  ;;  %v4056_v45 = vld [vmem:[%s5025_s12 + $0x4c] sm:$0xf]  ;;  %v2789_v30 = vrot.slane %v2788_v22, 4  ;;  %v4058_v24 = vld [vmem:[%s5025_s12 + $0x54] sm:$0xf]  ;;  %v2827_v42 = vrot.slane %v2825_v33, 5 }
  0xa6   : > { %4575 = vmatprep.subr.bf16.mxu0 %v4779_v47  ;;  %v2815_v28 = vshll.u32 %v4056_v45, 16  ;;  %v2819_v29 = vshrl.u32 %v4056_v45, 16  ;;  %4614 = vmatpush3.bf16.msra.mxu1 %v4779_v47  ;;  %v2799_v34 = vrot.slane %v2798_v27, 4  ;;  %v2830_v39 = vshrl.u32 %v4058_v24, 16  ;;  %v4789_v21 = vld [vmem:[%s5025_s12 + $0x6c] sm:$0xff]  }
  0xa7   : > { %4561 = vmatprep.mubr.bf16.mxu1 %v4085_v26  ;;  %v2794_v40 = vsel %vm5048_vm2, %v2789_v30, %v2793_v14  ;;  %4607 = vmatprep.subr.bf16.mxu1 %v5483_v59  ;;  %v2812_v41 = vor.u32 %v2811_v32, %v2808_v31  ;;  %v2833_v46 = vshll.u32 %v4058_v24, 16  ;;  %v2843_v54 = vshrl.u32 %v4059_v38, 16  ;;  %v4065_v22 = vld [vmem:[%s5025_s12 + $0x70] sm:$0xf]  ;;  %v4066_v45 = vld [vmem:[%s5025_s12 + $0x74] sm:$0x1] }
  0xa8   : > { %v2817_v35 = vrot.slane %v2815_v28, 5  ;;  %v2821_v36 = vrot.slane %v2819_v29, 4  ;;  %v2832_v49 = vrot.slane %v2830_v39, 4  ;;  %v2841_v57 = vrot.slane %v2839_v50, 5  ;;  %v5554_v39 = vld [vmem:[%s5904_s1 + $0x200] sm:$0xff]  }
  0xa9   : > { %4576 = vmatpush3.bf16.msra.mxu0 %v4779_v47  ;;  %v2804_v47 = vsel %vm5048_vm2, %v2799_v34, %v2803_v17  ;;  %v2813_v52 = vrot.slane %v2812_v41, 4  ;;  %v2835_v53 = vrot.slane %v2833_v46, 5  ;;  %v2849_v58 = vshll.u32 %v4060_v44, 16  ;;  %v4101_v44 = vld [vmem:[%s5025_s12 + $0x20] sm:$0x1] }
  0xaa   : > { %4577 = vmatprep.subr.bf16.mxu0 %v5483_v59  ;;  %v2822_v48 = vor.u32 %v2821_v36, %v2817_v35  ;;  %v4086_v51 = vcombine.low %v2794_v40, %v2804_v47  ;;  %4615 = vmatpush3.bf16.msra.mxu1 %v5483_v59  ;;  %v2845_v63 = vrot.slane %v2843_v54, 4  ;;  %v2854_v7 = vshrl.u32 %v4061_v3, 16  ;;  %v4099_v40 = vld [vmem:[%s5025_s12 + $0x18] sm:$0xe]  ;;  %v4111_v50 = vld [vmem:[%s5025_s12 + $0x48] sm:$0xe] }
  0xab   : > { %4608 = vmatprep.subr.bf16.mxu1 %v5496_v18  ;;  %v2818_v61 = vsel %vm5048_vm2, %v2813_v52, %v2817_v35  ;;  %v2836_v62 = vor.u32 %v2835_v53, %v2832_v49  ;;  %v2851_v4 = vrot.slane %v2849_v58, 5  ;;  %v2857_v11 = vshll.u32 %v4061_v3, 16 }
  0xac   : > { %4530 = vmatmul.mubr.bf16.gmra.mxu0 %v4781_v12  ;;  %v2823_v56 = vrot.slane %v2822_v48, 4  ;;  %4562 = vmatmul.mubr.bf16.gmra.mxu1 %v4086_v51  ;;  %v2846_v10 = vor.u32 %v2845_v63, %v2841_v57  ;;  %v2856_v12 = vrot.slane %v2854_v7, 4  ;;  %v2863_v13 = vshll.u32 %v4062_v5, 16  ;;  %v4112_v51 = vld [vmem:[%s5025_s12 + $0x4c] sm:$0xf] }
  0xad   : > { %4578 = vmatpush3.bf16.msra.mxu0 %v5483_v59  ;;  %4533 = vmatprep.mubr.bf16.mxu0 %v4784_v19  ;;  %v2837_v9 = vrot.slane %v2836_v62, 4  ;;  %v2867_v14 = vshrl.u32 %v4062_v5, 16  ;;  %v2873_v15 = vshll.u32 %v4063_v6, 16  ;;  %v2859_v20 = vrot.slane %v2857_v11, 5  ;;  %v4103_v63 = vld [vmem:[%s5025_s12 + $0x28] sm:$0xf] }
  0xae   : > { %4579 = vmatprep.subr.bf16.mxu0 %v5496_v18  ;;  %v2828_v59 = vsel %vm5048_vm2, %v2823_v56, %v2827_v42  ;;  %4616 = vmatpush3.bf16.msra.mxu1 %v5496_v18  ;;  %v2847_v19 = vrot.slane %v2846_v10, 4  ;;  %v2865_v23 = vrot.slane %v2863_v13, 5  ;;  %v2878_v26 = vshrl.u32 %v4064_v16, 16  ;;  %v4113_v56 = vld [vmem:[%s5025_s12 + $0x50] sm:$0x1] }
  0xaf   : > { %v4087_v8 = vcombine.low %v2818_v61, %v2828_v59  ;;  %v2842_v17 = vsel %vm5048_vm2, %v2837_v9, %v2841_v57  ;;  %4609 = vmatprep.subr.bf16.mxu1 %v4786_v55  ;;  %v2869_v25 = vrot.slane %v2867_v14, 4  ;;  %v2875_v2 = vrot.slane %v2873_v15, 5  ;;  %v4102_v57 = vld [vmem:[%s5025_s12 + $0x24] sm:$0xe]  ;;  %v4104_v5 = vld [vmem:[%s5025_s12 + $0x2c] sm:$0x1] }
  0xb0   : > { %v2852_v27 = vsel %vm5048_vm2, %v2847_v19, %v2851_v4  ;;  %v2860_v28 = vor.u32 %v2859_v20, %v2856_v12  ;;  %v2881_v29 = vshll.u32 %v4064_v16, 16  ;;  %v2887_v30 = vshll.u32 %v4065_v22, 16  ;;  %v4114_v10 = vld [vmem:[%s5025_s12 + $0x54] sm:$0xe]  ;;  %v4115_v11 = vld [vmem:[%s5025_s12 + $0x58] sm:$0xf] }
  0xb1   : > { %4580 = vmatpush3.bf16.msra.mxu0 %v5496_v18  ;;  %4565 = vmatprep.mubr.bf16.mxu1 %v4087_v8  ;;  %v5545_v18 = vld [vmem:[%s5904_s1 + $0x208] sm:$0xff]   ;;  %v4088_v31 = vcombine.low %v2842_v17, %v2852_v27  ;;  %v2870_v32 = vor.u32 %v2869_v25, %v2865_v23  ;;  %v2880_v33 = vrot.slane %v2878_v26, 4  ;;  %v2891_v24 = vshrl.u32 %v4065_v22, 16  ;;  %v4116_v16 = vld [vmem:[%s5025_s12 + $0x5c] sm:$0x1] }
  0xb2   : > { %4581 = vmatprep.subr.bf16.mxu0 %v4786_v55  ;;  %4617 = vmatpush3.bf16.msra.mxu1 %v4786_v55  ;;  %v2861_v34 = vrot.slane %v2860_v28, 4  ;;  %v2883_v35 = vrot.slane %v2881_v29, 5  ;;  %v2889_v36 = vrot.slane %v2887_v30, 5  ;;  %v2897_v38 = vshll.u32 %v4066_v45, 16  ;;  %v4105_v17 = vld [vmem:[%s5025_s12 + $0x30] sm:$0xe] }
  0xb3   : > { %4610 = vmatprep.subr.bf16.mxu1 %v5527_v0  ;;  %v2871_v41 = vrot.slane %v2870_v32, 4  ;;  %v2893_v42 = vrot.slane %v2891_v24, 4  ;;  %v4123_v49 = vrot.slane %v4099_v40, 9  ;;  %v4127_v61 = vrot.slane %v4111_v50, 9  ;;  %v4106_v22 = vld [vmem:[%s5025_s12 + $0x34] sm:$0xf] }
  0xb4   : > { %4534 = vmatmul.mubr.bf16.gmra.mxu0 %v4785_v43  ;;  %4566 = vmatmul.mubr.bf16.gmra.mxu1 %v4088_v31  ;;  %v4100_v43 = vld [vmem:[%s5025_s12 + $0x1c] sm:$0xf]  ;;  %v2866_v46 = vsel %vm5048_vm2, %v2861_v34, %v2865_v23  ;;  %v2884_v47 = vor.u32 %v2883_v35, %v2880_v33  ;;  %v2899_v48 = vrot.slane %v2897_v38, 5  ;;  %v3221_v62 = vrot.slane %v4112_v51, 5  ;;  %v4107_v45 = vld [vmem:[%s5025_s12 + $0x38] sm:$0x1] }
  0xb5   : > { %4537 = vmatprep.mubr.bf16.mxu0 %v4788_v60  ;;  %4582 = vmatpush3.bf16.msra.mxu0 %v4786_v55  ;;  %v2876_v52 = vsel %vm5048_vm2, %v2871_v41, %v2875_v2  ;;  %v2894_v53 = vor.u32 %v2893_v42, %v2889_v36  ;;  %v3193_v54 = vrot.slane %v4100_v43, 5  ;;  %v3196_v55 = vrot.slane %v4101_v44, 5  ;;  %v4117_v26 = vld [vmem:[%s5025_s12 + $0x60] sm:$0xe]  ;;  %v4118_v27 = vld [vmem:[%s5025_s12 + $0x64] sm:$0xf] }
  0xb6   : > { %4583 = vmatprep.subr.bf16.mxu0 %v5527_v0  ;;  %4618 = vmatpush3.bf16.msra.mxu1 %v5527_v0  ;;  %v4089_v58 = vcombine.low %v2866_v46, %v2876_v52  ;;  %v2885_v60 = vrot.slane %v2884_v47, 4  ;;  %v3224_v4 = vrot.slane %v4113_v56, 5  ;;  %v3222_v7 = vsel %vm5154_vm5, %v4127_v61, %v3221_v62  ;;  %v4119_v32 = vld [vmem:[%s5025_s12 + $0x68] sm:$0x1]  ;;  %v4109_v38 = vld [vmem:[%s5025_s12 + $0x40] sm:$0xf] }
  0xb7   : > { %4611 = vmatprep.subr.bf16.mxu1 %v5545_v18  ;;  %v2895_v3 = vrot.slane %v2894_v53, 4  ;;  %v3195_v59 = vrot.slane %v3193_v54, 4  ;;  %v3223_v8 = vrot.slane %v3221_v62, 4  ;;  %v4124_v9 = vrot.slane %v4102_v57, 9  ;;  %v4120_v44 = vld [vmem:[%s5025_s12 + $0x6c] sm:$0xe] }
  0xb8   : > { %4569 = vmatprep.mubr.bf16.mxu1 %v4089_v58  ;;  %v2890_v6 = vsel %vm5048_vm2, %v2885_v60, %v2889_v36  ;;  %v3200_v14 = vrot.slane %v4103_v63, 5  ;;  %v3203_v15 = vrot.slane %v4104_v5, 5  ;;  %v4128_v37 = vrot.slane %v4114_v10, 9  ;;  %v4108_v36 = vld [vmem:[%s5025_s12 + $0x3c] sm:$0xe] }
  0xb9   : > { %4584 = vmatpush3.bf16.msra.mxu0 %v5527_v0  ;;  %v3194_v0 = vsel %vm5154_vm5, %v4123_v49, %v3193_v54  ;;  %v2900_v12 = vsel %vm5048_vm2, %v2895_v3, %v2899_v48  ;;  %v3197_v13 = vsel %vm5154_vm5, %v3195_v59, %v3196_v55  ;;  %v3228_v2 = vrot.slane %v4115_v11, 5  ;;  %v4121_v50 = vld [vmem:[%s5025_s12 + $0x70] sm:$0xf]  ;;  %v4122_v55 = vld [vmem:[%s5025_s12 + $0x74] sm:$0x1] }
  0xba   : > { %4585 = vmatprep.subr.bf16.mxu0 %v5545_v18  ;;  %4619 = vmatpush3.bf16.msra.mxu1 %v5545_v18  ;;  %v4090_v19 = vcombine.low %v2890_v6, %v2900_v12  ;;  %v4147_v20 = vcombine.low %v3194_v0, %v3197_v13  ;;  %v3201_v23 = vsel %vm5154_vm5, %v4124_v9, %v3200_v14  ;;  %v3202_v25 = vrot.slane %v3200_v14, 4 }
  0xbb   : > { %4612 = vmatprep.subr.bf16.mxu1 %v5554_v39  ;;  %v3231_v28 = vrot.slane %v4116_v16, 5  ;;  %v4125_v29 = vrot.slane %v4105_v17, 9  ;;  %v3207_v30 = vrot.slane %v4106_v22, 5  ;;  %v3210_v31 = vrot.slane %v4107_v45, 5 }
  0xbc   : > { %4538 = vmatmul.mubr.bf16.gmra.mxu0 %v4789_v21  ;;  %v3225_v21 = vsel %vm5154_vm5, %v3223_v8, %v3224_v4  ;;  %4570 = vmatmul.mubr.bf16.gmra.mxu1 %v4090_v19  ;;  %v3204_v33 = vsel %vm5154_vm5, %v3202_v25, %v3203_v15  ;;  %v3229_v24 = vsel %vm5154_vm5, %v4128_v37, %v3228_v2  ;;  %v3230_v34 = vrot.slane %v3228_v2, 4 }
  0xbd   : > { %4586 = vmatpush3.bf16.msra.mxu0 %v5545_v18  ;;  %v4151_v18 = vcombine.low %v3222_v7, %v3225_v21  ;;  %4589 = vmatprep.mubr.bf16.mxu0 %v4147_v20  ;;  %v4129_v35 = vrot.slane %v4117_v26, 9  ;;  %v4148_v40 = vcombine.low %v3201_v23, %v3204_v33  ;;  %v3208_v41 = vsel %vm5154_vm5, %v4125_v29, %v3207_v30 }
  0xbe   : > { %4587 = vmatprep.subr.bf16.mxu0 %v5554_v39  ;;  %4620 = vmatpush3.bf16.msra.mxu1 %v5554_v39  ;;  %v3209_v42 = vrot.slane %v3207_v30, 4  ;;  %v3235_v43 = vrot.slane %v4118_v27, 5  ;;  %v3232_v46 = vsel %vm5154_vm5, %v3230_v34, %v3231_v28  ;;  %v3238_v47 = vrot.slane %v4119_v32, 5 }
  0xbf   : > { %4597 = vmatprep.mubr.bf16.mxu1 %v4151_v18  ;;  %v4126_v48 = vrot.slane %v4108_v36, 9  ;;  %v3214_v49 = vrot.slane %v4109_v38, 5  ;;  %v4152_v51 = vcombine.low %v3229_v24, %v3232_v46  ;;  %v4130_v62 = vrot.slane %v4120_v44, 9 }
  0xc0   : > { %v3211_v52 = vsel %vm5154_vm5, %v3209_v42, %v3210_v31  ;;  %v3236_v53 = vsel %vm5154_vm5, %v4129_v35, %v3235_v43  ;;  %v3237_v54 = vrot.slane %v3235_v43, 4  ;;  %v3242_v63 = vrot.slane %v4121_v50, 5 }
  0xc1   : > { %4588 = vmatpush3.bf16.msra.mxu0 %v5554_v39  ;;  %v4110_v39 = vld [vmem:[%s5025_s12 + $0x44] sm:$0x1]  ;;  %v4149_v56 = vcombine.low %v3208_v41, %v3211_v52  ;;  %v3215_v57 = vsel %vm5154_vm5, %v4126_v48, %v3214_v49  ;;  %v3216_v58 = vrot.slane %v3214_v49, 4  ;;  %v3245_v3 = vrot.slane %v4122_v55, 5  ;;  %s256_s12 = sand.u32 1, %s4860_s16  }
  0xc2   : > { %v3217_v60 = vrot.slane %v4110_v39, 5  ;;  %v3239_v61 = vsel %vm5154_vm5, %v3237_v54, %v3238_v47  ;;  %v3244_v5 = vrot.slane %v3242_v63, 4  ;;  %v3243_v6 = vsel %vm5154_vm5, %v4130_v62, %v3242_v63  ;;  %s3737_s27 = sshll.u32 %s256_s12, 7  ;;  %s5852_s24 = scalar_lea.sflag [#allocation4], %s256_s12 }
  0xc3   : > { %v4153_v0 = vcombine.low %v3236_v53, %v3239_v61  ;;  %s5794_s8 = scalar_lea.vmem [#allocation3], %s3737_s27  ;;  %s4798_s27 = scalar_lea.vmem %s4797_s5, 4096 }
  0xc4   : > { %4590 = vmatmul.mubr.bf16.vlgmr.msra.gmra.mxu0 %v4148_v40  ;;  %v3218_v59 = vsel %vm5154_vm5, %v3216_v58, %v3217_v60  ;;  %4598 = vmatmul.mubr.bf16.vlgmr.msra.gmra.mxu1 %v4152_v51  ;;  %v3246_v7 = vsel %vm5154_vm5, %v3244_v5, %v3245_v3  ;;  %s3601_s10 = sshll.u32 %s5794_s8, 4  ;;  %s5846_s10 = int_to_ptr.vmem [resolvable:$true] %s3601_s10 }
  0xc5   : > { %4593 = vmatprep.mubr.bf16.mxu0 %v4149_v56  ;;  %v4150_v4 = vcombine.low %v3215_v57, %v3218_v59  ;;  %4601 = vmatprep.mubr.bf16.mxu1 %v4153_v0  ;;  %v4154_v8 = vcombine.low %v3243_v6, %v3246_v7  ;;  %s4792_s30 = scalar_lea.vmem %s5846_s10, 2048  ;;  %p4799_p4 = scmp.lt.s32.totalorder %s5846_s10, %s4797_s5 }
  0xc6   : > { %p4793_p0 = scmp.ne.s32.totalorder %s5846_s10, %s4792_s30  ;;  %p4800_p5 = scmp.lt.s32.totalorder %s4798_s27, %s4792_s30 }
  0xc8   : > { %p4794_p1 = pnand %p4793_p0, %p4965_p3  ;;  %p4801_p6 = por %p4800_p5, %p4799_p4 }
  0xca   : > { %p4795_p2 = pneg %p4794_p1 }
  0xcc   : > { %4594 = vmatmul.mubr.bf16.gmra.mxu0 %v4150_v4  ;;  %4602 = vmatmul.mubr.bf16.gmra.mxu1 %v4154_v8  ;;  %p4802_p7 = pnand %p4801_p6, %p4795_p2 }
  0xf7   : > { %v4335_v9 = vpop.f32.mrf.mxu0 }
  0xf8   : > { %v4367_v10 = vpop.f32.mrf.mxu1 }
  0xf9   : > { %v952_v11 = vadd.f32 %v4367_v10, %v4335_v9  ;;  %v442_v12 = vpop.f32.mrf.mxu0 }
  0xfa   : > { %v871_v13 = vpop.f32.mrf.mxu1 }
  0xfb   : > { %v950_v14 = vadd.f32 %v871_v13, %v442_v12  ;;  %v4336_v15 = vpop.f32.mrf.mxu0 }
  0xfc   : > { %v4368_v16 = vpop.f32.mrf.mxu1 }
  0xfd   : > { %v953_v17 = vadd.f32 %v4368_v16, %v4336_v15  ;;  %v445_v19 = vpop.f32.mrf.mxu0 }
  0xfe   : > { %v874_v20 = vpop.f32.mrf.mxu1 }
  0xff   : > { %v951_v21 = vadd.f32 %v874_v20, %v445_v19  ;;  %v4339_v37 = vpop.f32.mrf.mxu0 }
 0x101   : > { %v458_v22 = vpop.f32.mrf.mxu0 }
 0x102   : > { %v4371_v45 = vpop.f32.mrf.mxu1 }
 0x103   : > { %v956_v1 = vadd.f32 %v4371_v45, %v4339_v37  ;;  %v4340_v18 = vpop.f32.mrf.mxu0 }
 0x104   : > { %v887_v23 = vpop.f32.mrf.mxu1 }
 0x105   : > { %v954_v25 = vadd.f32 %v887_v23, %v458_v22  ;;  %v461_v2 = vpop.f32.mrf.mxu0 }
 0x106   : > { %v4372_v26 = vpop.f32.mrf.mxu1 }
 0x107   : > { %v957_v27 = vadd.f32 %v4372_v26, %v4340_v18  ;;  %v4343_v28 = vpop.f32.mrf.mxu0 }
 0x108   : > { %v890_v29 = vpop.f32.mrf.mxu1 }
 0x109   : > { %v955_v30 = vadd.f32 %v890_v29, %v461_v2  ;;  %v474_v31 = vpop.f32.mrf.mxu0 }
 0x10a   : > { %v4375_v33 = vpop.f32.mrf.mxu1 }
 0x10b   : > { %v4344_v32 = vpop.f32.mrf.mxu0  ;;  %v960_v34 = vadd.f32 %v4375_v33, %v4343_v28 }
 0x10c   : > { %v903_v35 = vpop.f32.mrf.mxu1 }
 0x10d   : > { %v477_v24 = vpop.f32.mrf.mxu0  ;;  %v958_v38 = vadd.f32 %v903_v35, %v474_v31 }
 0x10e   : > { %v4376_v40 = vpop.f32.mrf.mxu1 }
 0x10f   : > { %v4347_v36 = vpop.f32.mrf.mxu0  ;;  %v961_v42 = vadd.f32 %v4376_v40, %v4344_v32 }
 0x110   : > { %v906_v43 = vpop.f32.mrf.mxu1 }
 0x111   : > { %v490_v41 = vpop.f32.mrf.mxu0  ;;  %v959_v39 = vadd.f32 %v906_v43, %v477_v24 }
 0x112   : > { %v4379_v46 = vpop.f32.mrf.mxu1 }
 0x113   : > { %v4348_v44 = vpop.f32.mrf.mxu0  ;;  %v964_v48 = vadd.f32 %v4379_v46, %v4347_v36 }
 0x114   : > { %v919_v49 = vpop.f32.mrf.mxu1 }
 0x115   : > { %v493_v47 = vpop.f32.mrf.mxu0  ;;  %v962_v50 = vadd.f32 %v919_v49, %v490_v41 }
 0x116   : > { %v4380_v51 = vpop.f32.mrf.mxu1 }
 0x117   : > { %v4399_v52 = vpop.f32.mrf.mxu0  ;;  %v965_v53 = vadd.f32 %v4380_v51, %v4348_v44 }
 0x118   : > { %v1301_v54 = vadd.f32 %v4399_v52, %v952_v11  ;;  %v922_v55 = vpop.f32.mrf.mxu1 }
 0x119   : > { %v1220_v56 = vpop.f32.mrf.mxu0  ;;  %v963_v57 = vadd.f32 %v922_v55, %v493_v47 }
 0x11a   : > { %v1299_v58 = vadd.f32 %v1220_v56, %v950_v14  ;;  %v4431_v60 = vpop.f32.mrf.mxu1 }
 0x11b   : > { %v4400_v61 = vpop.f32.mrf.mxu0  ;;  %v5630_v62 = vadd.f32 %v4431_v60, %v1301_v54 }
 0x11c   : > { %v1302_v63 = vadd.f32 %v4400_v61, %v953_v17  ;;  %v1495_v3 = vpop.f32.mrf.mxu1 }
 0x11d   : > { %v1223_v0 = vpop.f32.mrf.mxu0  ;;  %v5632_v59 = vadd.f32 %v1495_v3, %v1299_v58 }
 0x11e   : > { %v1300_v4 = vadd.f32 %v1223_v0, %v951_v21  ;;  %v4432_v5 = vpop.f32.mrf.mxu1 }
 0x11f   : > { %v5634_v6 = vadd.f32 %v4432_v5, %v1302_v63  ;;  %v4403_v7 = vpop.f32.mrf.mxu0 }
 0x120   : > { %v1498_v8 = vpop.f32.mrf.mxu1  ;;  %v1305_v9 = vadd.f32 %v4403_v7, %v956_v1 }
 0x121   : > { %v5636_v10 = vadd.f32 %v1498_v8, %v1300_v4  ;;  %v1236_v11 = vpop.f32.mrf.mxu0 }
 0x122   : > { %v4435_v12 = vpop.f32.mrf.mxu1  ;;  %v1303_v13 = vadd.f32 %v1236_v11, %v954_v25 }
 0x123   : > { %v5638_v14 = vadd.f32 %v4435_v12, %v1305_v9  ;;  %v4404_v15 = vpop.f32.mrf.mxu0 }
 0x124   : > { %v1511_v16 = vpop.f32.mrf.mxu1  ;;  %v1306_v17 = vadd.f32 %v4404_v15, %v957_v27 }
 0x125   : > { %v5640_v19 = vadd.f32 %v1511_v16, %v1303_v13  ;;  %v1239_v20 = vpop.f32.mrf.mxu0 }
 0x126   : > { %v4436_v21 = vpop.f32.mrf.mxu1  ;;  %v1304_v37 = vadd.f32 %v1239_v20, %v955_v30 }
 0x127   : > { %v5642_v22 = vadd.f32 %v4436_v21, %v1306_v17  ;;  %v4407_v18 = vpop.f32.mrf.mxu0 }
 0x128   : > { %v1514_v45 = vpop.f32.mrf.mxu1  ;;  %v1309_v23 = vadd.f32 %v4407_v18, %v960_v34 }
 0x129   : > { %v5644_v1 = vadd.f32 %v1514_v45, %v1304_v37  ;;  %v1252_v26 = vpop.f32.mrf.mxu0 }
 0x12a   : > { %v4439_v2 = vpop.f32.mrf.mxu1  ;;  %v1307_v28 = vadd.f32 %v1252_v26, %v958_v38 }
 0x12b   : > { %v5646_v25 = vadd.f32 %v4439_v2, %v1309_v23  ;;  %v4408_v31 = vpop.f32.mrf.mxu0 }
 0x12c   : > { %v1527_v29 = vpop.f32.mrf.mxu1  ;;  %v1310_v32 = vadd.f32 %v4408_v31, %v961_v42 }
 0x12d   : > { %v5648_v27 = vadd.f32 %v1527_v29, %v1307_v28  ;;  %v1255_v24 = vpop.f32.mrf.mxu0 }
 0x12e   : > { %v4440_v33 = vpop.f32.mrf.mxu1  ;;  %v1308_v35 = vadd.f32 %v1255_v24, %v959_v39 }
 0x12f   : > { %v5650_v30 = vadd.f32 %v4440_v33, %v1310_v32  ;;  %v4411_v41 = vpop.f32.mrf.mxu0 }
 0x130   : > { %v1530_v36 = vpop.f32.mrf.mxu1  ;;  %v1313_v34 = vadd.f32 %v4411_v41, %v964_v48 }
 0x131   : > { %v5652_v40 = vadd.f32 %v1530_v36, %v1308_v35  ;;  %v1268_v44 = vpop.f32.mrf.mxu0 }
 0x132   : > { %v4443_v43 = vpop.f32.mrf.mxu1  ;;  %v1311_v38 = vadd.f32 %v1268_v44, %v962_v50 }
 0x133   : > { %v5654_v46 = vadd.f32 %v4443_v43, %v1313_v34  ;;  %v4412_v49 = vpop.f32.mrf.mxu0 }
 0x134   : > { %v1543_v47 = vpop.f32.mrf.mxu1  ;;  %v1314_v42 = vadd.f32 %v4412_v49, %v965_v53 }
 0x135   : > { %v5656_v51 = vadd.f32 %v1543_v47, %v1311_v38  ;;  %v1271_v54 = vpop.f32.mrf.mxu0 }
 0x136   : > { %v4444_v52 = vpop.f32.mrf.mxu1  ;;  %v1312_v39 = vadd.f32 %v1271_v54, %v963_v57 }
 0x137   : > { %v5658_v55 = vadd.f32 %v4444_v52, %v1314_v42 }
 0x138   : > { %v1546_v56 = vpop.f32.mrf.mxu1  ;;  %v4463_v60 = vpop.f32.mrf.mxu0 }
 0x139   : > { %v5660_v58 = vadd.f32 %v1546_v56, %v1312_v39 }
 0x13a   : > { %v5662_v48 = vpop.f32.mrf.mxu1  ;;  %v1953_v61 = vpop.f32.mrf.mxu0 }
 0x13c   : > { %v5664_v63 = vpop.f32.mrf.mxu1  ;;  %v4464_v50 = vpop.f32.mrf.mxu0 }
 0x13e   : > { %v5666_v3 = vpop.f32.mrf.mxu1  ;;  %v1956_v0 = vpop.f32.mrf.mxu0 }
 0x140   : > { %v5668_v4 = vpop.f32.mrf.mxu1 }
 0x142   : > { %v5670_v5 = vpop.f32.mrf.mxu1 }
 0x144   : > { %v4467_v53 = vpop.f32.mrf.mxu0  ;;  %v5672_v57 = vpop.f32.mrf.mxu1 }
 0x146   : > { %v1969_v7 = vpop.f32.mrf.mxu0  ;;  %v5674_v9 = vpop.f32.mrf.mxu1 }
 0x148   : > { %v4468_v8 = vpop.f32.mrf.mxu0  ;;  %v5676_v12 = vpop.f32.mrf.mxu1 }
 0x14a   : > { %v1972_v11 = vpop.f32.mrf.mxu0 }
 0x14c   : > { %v5678_v15 = vpop.f32.mrf.mxu1 }
 0x14e   : > { %v4471_v13 = vpop.f32.mrf.mxu0  ;;  %v5680_v17 = vpop.f32.mrf.mxu1 }
 0x150   : > { %v1985_v16 = vpop.f32.mrf.mxu0  ;;  %v5682_v20 = vpop.f32.mrf.mxu1 }
 0x152   : > { %v4472_v21 = vpop.f32.mrf.mxu0  ;;  %v5684_v37 = vpop.f32.mrf.mxu1 }
 0x153   : > { %5914 = vst [vmem:[#allocation6_spill] sm:$0xff] %v5684_v37 }
 0x154   : > { %v1988_v45 = vpop.f32.mrf.mxu0 }
 0x156   : > { %v5686_v18 = vpop.f32.mrf.mxu1 }
 0x157   : > { %5915 = vst [vmem:[#allocation7_spill] sm:$0xff] %v5686_v18  ;;  %v2035_v18 = vadd.f32 %v4464_v50, %v5634_v6 }
 0x158   : > { %v5688_v2 = vpop.f32.mrf.mxu1 }
 0x159   : > { %5916 = vst [vmem:[#allocation8_spill] sm:$0xff] %v5688_v2  ;;  %v2032_v2 = vadd.f32 %v1953_v61, %v5632_v59  ;;  %v2381_v61 = vadd.f32 %v5666_v3, %v2035_v18 }
 0x15a   : > { %v5690_v29 = vpop.f32.mrf.mxu1 }
 0x15b   : > { %5917 = vst [vmem:[#allocation9_spill] sm:$0xff] %v5690_v29  ;;  %v2378_v6 = vadd.f32 %v5664_v63, %v2032_v2 }
 0x15c   : > { %v4475_v23 = vpop.f32.mrf.mxu0  ;;  %v5692_v32 = vpop.f32.mrf.mxu1 }
 0x15d   : > { %5918 = vst [vmem:[#allocation10_spill] sm:$0xff] %v5692_v32  ;;  %v2046_v63 = vadd.f32 %v4475_v23, %v5654_v46 }
 0x15e   : > { %v2001_v26 = vpop.f32.mrf.mxu0 }
 0x160   : > { %v4476_v28 = vpop.f32.mrf.mxu0 }
 0x161   : > { %v5694_v35 = vpop.f32.mrf.mxu1 }
 0x162   : > { %v2004_v31 = vpop.f32.mrf.mxu0  ;;  %5919 = vst [vmem:[#allocation11_spill] sm:$0xff] %v5694_v35 }
 0x163   : > { %v5696_v41 = vpop.f32.mrf.mxu1 }
 0x164   : > { %v4527_v33 = vpop.f32.mrf.mxu0  ;;  %5920 = vst [vmem:[#allocation12_spill] sm:$0xff] %v5696_v41 }
 0x165   : > { %v5698_v43 = vpop.f32.mrf.mxu1 }
 0x166   : > { %v2574_v24 = vpop.f32.mrf.mxu0  ;;  %5921 = vst [vmem:[#allocation13_spill] sm:$0xff] %v5698_v43 }
 0x167   : > { %v5700_v38 = vpop.f32.mrf.mxu1 }
 0x168   : > { %v4528_v36 = vpop.f32.mrf.mxu0  ;;  %5922 = vst [vmem:[#allocation14_spill] sm:$0xff] %v5700_v38  ;;  %v2034_v38 = vadd.f32 %v4463_v60, %v5630_v62 }
 0x16a   : > { %v2577_v34 = vpop.f32.mrf.mxu0  ;;  %v2380_v59 = vadd.f32 %v5662_v48, %v2034_v38  ;;  %v2041_v48 = vadd.f32 %v1988_v45, %v5652_v40 }
 0x16c   : > { %v4531_v44 = vpop.f32.mrf.mxu0  ;;  %v5702_v42 = vpop.f32.mrf.mxu1 }
 0x16d   : > { %5923 = vst [vmem:[#allocation15_spill] sm:$0xff] %v5702_v42 }
 0x16e   : > { %v2590_v47 = vpop.f32.mrf.mxu0  ;;  %v5704_v54 = vpop.f32.mrf.mxu1 }
 0x16f   : > { %5924 = vst [vmem:[#allocation16_spill] sm:$0xff] %v5704_v54  ;;  %v2033_v54 = vadd.f32 %v1956_v0, %v5636_v10  ;;  %v2042_v10 = vadd.f32 %v4471_v13, %v5646_v25  ;;  %v2044_v25 = vadd.f32 %v2001_v26, %v5656_v51  ;;  %v5930_v13 = vld [vmem:[#allocation6_spill] sm:$0xff] }
 0x170   : > { %v4532_v49 = vpop.f32.mrf.mxu0  ;;  %v5706_v56 = vpop.f32.mrf.mxu1 }
 0x171   : > { %5925 = vst [vmem:[#allocation17_spill] sm:$0xff] %v5706_v56  ;;  %v2038_v56 = vadd.f32 %v4467_v53, %v5638_v14  ;;  %v2040_v14 = vadd.f32 %v1985_v16, %v5648_v27  ;;  %v2655_v53 = vadd.f32 %v4527_v33, %v2380_v59  ;;  %v5931_v16 = vld [vmem:[#allocation7_spill] sm:$0xff] }
 0x172   : > { %v2593_v52 = vpop.f32.mrf.mxu0  ;;  %v5708_v35 = vpop.f32.mrf.mxu1 }
 0x173   : > { %5926 = vst [vmem:[#allocation18_spill] sm:$0xff] %v5708_v35  ;;  %v2036_v35 = vadd.f32 %v1969_v7, %v5640_v19  ;;  %v2379_v19 = vadd.f32 %v5668_v4, %v2033_v54  ;;  %v2384_v50 = vadd.f32 %v5670_v5, %v2038_v56  ;;  %v2047_v4 = vadd.f32 %v4476_v28, %v5658_v55 }
 0x174   : > { %v4535_v39 = vpop.f32.mrf.mxu0  ;;  %v5714_v43 = vpop.f32.mrf.mxu1  ;;  %v2388_v5 = vadd.f32 %v5678_v15, %v2042_v10  ;;  %v2045_v7 = vadd.f32 %v2004_v31, %v5660_v58  ;;  %v2392_v55 = vadd.f32 %v5931_v16, %v2046_v63  ;;  %v5934_v58 = vld [vmem:[#allocation11_spill] sm:$0xff]  ;;  %v5936_v31 = vld [vmem:[#allocation12_spill] sm:$0xff] }
 0x175   : > { %5929 = vst [vmem:[#allocation21_spill] sm:$0xff] %v5714_v43  ;;  %v2037_v43 = vadd.f32 %v1972_v11, %v5644_v1  ;;  %v2382_v0 = vadd.f32 %v5672_v57, %v2036_v35  ;;  %v2653_v57 = vadd.f32 %v2574_v24, %v2378_v6  ;;  %v2656_v11 = vadd.f32 %v4528_v36, %v2381_v61  ;;  %v5939_v54 = vld [vmem:[#allocation15_spill] sm:$0xff] }
 0x176   : > { %v2606_v32 = vpop.f32.mrf.mxu0  ;;  %v5721_v37 = vpop.f32.mrf.mxu1  ;;  %v2654_v51 = vadd.f32 %v2577_v34, %v2379_v19  ;;  %v3113_v2 = vadd.f32 %v5934_v58, %v2655_v53  ;;  %v2663_v28 = vadd.f32 %v4535_v39, %v2388_v5  ;;  %v5940_v59 = vld [vmem:[#allocation16_spill] sm:$0xff] }
 0x177   : > { %v2383_v3 = vadd.f32 %v5676_v12, %v2037_v43  ;;  %v2387_v12 = vadd.f32 %v5930_v13, %v2041_v48  ;;  %v2657_v15 = vadd.f32 %v2590_v47, %v2382_v0  ;;  %v3111_v33 = vadd.f32 %v5936_v31, %v2653_v57  ;;  %v5762_v43 = vld [vmem:[%s5905_s2] ss:$0 sm:$0xff] }
 0x178   : > { %v5710_v41 = vpop.f32.mrf.mxu0  ;;  %v5728_v62 = vpop.f32.mrf.mxu1  ;;  %v5938_v47 = vld [vmem:[#allocation14_spill] sm:$0xff]  ;;  %v5943_v0 = vld [vmem:[#allocation17_spill] sm:$0xff] }
 0x179   : > { %5927 = vst [vmem:[#allocation19_spill] sm:$0xff] %v5710_v41  ;;  %v2658_v24 = vadd.f32 %v2593_v52, %v2383_v3  ;;  %v3115_v6 = vadd.f32 %v5940_v59, %v2657_v15 }
 0x17a   : > { %v5712_v29 = vpop.f32.mrf.mxu0  ;;  %v5738_v1 = vpop.f32.mrf.mxu1 }
 0x17b   : > { %5928 = vst [vmem:[#allocation20_spill] sm:$0xff] %v5712_v29  ;;  %v2039_v29 = vadd.f32 %v4468_v8, %v5642_v22  ;;  %v2043_v22 = vadd.f32 %v4472_v21, %v5650_v30  ;;  %v2386_v30 = vadd.f32 %v5680_v17, %v2040_v14  ;;  %v5932_v21 = vld [vmem:[#allocation8_spill] sm:$0xff]  ;;  %v5933_v17 = vld [vmem:[#allocation9_spill] sm:$0xff] }
 0x17c   : > { %v4539_v42 = vpop.f32.mrf.mxu0  ;;  %v4571_v8 = vpop.f32.mrf.mxu1  ;;  %v2390_v45 = vadd.f32 %v5932_v21, %v2044_v25  ;;  %v2393_v23 = vadd.f32 %v5933_v17, %v2047_v4  ;;  %v5944_v63 = vld [vmem:[#allocation21_spill] sm:$0xff]  ;;  %v5945_v4 = vld [vmem:[#allocation18_spill] sm:$0xff] }
 0x17d   : > { %v2385_v27 = vadd.f32 %v5674_v9, %v2039_v29  ;;  %v2389_v46 = vadd.f32 %v5682_v20, %v2043_v22  ;;  %v2659_v9 = vadd.f32 %v4531_v44, %v2384_v50  ;;  %v5935_v29 = vld [vmem:[#allocation10_spill] sm:$0xff]  ;;  %v2661_v35 = vadd.f32 %v2606_v32, %v2386_v30  ;;  %v5937_v44 = vld [vmem:[#allocation13_spill] sm:$0xff] }
 0x17e   : > { %v5724_v41 = vpop.f32.mrf.mxu0  ;;  %v3080_v18 = vpop.f32.mrf.mxu1  ;;  %v2391_v20 = vadd.f32 %v5935_v29, %v2045_v7  ;;  %v3114_v38 = vadd.f32 %v5937_v44, %v2656_v11  ;;  %v2667_v61 = vadd.f32 %v4539_v42, %v2392_v55  ;;  %v5773_v50 = vld [vmem:[%s5906_s3] ss:$0 sm:$0xff]  ;;  %v3121_v25 = vadd.f32 %v5944_v63, %v2663_v28 }
 0x17f   : > { %v2660_v26 = vadd.f32 %v4532_v49, %v2385_v27  ;;  %v3112_v49 = vadd.f32 %v5938_v47, %v2654_v51  ;;  %v3117_v39 = vadd.f32 %v5939_v54, %v2659_v9  ;;  %v5783_v53 = vadd.f32 %v5945_v4, %v2658_v24 }
 0x180   : > { %v4540_v60 = vpop.f32.mrf.mxu0  ;;  %v4572_v36 = vpop.f32.mrf.mxu1  ;;  %v5941_v52 = vld [vmem:[#allocation19_spill] sm:$0xff]  ;;  %v3119_v42 = vadd.f32 %v5721_v37, %v2661_v35  ;;  %v2665_v5 = vadd.f32 %v5724_v41, %v2390_v45  ;;  %v3125_v16 = vadd.f32 %v4571_v8, %v2667_v61 }
 0x181   : > { %v2664_v32 = vadd.f32 %v5941_v52, %v2389_v46  ;;  %v5776_v48 = vadd.f32 %v5943_v0, %v2660_v26  ;;  %v2668_v30 = vadd.f32 %v4540_v60, %v2393_v23 }
 0x182   : > { %v2625_v40 = vpop.f32.mrf.mxu0  ;;  %v5942_v10 = vld [vmem:[#allocation20_spill] sm:$0xff]  ;;  %v3083_v19 = vpop.f32.mrf.mxu1  ;;  %v3123_v17 = vadd.f32 %v3080_v18, %v2665_v5 }
 0x183   : > { %v2662_v14 = vadd.f32 %v5942_v10, %v2387_v12  ;;  %v3122_v13 = vadd.f32 %v5728_v62, %v2664_v32  ;;  %v2666_v55 = vadd.f32 %v2625_v40, %v2391_v20  ;;  %v3126_v23 = vadd.f32 %v4572_v36, %v2668_v30 }
 0x184   : > { %v4591_v34 = vpop.f32.mrf.mxu0  ;;  %v4599_v7 = vpop.f32.mrf.mxu1 }
 0x185   : > { %v3459_v56 = vadd.f32 %v4591_v34, %v3113_v2  ;;  %v3467_v11 = vadd.f32 %v4599_v7, %v3121_v25  ;;  %v3120_v12 = vadd.f32 %v5738_v1, %v2662_v14  ;;  %v3124_v29 = vadd.f32 %v3083_v19, %v2666_v55 }
 0x186   : > { %v3378_v22 = vpop.f32.mrf.mxu0  ;;  %v3410_v21 = vpop.f32.mrf.mxu1 }
 0x187   : > { %v3514_v27 = vmul.f32 %v5762_v43, %v3459_v56  ;;  %v3457_v3 = vadd.f32 %v3378_v22, %v3111_v33  ;;  %v3522_v41 = vmul.f32 %v5762_v43, %v3467_v11  ;;  %v3465_v45 = vadd.f32 %v3410_v21, %v3119_v42 }
 0x188   : > { %v4592_v57 = vpop.f32.mrf.mxu0  ;;  %v4600_v2 = vpop.f32.mrf.mxu1 }
 0x189   : > { %v3537_v46 = vadd.f32 %v5773_v50, %v3514_v27  ;;  %v3512_v51 = vmul.f32 %v5762_v43, %v3457_v3  ;;  %v3460_v9 = vadd.f32 %v4592_v57, %v3114_v38  ;;  %v3545_v62 = vadd.f32 %v5773_v50, %v3522_v41 }
 0x18a   : > { %v3381_v15 = vpop.f32.mrf.mxu0  ;;  %v3520_v8 = vmul.f32 %v5762_v43, %v3465_v45  ;;  %v3468_v40 = vadd.f32 %v4600_v2, %v3122_v13  ;;  %v3413_v31 = vpop.f32.mrf.mxu1 }
 0x18b   : > { %v3553_v37 = vmax.f32 %v3537_v46, 0.0  ;;  %v3535_v60 = vadd.f32 %v5773_v50, %v3512_v51  ;;  %v3515_v58 = vmul.f32 %v5762_v43, %v3460_v9  ;;  %v3458_v26 = vadd.f32 %v3381_v15, %v3112_v49 }
 0x18c   : > { %v4595_v28 = vpop.f32.mrf.mxu0  ;;  %v3561_v35 = vmax.f32 %v3545_v62, 0.0  ;;  %v3543_v36 = vadd.f32 %v5773_v50, %v3520_v8  ;;  %v3523_v34 = vmul.f32 %v5762_v43, %v3468_v40  ;;  %v3466_v44 = vadd.f32 %v3413_v31, %v3120_v12  ;;  %v4603_v54 = vpop.f32.mrf.mxu1 }
 0x18d   : > { %3569 = vst [vmem:[%s5794_s8 + $0x10] sm:$0xff] %v3553_v37  ;;  %v3551_v1 = vmax.f32 %v3535_v60, 0.0  ;;  %v3538_v18 = vadd.f32 %v5773_v50, %v3515_v58  ;;  %v3513_v20 = vmul.f32 %v5762_v43, %v3458_v26  ;;  %v3463_v33 = vadd.f32 %v4595_v28, %v3117_v39 }
 0x18e   : > { %v3394_v24 = vpop.f32.mrf.mxu0  ;;  %3577 = vst [vmem:[%s5794_s8 + $0x50] sm:$0xff] %v3561_v35  ;;  %v3559_v39 = vmax.f32 %v3543_v36, 0.0  ;;  %v3546_v52 = vadd.f32 %v5773_v50, %v3523_v34  ;;  %v3521_v32 = vmul.f32 %v5762_v43, %v3466_v44  ;;  %v3471_v10 = vadd.f32 %v4603_v54, %v3125_v16  ;;  %v3426_v22 = vpop.f32.mrf.mxu1 }
 0x18f   : > { %3567 = vst [vmem:[%s5794_s8] sm:$0xff] %v3551_v1  ;;  %v3554_v38 = vmax.f32 %v3538_v18, 0.0  ;;  %v3536_v47 = vadd.f32 %v5773_v50, %v3513_v20  ;;  %v3518_v49 = vmul.f32 %v5762_v43, %v3463_v33  ;;  %v3461_v56 = vadd.f32 %v3394_v24, %v3115_v6 }
 0x190   : > { %v4596_v59 = vpop.f32.mrf.mxu0  ;;  %3575 = vst [vmem:[%s5794_s8 + $0x40] sm:$0xff] %v3559_v39  ;;  %v3562_v63 = vmax.f32 %v3546_v52, 0.0  ;;  %v3544_v25 = vadd.f32 %v5773_v50, %v3521_v32  ;;  %v3526_v27 = vmul.f32 %v5762_v43, %v3471_v10  ;;  %v3469_v3 = vadd.f32 %v3426_v22, %v3123_v17  ;;  %v4604_v30 = vpop.f32.mrf.mxu1 }
 0x191   : > { %3570 = vst [vmem:[%s5794_s8 + $0x18] sm:$0xff] %v3554_v38  ;;  %v3552_v14 = vmax.f32 %v3536_v47, 0.0  ;;  %v3541_v61 = vadd.f32 %v5773_v50, %v3518_v49  ;;  %v3516_v19 = vmul.f32 %v5762_v43, %v3461_v56  ;;  %v3464_v6 = vadd.f32 %v4596_v59, %v5776_v48 }
 0x192   : > { %v3397_v0 = vpop.f32.mrf.mxu0  ;;  %3578 = vst [vmem:[%s5794_s8 + $0x58] sm:$0xff] %v3562_v63  ;;  %v3560_v7 = vmax.f32 %v3544_v25, 0.0  ;;  %v3549_v57 = vadd.f32 %v5773_v50, %v3526_v27  ;;  %v3524_v46 = vmul.f32 %v5762_v43, %v3469_v3  ;;  %v3472_v11 = vadd.f32 %v4604_v30, %v3126_v23  ;;  %v3429_v12 = vpop.f32.mrf.mxu1 }
 0x193   : > { %3568 = vst [vmem:[%s5794_s8 + $0x8] sm:$0xff] %v3552_v14  ;;  %v3557_v4 = vmax.f32 %v3541_v61, 0.0  ;;  %v3539_v42 = vadd.f32 %v5773_v50, %v3516_v19  ;;  %v3519_v5 = vmul.f32 %v5762_v43, %v3464_v6  ;;  %v3462_v48 = vadd.f32 %v3397_v0, %v5783_v53 }
 0x194   : > { %3576 = vst [vmem:[%s5794_s8 + $0x48] sm:$0xff] %v3560_v7  ;;  %v3565_v53 = vmax.f32 %v3549_v57, 0.0  ;;  %v3547_v16 = vadd.f32 %v5773_v50, %v3524_v46  ;;  %v3527_v55 = vmul.f32 %v5762_v43, %v3472_v11  ;;  %v3470_v21 = vadd.f32 %v3429_v12, %v3124_v29 }
 0x195   : > { %3573 = vst [vmem:[%s5794_s8 + $0x30] sm:$0xff] %v3557_v4  ;;  %v3555_v51 = vmax.f32 %v3539_v42, 0.0  ;;  %v3542_v9 = vadd.f32 %v5773_v50, %v3519_v5  ;;  %v3517_v13 = vmul.f32 %v5762_v43, %v3462_v48 }
 0x196   : > { %3581 = vst [vmem:[%s5794_s8 + $0x70] sm:$0xff] %v3565_v53  ;;  %v3563_v41 = vmax.f32 %v3547_v16, 0.0  ;;  %v3550_v60 = vadd.f32 %v5773_v50, %v3527_v55  ;;  %v3525_v45 = vmul.f32 %v5762_v43, %v3470_v21 }
 0x197   : > { %3571 = vst [vmem:[%s5794_s8 + $0x20] sm:$0xff] %v3555_v51  ;;  %v3558_v15 = vmax.f32 %v3542_v9, 0.0  ;;  %v3540_v37 = vadd.f32 %v5773_v50, %v3517_v13 }
 0x198   : > { %3579 = vst [vmem:[%s5794_s8 + $0x60] sm:$0xff] %v3563_v41  ;;  %v3566_v23 = vmax.f32 %v3550_v60, 0.0  ;;  %v3548_v58 = vadd.f32 %v5773_v50, %v3525_v45 }
 0x199   : > { %3574 = vst [vmem:[%s5794_s8 + $0x38] sm:$0xff] %v3558_v15  ;;  %v3556_v17 = vmax.f32 %v3540_v37, 0.0 }
 0x19a   : > { %3582 = vst [vmem:[%s5794_s8 + $0x78] sm:$0xff] %v3566_v23  ;;  %v3564_v43 = vmax.f32 %v3548_v58, 0.0 }
 0x19b   : > { %3572 = vst [vmem:[%s5794_s8 + $0x28] sm:$0xff] %v3556_v17 }
 0x19c   : > { %3580 = vst [vmem:[%s5794_s8 + $0x68] sm:$0xff] %v3564_v43 }
 0x19d   : > { %4805 = shalt.err (!%p4802_p7)
}
 0x19e   : > { %s4806_s12 = scalar_lea.hbm %s5844_s23, 2048  ;;  %s4810_s6 = scalar_lea.hbm %s5907_s4, 8192 }
 0x19f   : > { %p4807_p9 = scmp.ne.s32.totalorder %s5844_s23, %s4806_s12  ;;  %p4811_p12 = scmp.lt.s32.totalorder %s5844_s23, %s5907_s4 }
 0x1a0   : > { %p4812_p13 = scmp.lt.s32.totalorder %s4810_s6, %s4806_s12 }
 0x1a1   : > { %p4808_p10 = pnand %p4807_p9, %p4965_p3 }
 0x1a2   : > { %p4813_p0 = por %p4812_p13, %p4811_p12 }
 0x1a3   : > { %p4809_p11 = pneg %p4808_p10 }
 0x1a5   : > { %p4814_p1 = pnand %p4813_p0, %p4809_p11 }
 0x1a7   : > { %4817 = shalt.err (!%p4814_p1)
}
 0x1a8   : > { %s4887_s11 = smov 128   ;;  %s4888_s13 = smov 8  }
 0x1a9   : > { %4623 = dma.vmem_to_hbm [thread:$0]  (%p4965_p3), %s5846_s10, 2048, %s5844_s23, %s5852_s24, %s4887_s11, %s4887_s11, %s4888_s13  }
 0x1aa PF: > { %p4629_p2 = scmp.ge.s32.totalorder %s4884_s22, 2  ;;  %s3616_s30 = sand.u32 1, %s4856_s15  }
 0x1ab   : > { %s3617_s14 = scalar_lea.sflag [#allocation4], %s3616_s30 }
 0x1ac   : > { %p4626_p4 = pnand %p4629_p2, %p4974_p8 }
 0x1ae   : > { %p4627_p5 = pneg %p4626_p4 }
 0x1b0   : > { %4851 = dma.done.wait (%p4627_p5), %s3617_s14, 2048  }
 0x1b1   : > { %4853 = vsyncadd (%p4627_p5), %s3617_s14, 4294965248  ;;  %s17_s22 = sadd.s32 1, %s4884_s22   ;;  %s5946_s15 = smov %s4860_s16 }
 0x1b2   : > { %p14_p6 = scmp.ge.s32.totalorder %s17_s22, 6   ;;  %s5947_s16 = smov %s4864_s17 }
 0x1b3   : > { %s5948_s17 = smov %s4983_s7  ;;  %s5949_s18 = smov %s4876_s20 }
 0x1b4   : > { %s5950_s19 = smov %s4880_s21  ;;  %s5951_s20 = smov %s5954_s25 }
 0x1b5   : > { %s5952_s21 = smov %s5958_s26  ;;  %16 = sbr.rel (!%p14_p6) target bundleno = 5 (0x5), region = 90 }
 0x1ba   :  { %3622 = vsyncpa [#allocation4], 1 }
 0x1bb   :  { %3624 = vsyncpa [#allocation4 + $0x1], 1 }

</bundles_post_ra>
